<compile_context>
chip_gen: v6e
topology: v6e:2x2x1
jax: 0.10.0
libtpu: 0.0.40
codegen_flags: <defaults>
</compile_context>

<pallas_src>
import jax
import jax.numpy as jnp
from jax.experimental import pallas as pl
from jax.experimental.pallas import tpu as pltpu


def model_forward(x, w1, b1, w2, b2, *, band_h=8):
    # x: (N, C, H, W) f32; w1: (64, 3, 9, 9); b1: (64,); w2: (128, 64, 1, 1); b2: (128,)
    N, C, H, W = x.shape
    O1, C1, KH, KW = w1.shape
    assert C1 == C
    Ho, Wo = H - KH + 1, W - KW + 1
    n_taps = C * KH * KW
    hi = jax.lax.Precision.HIGHEST

    # --- exact trace-time fusion of conv1 + conv2[:, 0] --------------------
    w2vec = w2[0, :, 0, 0]                                   # (O1,)
    wf = jnp.einsum("o,ocij->cij", w2vec, w1, precision=hi)  # (C, KH, KW)
    bf = jnp.dot(w2vec, b1, precision=hi) + b2[0] - 3.89     # scalar, incl. shift
    w_flat = jnp.concatenate(
        [wf.reshape(n_taps), jnp.reshape(bf, (1,))]).astype(jnp.float32)  # SMEM

    # --- band the output rows; even step count >= 4 for v7x dual-TC --------
    assert band_h % 8 == 0 and Ho >= band_h, (Ho, band_h)
    n_bands = pl.cdiv(Ho, band_h)
    if n_bands % 2 == 1 and n_bands > 1:
        n_bands += 1                    # pad to even; extra band is clamped+dropped
    Ho_pad = n_bands * band_h

    def kernel(w_ref, x_ref, o_ref):
        # w_ref: SMEM (n_taps+1,) f32   (fused taps, fused bias last)
        # x_ref: VMEM (1, C, H, W) f32  (whole per-batch input, constant index
        #                                map -> DMA'd once per core)
        # o_ref: VMEM (1, band_h, Wo) f32 output band
        b = pl.program_id(1)
        # Clamp so the padded last band recomputes valid rows (never OOB);
        # its output rows land in the padded region and are sliced off.
        r0 = jnp.minimum(b * band_h, Ho - band_h)
        if (Ho - band_h) % 8 == 0:
            r0 = pl.multiple_of(r0, 8)

        # Hoisted sublane-offset row-band loads: one per (c, i) tap row.
        rows = [[x_ref[0, c, pl.ds(r0 + i, band_h), :] for i in range(KH)]
                for c in range(C)]

        # Start from the fused bias; per kw offset accumulate the (c,i) taps
        # at full width, then take one static lane-shifted slice per j.
        acc = jnp.full((band_h, Wo), w_ref[n_taps], dtype=jnp.float32)
        for j in range(KW):
            g = None
            for c in range(C):
                for i in range(KH):
                    t = w_ref[(c * KH + i) * KW + j] * rows[c][i]
                    g = t if g is None else g + t
            acc = acc + g[:, j:j + Wo]

        o_ref[0, :, :] = jnp.maximum(jnp.tanh(acc), 0.0)

    out = pl.pallas_call(
        kernel,
        out_shape=jax.ShapeDtypeStruct((N, Ho_pad, Wo), jnp.float32),
        grid=(N, n_bands),
        in_specs=[
            pl.BlockSpec(memory_space=pltpu.MemorySpace.SMEM),        # fused taps+bias
            pl.BlockSpec((1, C, H, W), lambda n, b: (n, 0, 0, 0)),    # raw input slab
        ],
        out_specs=pl.BlockSpec((1, band_h, Wo), lambda n, b: (n, b, 0)),
        compiler_params=pltpu.CompilerParams(
            dimension_semantics=("parallel", "parallel")),
    )(w_flat, x)

    return out[:, :Ho, :]


def reference_forward(x, w1, b1, w2, b2):
    dn = ("NCHW", "OIHW", "NCHW")
    hi = jax.lax.Precision.HIGHEST
    v1 = jax.lax.conv_general_dilated(x, w1, (1, 1), "VALID",
                                      dimension_numbers=dn, precision=hi)
    v1 = v1 + b1[None, :, None, None]
    v2 = jax.lax.conv_general_dilated(v1, w2, (1, 1), "VALID",
                                      dimension_numbers=dn, precision=hi)
    v2 = v2 + b2[None, :, None, None]
    v5 = jnp.maximum(jnp.tanh(v2 - 3.89), 0.0)
    return v5[:, 0, :, :]


if __name__ == "__main__":
    key = jax.random.PRNGKey(0)
    k_x, k_w1, k_b1, k_w2, k_b2 = jax.random.split(key, 5)

    # Shapes from the module spec: conv1 requires Cin=3; spatial 64 keeps it small.
    N, C, H, W = 1, 3, 64, 64
    x = jax.random.normal(k_x, (N, C, H, W), dtype=jnp.float32)

    # Deterministic synthetic parameters (scaled so the post -3.89/tanh/relu
    # output is not trivially all-zero).
    w1 = jax.random.normal(k_w1, (64, 3, 9, 9), dtype=jnp.float32) * 0.2
    b1 = jax.random.normal(k_b1, (64,), dtype=jnp.float32) * 0.2
    w2 = jax.random.normal(k_w2, (128, 64, 1, 1), dtype=jnp.float32) * 0.2
    b2 = jax.random.normal(k_b2, (128,), dtype=jnp.float32) * 0.2

    fwd = jax.jit(model_forward)
    out = jax.block_until_ready(fwd(x, w1, b1, w2, b2))
    ref = jax.block_until_ready(reference_forward(x, w1, b1, w2, b2))

    assert out.shape == ref.shape == (N, H - 8, W - 8), (out.shape, ref.shape)
    max_err = float(jnp.max(jnp.abs(out - ref)))
    assert jnp.allclose(out, ref, atol=1e-3, rtol=1e-3), \
        f"mismatch vs reference, max abs err={max_err}"

    print("KERNEL_OK")
</pallas_src>

<mosaic_0001>
module attributes {stable_mosaic.version = 11 : i64} {
  func.func @kernel(%arg0: i32, %arg1: i32, %arg2: memref<244xf32, #tpu.memory_space<smem>>, %arg3: memref<1x3x64x64xf32, #tpu.memory_space<vmem>>, %arg4: memref<1x8x56xf32, #tpu.memory_space<vmem>>) attributes {dimension_semantics = [#tpu.dimension_semantics<parallel>, #tpu.dimension_semantics<parallel>], iteration_bounds = array<i64: 1, 8>, scalar_prefetch = 0 : i64, scratch_operands = 0 : i64, tpu.core_type = #tpu.core_type<tc>, window_params = [{transform_indices = @transform_0, window_bounds = array<i64: 244>}, {transform_indices = @transform_1, window_bounds = array<i64: 1, 3, 64, 64>}, {transform_indices = @transform_2, window_bounds = array<i64: 1, 8, 56>}]} {
    %c8_i32 = arith.constant 8 : i32
    %0 = arith.muli %arg1, %c8_i32 : i32
    %c48_i32 = arith.constant 48 : i32
    %1 = arith.minsi %0, %c48_i32 : i32
    %2 = tpu.assume_multiple %1, 8 : i32
    %c0_i32 = arith.constant 0 : i32
    %3 = arith.addi %2, %c0_i32 : i32
    %c0 = arith.constant 0 : index
    %c0_0 = arith.constant 0 : index
    %4 = arith.index_cast %3 : i32 to index
    %c0_1 = arith.constant 0 : index
    %5 = vector.load %arg3[%c0, %c0_0, %4, %c0_1] : memref<1x3x64x64xf32, #tpu.memory_space<vmem>>, vector<1x1x8x64xf32>
    %6 = vector.shape_cast %5 : vector<1x1x8x64xf32> to vector<8x64xf32>
    %c1_i32 = arith.constant 1 : i32
    %7 = arith.addi %2, %c1_i32 : i32
    %c0_2 = arith.constant 0 : index
    %c0_3 = arith.constant 0 : index
    %8 = arith.index_cast %7 : i32 to index
    %c0_4 = arith.constant 0 : index
    %9 = vector.load %arg3[%c0_2, %c0_3, %8, %c0_4] : memref<1x3x64x64xf32, #tpu.memory_space<vmem>>, vector<1x1x8x64xf32>
    %10 = vector.shape_cast %9 : vector<1x1x8x64xf32> to vector<8x64xf32>
    %c2_i32 = arith.constant 2 : i32
    %11 = arith.addi %2, %c2_i32 : i32
    %c0_5 = arith.constant 0 : index
    %c0_6 = arith.constant 0 : index
    %12 = arith.index_cast %11 : i32 to index
    %c0_7 = arith.constant 0 : index
    %13 = vector.load %arg3[%c0_5, %c0_6, %12, %c0_7] : memref<1x3x64x64xf32, #tpu.memory_space<vmem>>, vector<1x1x8x64xf32>
    %14 = vector.shape_cast %13 : vector<1x1x8x64xf32> to vector<8x64xf32>
    %c3_i32 = arith.constant 3 : i32
    %15 = arith.addi %2, %c3_i32 : i32
    %c0_8 = arith.constant 0 : index
    %c0_9 = arith.constant 0 : index
    %16 = arith.index_cast %15 : i32 to index
    %c0_10 = arith.constant 0 : index
    %17 = vector.load %arg3[%c0_8, %c0_9, %16, %c0_10] : memref<1x3x64x64xf32, #tpu.memory_space<vmem>>, vector<1x1x8x64xf32>
    %18 = vector.shape_cast %17 : vector<1x1x8x64xf32> to vector<8x64xf32>
    %c4_i32 = arith.constant 4 : i32
    %19 = arith.addi %2, %c4_i32 : i32
    %c0_11 = arith.constant 0 : index
    %c0_12 = arith.constant 0 : index
    %20 = arith.index_cast %19 : i32 to index
    %c0_13 = arith.constant 0 : index
    %21 = vector.load %arg3[%c0_11, %c0_12, %20, %c0_13] : memref<1x3x64x64xf32, #tpu.memory_space<vmem>>, vector<1x1x8x64xf32>
    %22 = vector.shape_cast %21 : vector<1x1x8x64xf32> to vector<8x64xf32>
    %c5_i32 = arith.constant 5 : i32
    %23 = arith.addi %2, %c5_i32 : i32
    %c0_14 = arith.constant 0 : index
    %c0_15 = arith.constant 0 : index
    %24 = arith.index_cast %23 : i32 to index
    %c0_16 = arith.constant 0 : index
    %25 = vector.load %arg3[%c0_14, %c0_15, %24, %c0_16] : memref<1x3x64x64xf32, #tpu.memory_space<vmem>>, vector<1x1x8x64xf32>
    %26 = vector.shape_cast %25 : vector<1x1x8x64xf32> to vector<8x64xf32>
    %c6_i32 = arith.constant 6 : i32
    %27 = arith.addi %2, %c6_i32 : i32
    %c0_17 = arith.constant 0 : index
    %c0_18 = arith.constant 0 : index
    %28 = arith.index_cast %27 : i32 to index
    %c0_19 = arith.constant 0 : index
    %29 = vector.load %arg3[%c0_17, %c0_18, %28, %c0_19] : memref<1x3x64x64xf32, #tpu.memory_space<vmem>>, vector<1x1x8x64xf32>
    %30 = vector.shape_cast %29 : vector<1x1x8x64xf32> to vector<8x64xf32>
    %c7_i32 = arith.constant 7 : i32
    %31 = arith.addi %2, %c7_i32 : i32
    %c0_20 = arith.constant 0 : index
    %c0_21 = arith.constant 0 : index
    %32 = arith.index_cast %31 : i32 to index
    %c0_22 = arith.constant 0 : index
    %33 = vector.load %arg3[%c0_20, %c0_21, %32, %c0_22] : memref<1x3x64x64xf32, #tpu.memory_space<vmem>>, vector<1x1x8x64xf32>
    %34 = vector.shape_cast %33 : vector<1x1x8x64xf32> to vector<8x64xf32>
    %c8_i32_23 = arith.constant 8 : i32
    %35 = arith.addi %2, %c8_i32_23 : i32
    %c0_24 = arith.constant 0 : index
    %c0_25 = arith.constant 0 : index
    %36 = arith.index_cast %35 : i32 to index
    %c0_26 = arith.constant 0 : index
    %37 = vector.load %arg3[%c0_24, %c0_25, %36, %c0_26] : memref<1x3x64x64xf32, #tpu.memory_space<vmem>>, vector<1x1x8x64xf32>
    %38 = vector.shape_cast %37 : vector<1x1x8x64xf32> to vector<8x64xf32>
    %c0_i32_27 = arith.constant 0 : i32
    %39 = arith.addi %2, %c0_i32_27 : i32
    %c0_28 = arith.constant 0 : index
    %c1 = arith.constant 1 : index
    %40 = arith.index_cast %39 : i32 to index
    %c0_29 = arith.constant 0 : index
    %41 = vector.load %arg3[%c0_28, %c1, %40, %c0_29] : memref<1x3x64x64xf32, #tpu.memory_space<vmem>>, vector<1x1x8x64xf32>
    %42 = vector.shape_cast %41 : vector<1x1x8x64xf32> to vector<8x64xf32>
    %c1_i32_30 = arith.constant 1 : i32
    %43 = arith.addi %2, %c1_i32_30 : i32
    %c0_31 = arith.constant 0 : index
    %c1_32 = arith.constant 1 : index
    %44 = arith.index_cast %43 : i32 to index
    %c0_33 = arith.constant 0 : index
    %45 = vector.load %arg3[%c0_31, %c1_32, %44, %c0_33] : memref<1x3x64x64xf32, #tpu.memory_space<vmem>>, vector<1x1x8x64xf32>
    %46 = vector.shape_cast %45 : vector<1x1x8x64xf32> to vector<8x64xf32>
    %c2_i32_34 = arith.constant 2 : i32
    %47 = arith.addi %2, %c2_i32_34 : i32
    %c0_35 = arith.constant 0 : index
    %c1_36 = arith.constant 1 : index
    %48 = arith.index_cast %47 : i32 to index
    %c0_37 = arith.constant 0 : index
    %49 = vector.load %arg3[%c0_35, %c1_36, %48, %c0_37] : memref<1x3x64x64xf32, #tpu.memory_space<vmem>>, vector<1x1x8x64xf32>
    %50 = vector.shape_cast %49 : vector<1x1x8x64xf32> to vector<8x64xf32>
    %c3_i32_38 = arith.constant 3 : i32
    %51 = arith.addi %2, %c3_i32_38 : i32
    %c0_39 = arith.constant 0 : index
    %c1_40 = arith.constant 1 : index
    %52 = arith.index_cast %51 : i32 to index
    %c0_41 = arith.constant 0 : index
    %53 = vector.load %arg3[%c0_39, %c1_40, %52, %c0_41] : memref<1x3x64x64xf32, #tpu.memory_space<vmem>>, vector<1x1x8x64xf32>
    %54 = vector.shape_cast %53 : vector<1x1x8x64xf32> to vector<8x64xf32>
    %c4_i32_42 = arith.constant 4 : i32
    %55 = arith.addi %2, %c4_i32_42 : i32
    %c0_43 = arith.constant 0 : index
    %c1_44 = arith.constant 1 : index
    %56 = arith.index_cast %55 : i32 to index
    %c0_45 = arith.constant 0 : index
    %57 = vector.load %arg3[%c0_43, %c1_44, %56, %c0_45] : memref<1x3x64x64xf32, #tpu.memory_space<vmem>>, vector<1x1x8x64xf32>
    %58 = vector.shape_cast %57 : vector<1x1x8x64xf32> to vector<8x64xf32>
    %c5_i32_46 = arith.constant 5 : i32
    %59 = arith.addi %2, %c5_i32_46 : i32
    %c0_47 = arith.constant 0 : index
    %c1_48 = arith.constant 1 : index
    %60 = arith.index_cast %59 : i32 to index
    %c0_49 = arith.constant 0 : index
    %61 = vector.load %arg3[%c0_47, %c1_48, %60, %c0_49] : memref<1x3x64x64xf32, #tpu.memory_space<vmem>>, vector<1x1x8x64xf32>
    %62 = vector.shape_cast %61 : vector<1x1x8x64xf32> to vector<8x64xf32>
    %c6_i32_50 = arith.constant 6 : i32
    %63 = arith.addi %2, %c6_i32_50 : i32
    %c0_51 = arith.constant 0 : index
    %c1_52 = arith.constant 1 : index
    %64 = arith.index_cast %63 : i32 to index
    %c0_53 = arith.constant 0 : index
    %65 = vector.load %arg3[%c0_51, %c1_52, %64, %c0_53] : memref<1x3x64x64xf32, #tpu.memory_space<vmem>>, vector<1x1x8x64xf32>
    %66 = vector.shape_cast %65 : vector<1x1x8x64xf32> to vector<8x64xf32>
    %c7_i32_54 = arith.constant 7 : i32
    %67 = arith.addi %2, %c7_i32_54 : i32
    %c0_55 = arith.constant 0 : index
    %c1_56 = arith.constant 1 : index
    %68 = arith.index_cast %67 : i32 to index
    %c0_57 = arith.constant 0 : index
    %69 = vector.load %arg3[%c0_55, %c1_56, %68, %c0_57] : memref<1x3x64x64xf32, #tpu.memory_space<vmem>>, vector<1x1x8x64xf32>
    %70 = vector.shape_cast %69 : vector<1x1x8x64xf32> to vector<8x64xf32>
    %c8_i32_58 = arith.constant 8 : i32
    %71 = arith.addi %2, %c8_i32_58 : i32
    %c0_59 = arith.constant 0 : index
    %c1_60 = arith.constant 1 : index
    %72 = arith.index_cast %71 : i32 to index
    %c0_61 = arith.constant 0 : index
    %73 = vector.load %arg3[%c0_59, %c1_60, %72, %c0_61] : memref<1x3x64x64xf32, #tpu.memory_space<vmem>>, vector<1x1x8x64xf32>
    %74 = vector.shape_cast %73 : vector<1x1x8x64xf32> to vector<8x64xf32>
    %c0_i32_62 = arith.constant 0 : i32
    %75 = arith.addi %2, %c0_i32_62 : i32
    %c0_63 = arith.constant 0 : index
    %c2 = arith.constant 2 : index
    %76 = arith.index_cast %75 : i32 to index
    %c0_64 = arith.constant 0 : index
    %77 = vector.load %arg3[%c0_63, %c2, %76, %c0_64] : memref<1x3x64x64xf32, #tpu.memory_space<vmem>>, vector<1x1x8x64xf32>
    %78 = vector.shape_cast %77 : vector<1x1x8x64xf32> to vector<8x64xf32>
    %c1_i32_65 = arith.constant 1 : i32
    %79 = arith.addi %2, %c1_i32_65 : i32
    %c0_66 = arith.constant 0 : index
    %c2_67 = arith.constant 2 : index
    %80 = arith.index_cast %79 : i32 to index
    %c0_68 = arith.constant 0 : index
    %81 = vector.load %arg3[%c0_66, %c2_67, %80, %c0_68] : memref<1x3x64x64xf32, #tpu.memory_space<vmem>>, vector<1x1x8x64xf32>
    %82 = vector.shape_cast %81 : vector<1x1x8x64xf32> to vector<8x64xf32>
    %c2_i32_69 = arith.constant 2 : i32
    %83 = arith.addi %2, %c2_i32_69 : i32
    %c0_70 = arith.constant 0 : index
    %c2_71 = arith.constant 2 : index
    %84 = arith.index_cast %83 : i32 to index
    %c0_72 = arith.constant 0 : index
    %85 = vector.load %arg3[%c0_70, %c2_71, %84, %c0_72] : memref<1x3x64x64xf32, #tpu.memory_space<vmem>>, vector<1x1x8x64xf32>
    %86 = vector.shape_cast %85 : vector<1x1x8x64xf32> to vector<8x64xf32>
    %c3_i32_73 = arith.constant 3 : i32
    %87 = arith.addi %2, %c3_i32_73 : i32
    %c0_74 = arith.constant 0 : index
    %c2_75 = arith.constant 2 : index
    %88 = arith.index_cast %87 : i32 to index
    %c0_76 = arith.constant 0 : index
    %89 = vector.load %arg3[%c0_74, %c2_75, %88, %c0_76] : memref<1x3x64x64xf32, #tpu.memory_space<vmem>>, vector<1x1x8x64xf32>
    %90 = vector.shape_cast %89 : vector<1x1x8x64xf32> to vector<8x64xf32>
    %c4_i32_77 = arith.constant 4 : i32
    %91 = arith.addi %2, %c4_i32_77 : i32
    %c0_78 = arith.constant 0 : index
    %c2_79 = arith.constant 2 : index
    %92 = arith.index_cast %91 : i32 to index
    %c0_80 = arith.constant 0 : index
    %93 = vector.load %arg3[%c0_78, %c2_79, %92, %c0_80] : memref<1x3x64x64xf32, #tpu.memory_space<vmem>>, vector<1x1x8x64xf32>
    %94 = vector.shape_cast %93 : vector<1x1x8x64xf32> to vector<8x64xf32>
    %c5_i32_81 = arith.constant 5 : i32
    %95 = arith.addi %2, %c5_i32_81 : i32
    %c0_82 = arith.constant 0 : index
    %c2_83 = arith.constant 2 : index
    %96 = arith.index_cast %95 : i32 to index
    %c0_84 = arith.constant 0 : index
    %97 = vector.load %arg3[%c0_82, %c2_83, %96, %c0_84] : memref<1x3x64x64xf32, #tpu.memory_space<vmem>>, vector<1x1x8x64xf32>
    %98 = vector.shape_cast %97 : vector<1x1x8x64xf32> to vector<8x64xf32>
    %c6_i32_85 = arith.constant 6 : i32
    %99 = arith.addi %2, %c6_i32_85 : i32
    %c0_86 = arith.constant 0 : index
    %c2_87 = arith.constant 2 : index
    %100 = arith.index_cast %99 : i32 to index
    %c0_88 = arith.constant 0 : index
    %101 = vector.load %arg3[%c0_86, %c2_87, %100, %c0_88] : memref<1x3x64x64xf32, #tpu.memory_space<vmem>>, vector<1x1x8x64xf32>
    %102 = vector.shape_cast %101 : vector<1x1x8x64xf32> to vector<8x64xf32>
    %c7_i32_89 = arith.constant 7 : i32
    %103 = arith.addi %2, %c7_i32_89 : i32
    %c0_90 = arith.constant 0 : index
    %c2_91 = arith.constant 2 : index
    %104 = arith.index_cast %103 : i32 to index
    %c0_92 = arith.constant 0 : index
    %105 = vector.load %arg3[%c0_90, %c2_91, %104, %c0_92] : memref<1x3x64x64xf32, #tpu.memory_space<vmem>>, vector<1x1x8x64xf32>
    %106 = vector.shape_cast %105 : vector<1x1x8x64xf32> to vector<8x64xf32>
    %c8_i32_93 = arith.constant 8 : i32
    %107 = arith.addi %2, %c8_i32_93 : i32
    %c0_94 = arith.constant 0 : index
    %c2_95 = arith.constant 2 : index
    %108 = arith.index_cast %107 : i32 to index
    %c0_96 = arith.constant 0 : index
    %109 = vector.load %arg3[%c0_94, %c2_95, %108, %c0_96] : memref<1x3x64x64xf32, #tpu.memory_space<vmem>>, vector<1x1x8x64xf32>
    %110 = vector.shape_cast %109 : vector<1x1x8x64xf32> to vector<8x64xf32>
    %c243 = arith.constant 243 : index
    %111 = memref.load %arg2[%c243] : memref<244xf32, #tpu.memory_space<smem>>
    %112 = vector.broadcast %111 : f32 to vector<8x56xf32>
    %c0_97 = arith.constant 0 : index
    %113 = memref.load %arg2[%c0_97] : memref<244xf32, #tpu.memory_space<smem>>
    %114 = vector.broadcast %113 : f32 to vector<8x64xf32>
    %115 = arith.mulf %114, %6 : vector<8x64xf32>
    %c9 = arith.constant 9 : index
    %116 = memref.load %arg2[%c9] : memref<244xf32, #tpu.memory_space<smem>>
    %117 = vector.broadcast %116 : f32 to vector<8x64xf32>
    %118 = arith.mulf %117, %10 : vector<8x64xf32>
    %119 = arith.addf %115, %118 : vector<8x64xf32>
    %c18 = arith.constant 18 : index
    %120 = memref.load %arg2[%c18] : memref<244xf32, #tpu.memory_space<smem>>
    %121 = vector.broadcast %120 : f32 to vector<8x64xf32>
    %122 = arith.mulf %121, %14 : vector<8x64xf32>
    %123 = arith.addf %119, %122 : vector<8x64xf32>
    %c27 = arith.constant 27 : index
    %124 = memref.load %arg2[%c27] : memref<244xf32, #tpu.memory_space<smem>>
    %125 = vector.broadcast %124 : f32 to vector<8x64xf32>
    %126 = arith.mulf %125, %18 : vector<8x64xf32>
    %127 = arith.addf %123, %126 : vector<8x64xf32>
    %c36 = arith.constant 36 : index
    %128 = memref.load %arg2[%c36] : memref<244xf32, #tpu.memory_space<smem>>
    %129 = vector.broadcast %128 : f32 to vector<8x64xf32>
    %130 = arith.mulf %129, %22 : vector<8x64xf32>
    %131 = arith.addf %127, %130 : vector<8x64xf32>
    %c45 = arith.constant 45 : index
    %132 = memref.load %arg2[%c45] : memref<244xf32, #tpu.memory_space<smem>>
    %133 = vector.broadcast %132 : f32 to vector<8x64xf32>
    %134 = arith.mulf %133, %26 : vector<8x64xf32>
    %135 = arith.addf %131, %134 : vector<8x64xf32>
    %c54 = arith.constant 54 : index
    %136 = memref.load %arg2[%c54] : memref<244xf32, #tpu.memory_space<smem>>
    %137 = vector.broadcast %136 : f32 to vector<8x64xf32>
    %138 = arith.mulf %137, %30 : vector<8x64xf32>
    %139 = arith.addf %135, %138 : vector<8x64xf32>
    %c63 = arith.constant 63 : index
    %140 = memref.load %arg2[%c63] : memref<244xf32, #tpu.memory_space<smem>>
    %141 = vector.broadcast %140 : f32 to vector<8x64xf32>
    %142 = arith.mulf %141, %34 : vector<8x64xf32>
    %143 = arith.addf %139, %142 : vector<8x64xf32>
    %c72 = arith.constant 72 : index
    %144 = memref.load %arg2[%c72] : memref<244xf32, #tpu.memory_space<smem>>
    %145 = vector.broadcast %144 : f32 to vector<8x64xf32>
    %146 = arith.mulf %145, %38 : vector<8x64xf32>
    %147 = arith.addf %143, %146 : vector<8x64xf32>
    %c81 = arith.constant 81 : index
    %148 = memref.load %arg2[%c81] : memref<244xf32, #tpu.memory_space<smem>>
    %149 = vector.broadcast %148 : f32 to vector<8x64xf32>
    %150 = arith.mulf %149, %42 : vector<8x64xf32>
    %151 = arith.addf %147, %150 : vector<8x64xf32>
    %c90 = arith.constant 90 : index
    %152 = memref.load %arg2[%c90] : memref<244xf32, #tpu.memory_space<smem>>
    %153 = vector.broadcast %152 : f32 to vector<8x64xf32>
    %154 = arith.mulf %153, %46 : vector<8x64xf32>
    %155 = arith.addf %151, %154 : vector<8x64xf32>
    %c99 = arith.constant 99 : index
    %156 = memref.load %arg2[%c99] : memref<244xf32, #tpu.memory_space<smem>>
    %157 = vector.broadcast %156 : f32 to vector<8x64xf32>
    %158 = arith.mulf %157, %50 : vector<8x64xf32>
    %159 = arith.addf %155, %158 : vector<8x64xf32>
    %c108 = arith.constant 108 : index
    %160 = memref.load %arg2[%c108] : memref<244xf32, #tpu.memory_space<smem>>
    %161 = vector.broadcast %160 : f32 to vector<8x64xf32>
    %162 = arith.mulf %161, %54 : vector<8x64xf32>
    %163 = arith.addf %159, %162 : vector<8x64xf32>
    %c117 = arith.constant 117 : index
    %164 = memref.load %arg2[%c117] : memref<244xf32, #tpu.memory_space<smem>>
    %165 = vector.broadcast %164 : f32 to vector<8x64xf32>
    %166 = arith.mulf %165, %58 : vector<8x64xf32>
    %167 = arith.addf %163, %166 : vector<8x64xf32>
    %c126 = arith.constant 126 : index
    %168 = memref.load %arg2[%c126] : memref<244xf32, #tpu.memory_space<smem>>
    %169 = vector.broadcast %168 : f32 to vector<8x64xf32>
    %170 = arith.mulf %169, %62 : vector<8x64xf32>
    %171 = arith.addf %167, %170 : vector<8x64xf32>
    %c135 = arith.constant 135 : index
    %172 = memref.load %arg2[%c135] : memref<244xf32, #tpu.memory_space<smem>>
    %173 = vector.broadcast %172 : f32 to vector<8x64xf32>
    %174 = arith.mulf %173, %66 : vector<8x64xf32>
    %175 = arith.addf %171, %174 : vector<8x64xf32>
    %c144 = arith.constant 144 : index
    %176 = memref.load %arg2[%c144] : memref<244xf32, #tpu.memory_space<smem>>
    %177 = vector.broadcast %176 : f32 to vector<8x64xf32>
    %178 = arith.mulf %177, %70 : vector<8x64xf32>
    %179 = arith.addf %175, %178 : vector<8x64xf32>
    %c153 = arith.constant 153 : index
    %180 = memref.load %arg2[%c153] : memref<244xf32, #tpu.memory_space<smem>>
    %181 = vector.broadcast %180 : f32 to vector<8x64xf32>
    %182 = arith.mulf %181, %74 : vector<8x64xf32>
    %183 = arith.addf %179, %182 : vector<8x64xf32>
    %c162 = arith.constant 162 : index
    %184 = memref.load %arg2[%c162] : memref<244xf32, #tpu.memory_space<smem>>
    %185 = vector.broadcast %184 : f32 to vector<8x64xf32>
    %186 = arith.mulf %185, %78 : vector<8x64xf32>
    %187 = arith.addf %183, %186 : vector<8x64xf32>
    %c171 = arith.constant 171 : index
    %188 = memref.load %arg2[%c171] : memref<244xf32, #tpu.memory_space<smem>>
    %189 = vector.broadcast %188 : f32 to vector<8x64xf32>
    %190 = arith.mulf %189, %82 : vector<8x64xf32>
    %191 = arith.addf %187, %190 : vector<8x64xf32>
    %c180 = arith.constant 180 : index
    %192 = memref.load %arg2[%c180] : memref<244xf32, #tpu.memory_space<smem>>
    %193 = vector.broadcast %192 : f32 to vector<8x64xf32>
    %194 = arith.mulf %193, %86 : vector<8x64xf32>
    %195 = arith.addf %191, %194 : vector<8x64xf32>
    %c189 = arith.constant 189 : index
    %196 = memref.load %arg2[%c189] : memref<244xf32, #tpu.memory_space<smem>>
    %197 = vector.broadcast %196 : f32 to vector<8x64xf32>
    %198 = arith.mulf %197, %90 : vector<8x64xf32>
    %199 = arith.addf %195, %198 : vector<8x64xf32>
    %c198 = arith.constant 198 : index
    %200 = memref.load %arg2[%c198] : memref<244xf32, #tpu.memory_space<smem>>
    %201 = vector.broadcast %200 : f32 to vector<8x64xf32>
    %202 = arith.mulf %201, %94 : vector<8x64xf32>
    %203 = arith.addf %199, %202 : vector<8x64xf32>
    %c207 = arith.constant 207 : index
    %204 = memref.load %arg2[%c207] : memref<244xf32, #tpu.memory_space<smem>>
    %205 = vector.broadcast %204 : f32 to vector<8x64xf32>
    %206 = arith.mulf %205, %98 : vector<8x64xf32>
    %207 = arith.addf %203, %206 : vector<8x64xf32>
    %c216 = arith.constant 216 : index
    %208 = memref.load %arg2[%c216] : memref<244xf32, #tpu.memory_space<smem>>
    %209 = vector.broadcast %208 : f32 to vector<8x64xf32>
    %210 = arith.mulf %209, %102 : vector<8x64xf32>
    %211 = arith.addf %207, %210 : vector<8x64xf32>
    %c225 = arith.constant 225 : index
    %212 = memref.load %arg2[%c225] : memref<244xf32, #tpu.memory_space<smem>>
    %213 = vector.broadcast %212 : f32 to vector<8x64xf32>
    %214 = arith.mulf %213, %106 : vector<8x64xf32>
    %215 = arith.addf %211, %214 : vector<8x64xf32>
    %c234 = arith.constant 234 : index
    %216 = memref.load %arg2[%c234] : memref<244xf32, #tpu.memory_space<smem>>
    %217 = vector.broadcast %216 : f32 to vector<8x64xf32>
    %218 = arith.mulf %217, %110 : vector<8x64xf32>
    %219 = arith.addf %215, %218 : vector<8x64xf32>
    %220 = vector.extract_strided_slice %219 {offsets = [0, 0], sizes = [8, 56], strides = [1, 1]} : vector<8x64xf32> to vector<8x56xf32>
    %221 = arith.addf %112, %220 : vector<8x56xf32>
    %c1_98 = arith.constant 1 : index
    %222 = memref.load %arg2[%c1_98] : memref<244xf32, #tpu.memory_space<smem>>
    %223 = vector.broadcast %222 : f32 to vector<8x64xf32>
    %224 = arith.mulf %223, %6 : vector<8x64xf32>
    %c10 = arith.constant 10 : index
    %225 = memref.load %arg2[%c10] : memref<244xf32, #tpu.memory_space<smem>>
    %226 = vector.broadcast %225 : f32 to vector<8x64xf32>
    %227 = arith.mulf %226, %10 : vector<8x64xf32>
    %228 = arith.addf %224, %227 : vector<8x64xf32>
    %c19 = arith.constant 19 : index
    %229 = memref.load %arg2[%c19] : memref<244xf32, #tpu.memory_space<smem>>
    %230 = vector.broadcast %229 : f32 to vector<8x64xf32>
    %231 = arith.mulf %230, %14 : vector<8x64xf32>
    %232 = arith.addf %228, %231 : vector<8x64xf32>
    %c28 = arith.constant 28 : index
    %233 = memref.load %arg2[%c28] : memref<244xf32, #tpu.memory_space<smem>>
    %234 = vector.broadcast %233 : f32 to vector<8x64xf32>
    %235 = arith.mulf %234, %18 : vector<8x64xf32>
    %236 = arith.addf %232, %235 : vector<8x64xf32>
    %c37 = arith.constant 37 : index
    %237 = memref.load %arg2[%c37] : memref<244xf32, #tpu.memory_space<smem>>
    %238 = vector.broadcast %237 : f32 to vector<8x64xf32>
    %239 = arith.mulf %238, %22 : vector<8x64xf32>
    %240 = arith.addf %236, %239 : vector<8x64xf32>
    %c46 = arith.constant 46 : index
    %241 = memref.load %arg2[%c46] : memref<244xf32, #tpu.memory_space<smem>>
    %242 = vector.broadcast %241 : f32 to vector<8x64xf32>
    %243 = arith.mulf %242, %26 : vector<8x64xf32>
    %244 = arith.addf %240, %243 : vector<8x64xf32>
    %c55 = arith.constant 55 : index
    %245 = memref.load %arg2[%c55] : memref<244xf32, #tpu.memory_space<smem>>
    %246 = vector.broadcast %245 : f32 to vector<8x64xf32>
    %247 = arith.mulf %246, %30 : vector<8x64xf32>
    %248 = arith.addf %244, %247 : vector<8x64xf32>
    %c64 = arith.constant 64 : index
    %249 = memref.load %arg2[%c64] : memref<244xf32, #tpu.memory_space<smem>>
    %250 = vector.broadcast %249 : f32 to vector<8x64xf32>
    %251 = arith.mulf %250, %34 : vector<8x64xf32>
    %252 = arith.addf %248, %251 : vector<8x64xf32>
    %c73 = arith.constant 73 : index
    %253 = memref.load %arg2[%c73] : memref<244xf32, #tpu.memory_space<smem>>
    %254 = vector.broadcast %253 : f32 to vector<8x64xf32>
    %255 = arith.mulf %254, %38 : vector<8x64xf32>
    %256 = arith.addf %252, %255 : vector<8x64xf32>
    %c82 = arith.constant 82 : index
    %257 = memref.load %arg2[%c82] : memref<244xf32, #tpu.memory_space<smem>>
    %258 = vector.broadcast %257 : f32 to vector<8x64xf32>
    %259 = arith.mulf %258, %42 : vector<8x64xf32>
    %260 = arith.addf %256, %259 : vector<8x64xf32>
    %c91 = arith.constant 91 : index
    %261 = memref.load %arg2[%c91] : memref<244xf32, #tpu.memory_space<smem>>
    %262 = vector.broadcast %261 : f32 to vector<8x64xf32>
    %263 = arith.mulf %262, %46 : vector<8x64xf32>
    %264 = arith.addf %260, %263 : vector<8x64xf32>
    %c100 = arith.constant 100 : index
    %265 = memref.load %arg2[%c100] : memref<244xf32, #tpu.memory_space<smem>>
    %266 = vector.broadcast %265 : f32 to vector<8x64xf32>
    %267 = arith.mulf %266, %50 : vector<8x64xf32>
    %268 = arith.addf %264, %267 : vector<8x64xf32>
    %c109 = arith.constant 109 : index
    %269 = memref.load %arg2[%c109] : memref<244xf32, #tpu.memory_space<smem>>
    %270 = vector.broadcast %269 : f32 to vector<8x64xf32>
    %271 = arith.mulf %270, %54 : vector<8x64xf32>
    %272 = arith.addf %268, %271 : vector<8x64xf32>
    %c118 = arith.constant 118 : index
    %273 = memref.load %arg2[%c118] : memref<244xf32, #tpu.memory_space<smem>>
    %274 = vector.broadcast %273 : f32 to vector<8x64xf32>
    %275 = arith.mulf %274, %58 : vector<8x64xf32>
    %276 = arith.addf %272, %275 : vector<8x64xf32>
    %c127 = arith.constant 127 : index
    %277 = memref.load %arg2[%c127] : memref<244xf32, #tpu.memory_space<smem>>
    %278 = vector.broadcast %277 : f32 to vector<8x64xf32>
    %279 = arith.mulf %278, %62 : vector<8x64xf32>
    %280 = arith.addf %276, %279 : vector<8x64xf32>
    %c136 = arith.constant 136 : index
    %281 = memref.load %arg2[%c136] : memref<244xf32, #tpu.memory_space<smem>>
    %282 = vector.broadcast %281 : f32 to vector<8x64xf32>
    %283 = arith.mulf %282, %66 : vector<8x64xf32>
    %284 = arith.addf %280, %283 : vector<8x64xf32>
    %c145 = arith.constant 145 : index
    %285 = memref.load %arg2[%c145] : memref<244xf32, #tpu.memory_space<smem>>
    %286 = vector.broadcast %285 : f32 to vector<8x64xf32>
    %287 = arith.mulf %286, %70 : vector<8x64xf32>
    %288 = arith.addf %284, %287 : vector<8x64xf32>
    %c154 = arith.constant 154 : index
    %289 = memref.load %arg2[%c154] : memref<244xf32, #tpu.memory_space<smem>>
    %290 = vector.broadcast %289 : f32 to vector<8x64xf32>
    %291 = arith.mulf %290, %74 : vector<8x64xf32>
    %292 = arith.addf %288, %291 : vector<8x64xf32>
    %c163 = arith.constant 163 : index
    %293 = memref.load %arg2[%c163] : memref<244xf32, #tpu.memory_space<smem>>
    %294 = vector.broadcast %293 : f32 to vector<8x64xf32>
    %295 = arith.mulf %294, %78 : vector<8x64xf32>
    %296 = arith.addf %292, %295 : vector<8x64xf32>
    %c172 = arith.constant 172 : index
    %297 = memref.load %arg2[%c172] : memref<244xf32, #tpu.memory_space<smem>>
    %298 = vector.broadcast %297 : f32 to vector<8x64xf32>
    %299 = arith.mulf %298, %82 : vector<8x64xf32>
    %300 = arith.addf %296, %299 : vector<8x64xf32>
    %c181 = arith.constant 181 : index
    %301 = memref.load %arg2[%c181] : memref<244xf32, #tpu.memory_space<smem>>
    %302 = vector.broadcast %301 : f32 to vector<8x64xf32>
    %303 = arith.mulf %302, %86 : vector<8x64xf32>
    %304 = arith.addf %300, %303 : vector<8x64xf32>
    %c190 = arith.constant 190 : index
    %305 = memref.load %arg2[%c190] : memref<244xf32, #tpu.memory_space<smem>>
    %306 = vector.broadcast %305 : f32 to vector<8x64xf32>
    %307 = arith.mulf %306, %90 : vector<8x64xf32>
    %308 = arith.addf %304, %307 : vector<8x64xf32>
    %c199 = arith.constant 199 : index
    %309 = memref.load %arg2[%c199] : memref<244xf32, #tpu.memory_space<smem>>
    %310 = vector.broadcast %309 : f32 to vector<8x64xf32>
    %311 = arith.mulf %310, %94 : vector<8x64xf32>
    %312 = arith.addf %308, %311 : vector<8x64xf32>
    %c208 = arith.constant 208 : index
    %313 = memref.load %arg2[%c208] : memref<244xf32, #tpu.memory_space<smem>>
    %314 = vector.broadcast %313 : f32 to vector<8x64xf32>
    %315 = arith.mulf %314, %98 : vector<8x64xf32>
    %316 = arith.addf %312, %315 : vector<8x64xf32>
    %c217 = arith.constant 217 : index
    %317 = memref.load %arg2[%c217] : memref<244xf32, #tpu.memory_space<smem>>
    %318 = vector.broadcast %317 : f32 to vector<8x64xf32>
    %319 = arith.mulf %318, %102 : vector<8x64xf32>
    %320 = arith.addf %316, %319 : vector<8x64xf32>
    %c226 = arith.constant 226 : index
    %321 = memref.load %arg2[%c226] : memref<244xf32, #tpu.memory_space<smem>>
    %322 = vector.broadcast %321 : f32 to vector<8x64xf32>
    %323 = arith.mulf %322, %106 : vector<8x64xf32>
    %324 = arith.addf %320, %323 : vector<8x64xf32>
    %c235 = arith.constant 235 : index
    %325 = memref.load %arg2[%c235] : memref<244xf32, #tpu.memory_space<smem>>
    %326 = vector.broadcast %325 : f32 to vector<8x64xf32>
    %327 = arith.mulf %326, %110 : vector<8x64xf32>
    %328 = arith.addf %324, %327 : vector<8x64xf32>
    %329 = vector.extract_strided_slice %328 {offsets = [0, 1], sizes = [8, 56], strides = [1, 1]} : vector<8x64xf32> to vector<8x56xf32>
    %330 = arith.addf %221, %329 : vector<8x56xf32>
    %c2_99 = arith.constant 2 : index
    %331 = memref.load %arg2[%c2_99] : memref<244xf32, #tpu.memory_space<smem>>
    %332 = vector.broadcast %331 : f32 to vector<8x64xf32>
    %333 = arith.mulf %332, %6 : vector<8x64xf32>
    %c11 = arith.constant 11 : index
    %334 = memref.load %arg2[%c11] : memref<244xf32, #tpu.memory_space<smem>>
    %335 = vector.broadcast %334 : f32 to vector<8x64xf32>
    %336 = arith.mulf %335, %10 : vector<8x64xf32>
    %337 = arith.addf %333, %336 : vector<8x64xf32>
    %c20 = arith.constant 20 : index
    %338 = memref.load %arg2[%c20] : memref<244xf32, #tpu.memory_space<smem>>
    %339 = vector.broadcast %338 : f32 to vector<8x64xf32>
    %340 = arith.mulf %339, %14 : vector<8x64xf32>
    %341 = arith.addf %337, %340 : vector<8x64xf32>
    %c29 = arith.constant 29 : index
    %342 = memref.load %arg2[%c29] : memref<244xf32, #tpu.memory_space<smem>>
    %343 = vector.broadcast %342 : f32 to vector<8x64xf32>
    %344 = arith.mulf %343, %18 : vector<8x64xf32>
    %345 = arith.addf %341, %344 : vector<8x64xf32>
    %c38 = arith.constant 38 : index
    %346 = memref.load %arg2[%c38] : memref<244xf32, #tpu.memory_space<smem>>
    %347 = vector.broadcast %346 : f32 to vector<8x64xf32>
    %348 = arith.mulf %347, %22 : vector<8x64xf32>
    %349 = arith.addf %345, %348 : vector<8x64xf32>
    %c47 = arith.constant 47 : index
    %350 = memref.load %arg2[%c47] : memref<244xf32, #tpu.memory_space<smem>>
    %351 = vector.broadcast %350 : f32 to vector<8x64xf32>
    %352 = arith.mulf %351, %26 : vector<8x64xf32>
    %353 = arith.addf %349, %352 : vector<8x64xf32>
    %c56 = arith.constant 56 : index
    %354 = memref.load %arg2[%c56] : memref<244xf32, #tpu.memory_space<smem>>
    %355 = vector.broadcast %354 : f32 to vector<8x64xf32>
    %356 = arith.mulf %355, %30 : vector<8x64xf32>
    %357 = arith.addf %353, %356 : vector<8x64xf32>
    %c65 = arith.constant 65 : index
    %358 = memref.load %arg2[%c65] : memref<244xf32, #tpu.memory_space<smem>>
    %359 = vector.broadcast %358 : f32 to vector<8x64xf32>
    %360 = arith.mulf %359, %34 : vector<8x64xf32>
    %361 = arith.addf %357, %360 : vector<8x64xf32>
    %c74 = arith.constant 74 : index
    %362 = memref.load %arg2[%c74] : memref<244xf32, #tpu.memory_space<smem>>
    %363 = vector.broadcast %362 : f32 to vector<8x64xf32>
    %364 = arith.mulf %363, %38 : vector<8x64xf32>
    %365 = arith.addf %361, %364 : vector<8x64xf32>
    %c83 = arith.constant 83 : index
    %366 = memref.load %arg2[%c83] : memref<244xf32, #tpu.memory_space<smem>>
    %367 = vector.broadcast %366 : f32 to vector<8x64xf32>
    %368 = arith.mulf %367, %42 : vector<8x64xf32>
    %369 = arith.addf %365, %368 : vector<8x64xf32>
    %c92 = arith.constant 92 : index
    %370 = memref.load %arg2[%c92] : memref<244xf32, #tpu.memory_space<smem>>
    %371 = vector.broadcast %370 : f32 to vector<8x64xf32>
    %372 = arith.mulf %371, %46 : vector<8x64xf32>
    %373 = arith.addf %369, %372 : vector<8x64xf32>
    %c101 = arith.constant 101 : index
    %374 = memref.load %arg2[%c101] : memref<244xf32, #tpu.memory_space<smem>>
    %375 = vector.broadcast %374 : f32 to vector<8x64xf32>
    %376 = arith.mulf %375, %50 : vector<8x64xf32>
    %377 = arith.addf %373, %376 : vector<8x64xf32>
    %c110 = arith.constant 110 : index
    %378 = memref.load %arg2[%c110] : memref<244xf32, #tpu.memory_space<smem>>
    %379 = vector.broadcast %378 : f32 to vector<8x64xf32>
    %380 = arith.mulf %379, %54 : vector<8x64xf32>
    %381 = arith.addf %377, %380 : vector<8x64xf32>
    %c119 = arith.constant 119 : index
    %382 = memref.load %arg2[%c119] : memref<244xf32, #tpu.memory_space<smem>>
    %383 = vector.broadcast %382 : f32 to vector<8x64xf32>
    %384 = arith.mulf %383, %58 : vector<8x64xf32>
    %385 = arith.addf %381, %384 : vector<8x64xf32>
    %c128 = arith.constant 128 : index
    %386 = memref.load %arg2[%c128] : memref<244xf32, #tpu.memory_space<smem>>
    %387 = vector.broadcast %386 : f32 to vector<8x64xf32>
    %388 = arith.mulf %387, %62 : vector<8x64xf32>
    %389 = arith.addf %385, %388 : vector<8x64xf32>
    %c137 = arith.constant 137 : index
    %390 = memref.load %arg2[%c137] : memref<244xf32, #tpu.memory_space<smem>>
    %391 = vector.broadcast %390 : f32 to vector<8x64xf32>
    %392 = arith.mulf %391, %66 : vector<8x64xf32>
    %393 = arith.addf %389, %392 : vector<8x64xf32>
    %c146 = arith.constant 146 : index
    %394 = memref.load %arg2[%c146] : memref<244xf32, #tpu.memory_space<smem>>
    %395 = vector.broadcast %394 : f32 to vector<8x64xf32>
    %396 = arith.mulf %395, %70 : vector<8x64xf32>
    %397 = arith.addf %393, %396 : vector<8x64xf32>
    %c155 = arith.constant 155 : index
    %398 = memref.load %arg2[%c155] : memref<244xf32, #tpu.memory_space<smem>>
    %399 = vector.broadcast %398 : f32 to vector<8x64xf32>
    %400 = arith.mulf %399, %74 : vector<8x64xf32>
    %401 = arith.addf %397, %400 : vector<8x64xf32>
    %c164 = arith.constant 164 : index
    %402 = memref.load %arg2[%c164] : memref<244xf32, #tpu.memory_space<smem>>
    %403 = vector.broadcast %402 : f32 to vector<8x64xf32>
    %404 = arith.mulf %403, %78 : vector<8x64xf32>
    %405 = arith.addf %401, %404 : vector<8x64xf32>
    %c173 = arith.constant 173 : index
    %406 = memref.load %arg2[%c173] : memref<244xf32, #tpu.memory_space<smem>>
    %407 = vector.broadcast %406 : f32 to vector<8x64xf32>
    %408 = arith.mulf %407, %82 : vector<8x64xf32>
    %409 = arith.addf %405, %408 : vector<8x64xf32>
    %c182 = arith.constant 182 : index
    %410 = memref.load %arg2[%c182] : memref<244xf32, #tpu.memory_space<smem>>
    %411 = vector.broadcast %410 : f32 to vector<8x64xf32>
    %412 = arith.mulf %411, %86 : vector<8x64xf32>
    %413 = arith.addf %409, %412 : vector<8x64xf32>
    %c191 = arith.constant 191 : index
    %414 = memref.load %arg2[%c191] : memref<244xf32, #tpu.memory_space<smem>>
    %415 = vector.broadcast %414 : f32 to vector<8x64xf32>
    %416 = arith.mulf %415, %90 : vector<8x64xf32>
    %417 = arith.addf %413, %416 : vector<8x64xf32>
    %c200 = arith.constant 200 : index
    %418 = memref.load %arg2[%c200] : memref<244xf32, #tpu.memory_space<smem>>
    %419 = vector.broadcast %418 : f32 to vector<8x64xf32>
    %420 = arith.mulf %419, %94 : vector<8x64xf32>
    %421 = arith.addf %417, %420 : vector<8x64xf32>
    %c209 = arith.constant 209 : index
    %422 = memref.load %arg2[%c209] : memref<244xf32, #tpu.memory_space<smem>>
    %423 = vector.broadcast %422 : f32 to vector<8x64xf32>
    %424 = arith.mulf %423, %98 : vector<8x64xf32>
    %425 = arith.addf %421, %424 : vector<8x64xf32>
    %c218 = arith.constant 218 : index
    %426 = memref.load %arg2[%c218] : memref<244xf32, #tpu.memory_space<smem>>
    %427 = vector.broadcast %426 : f32 to vector<8x64xf32>
    %428 = arith.mulf %427, %102 : vector<8x64xf32>
    %429 = arith.addf %425, %428 : vector<8x64xf32>
    %c227 = arith.constant 227 : index
    %430 = memref.load %arg2[%c227] : memref<244xf32, #tpu.memory_space<smem>>
    %431 = vector.broadcast %430 : f32 to vector<8x64xf32>
    %432 = arith.mulf %431, %106 : vector<8x64xf32>
    %433 = arith.addf %429, %432 : vector<8x64xf32>
    %c236 = arith.constant 236 : index
    %434 = memref.load %arg2[%c236] : memref<244xf32, #tpu.memory_space<smem>>
    %435 = vector.broadcast %434 : f32 to vector<8x64xf32>
    %436 = arith.mulf %435, %110 : vector<8x64xf32>
    %437 = arith.addf %433, %436 : vector<8x64xf32>
    %438 = vector.extract_strided_slice %437 {offsets = [0, 2], sizes = [8, 56], strides = [1, 1]} : vector<8x64xf32> to vector<8x56xf32>
    %439 = arith.addf %330, %438 : vector<8x56xf32>
    %c3 = arith.constant 3 : index
    %440 = memref.load %arg2[%c3] : memref<244xf32, #tpu.memory_space<smem>>
    %441 = vector.broadcast %440 : f32 to vector<8x64xf32>
    %442 = arith.mulf %441, %6 : vector<8x64xf32>
    %c12 = arith.constant 12 : index
    %443 = memref.load %arg2[%c12] : memref<244xf32, #tpu.memory_space<smem>>
    %444 = vector.broadcast %443 : f32 to vector<8x64xf32>
    %445 = arith.mulf %444, %10 : vector<8x64xf32>
    %446 = arith.addf %442, %445 : vector<8x64xf32>
    %c21 = arith.constant 21 : index
    %447 = memref.load %arg2[%c21] : memref<244xf32, #tpu.memory_space<smem>>
    %448 = vector.broadcast %447 : f32 to vector<8x64xf32>
    %449 = arith.mulf %448, %14 : vector<8x64xf32>
    %450 = arith.addf %446, %449 : vector<8x64xf32>
    %c30 = arith.constant 30 : index
    %451 = memref.load %arg2[%c30] : memref<244xf32, #tpu.memory_space<smem>>
    %452 = vector.broadcast %451 : f32 to vector<8x64xf32>
    %453 = arith.mulf %452, %18 : vector<8x64xf32>
    %454 = arith.addf %450, %453 : vector<8x64xf32>
    %c39 = arith.constant 39 : index
    %455 = memref.load %arg2[%c39] : memref<244xf32, #tpu.memory_space<smem>>
    %456 = vector.broadcast %455 : f32 to vector<8x64xf32>
    %457 = arith.mulf %456, %22 : vector<8x64xf32>
    %458 = arith.addf %454, %457 : vector<8x64xf32>
    %c48 = arith.constant 48 : index
    %459 = memref.load %arg2[%c48] : memref<244xf32, #tpu.memory_space<smem>>
    %460 = vector.broadcast %459 : f32 to vector<8x64xf32>
    %461 = arith.mulf %460, %26 : vector<8x64xf32>
    %462 = arith.addf %458, %461 : vector<8x64xf32>
    %c57 = arith.constant 57 : index
    %463 = memref.load %arg2[%c57] : memref<244xf32, #tpu.memory_space<smem>>
    %464 = vector.broadcast %463 : f32 to vector<8x64xf32>
    %465 = arith.mulf %464, %30 : vector<8x64xf32>
    %466 = arith.addf %462, %465 : vector<8x64xf32>
    %c66 = arith.constant 66 : index
    %467 = memref.load %arg2[%c66] : memref<244xf32, #tpu.memory_space<smem>>
    %468 = vector.broadcast %467 : f32 to vector<8x64xf32>
    %469 = arith.mulf %468, %34 : vector<8x64xf32>
    %470 = arith.addf %466, %469 : vector<8x64xf32>
    %c75 = arith.constant 75 : index
    %471 = memref.load %arg2[%c75] : memref<244xf32, #tpu.memory_space<smem>>
    %472 = vector.broadcast %471 : f32 to vector<8x64xf32>
    %473 = arith.mulf %472, %38 : vector<8x64xf32>
    %474 = arith.addf %470, %473 : vector<8x64xf32>
    %c84 = arith.constant 84 : index
    %475 = memref.load %arg2[%c84] : memref<244xf32, #tpu.memory_space<smem>>
    %476 = vector.broadcast %475 : f32 to vector<8x64xf32>
    %477 = arith.mulf %476, %42 : vector<8x64xf32>
    %478 = arith.addf %474, %477 : vector<8x64xf32>
    %c93 = arith.constant 93 : index
    %479 = memref.load %arg2[%c93] : memref<244xf32, #tpu.memory_space<smem>>
    %480 = vector.broadcast %479 : f32 to vector<8x64xf32>
    %481 = arith.mulf %480, %46 : vector<8x64xf32>
    %482 = arith.addf %478, %481 : vector<8x64xf32>
    %c102 = arith.constant 102 : index
    %483 = memref.load %arg2[%c102] : memref<244xf32, #tpu.memory_space<smem>>
    %484 = vector.broadcast %483 : f32 to vector<8x64xf32>
    %485 = arith.mulf %484, %50 : vector<8x64xf32>
    %486 = arith.addf %482, %485 : vector<8x64xf32>
    %c111 = arith.constant 111 : index
    %487 = memref.load %arg2[%c111] : memref<244xf32, #tpu.memory_space<smem>>
    %488 = vector.broadcast %487 : f32 to vector<8x64xf32>
    %489 = arith.mulf %488, %54 : vector<8x64xf32>
    %490 = arith.addf %486, %489 : vector<8x64xf32>
    %c120 = arith.constant 120 : index
    %491 = memref.load %arg2[%c120] : memref<244xf32, #tpu.memory_space<smem>>
    %492 = vector.broadcast %491 : f32 to vector<8x64xf32>
    %493 = arith.mulf %492, %58 : vector<8x64xf32>
    %494 = arith.addf %490, %493 : vector<8x64xf32>
    %c129 = arith.constant 129 : index
    %495 = memref.load %arg2[%c129] : memref<244xf32, #tpu.memory_space<smem>>
    %496 = vector.broadcast %495 : f32 to vector<8x64xf32>
    %497 = arith.mulf %496, %62 : vector<8x64xf32>
    %498 = arith.addf %494, %497 : vector<8x64xf32>
    %c138 = arith.constant 138 : index
    %499 = memref.load %arg2[%c138] : memref<244xf32, #tpu.memory_space<smem>>
    %500 = vector.broadcast %499 : f32 to vector<8x64xf32>
    %501 = arith.mulf %500, %66 : vector<8x64xf32>
    %502 = arith.addf %498, %501 : vector<8x64xf32>
    %c147 = arith.constant 147 : index
    %503 = memref.load %arg2[%c147] : memref<244xf32, #tpu.memory_space<smem>>
    %504 = vector.broadcast %503 : f32 to vector<8x64xf32>
    %505 = arith.mulf %504, %70 : vector<8x64xf32>
    %506 = arith.addf %502, %505 : vector<8x64xf32>
    %c156 = arith.constant 156 : index
    %507 = memref.load %arg2[%c156] : memref<244xf32, #tpu.memory_space<smem>>
    %508 = vector.broadcast %507 : f32 to vector<8x64xf32>
    %509 = arith.mulf %508, %74 : vector<8x64xf32>
    %510 = arith.addf %506, %509 : vector<8x64xf32>
    %c165 = arith.constant 165 : index
    %511 = memref.load %arg2[%c165] : memref<244xf32, #tpu.memory_space<smem>>
    %512 = vector.broadcast %511 : f32 to vector<8x64xf32>
    %513 = arith.mulf %512, %78 : vector<8x64xf32>
    %514 = arith.addf %510, %513 : vector<8x64xf32>
    %c174 = arith.constant 174 : index
    %515 = memref.load %arg2[%c174] : memref<244xf32, #tpu.memory_space<smem>>
    %516 = vector.broadcast %515 : f32 to vector<8x64xf32>
    %517 = arith.mulf %516, %82 : vector<8x64xf32>
    %518 = arith.addf %514, %517 : vector<8x64xf32>
    %c183 = arith.constant 183 : index
    %519 = memref.load %arg2[%c183] : memref<244xf32, #tpu.memory_space<smem>>
    %520 = vector.broadcast %519 : f32 to vector<8x64xf32>
    %521 = arith.mulf %520, %86 : vector<8x64xf32>
    %522 = arith.addf %518, %521 : vector<8x64xf32>
    %c192 = arith.constant 192 : index
    %523 = memref.load %arg2[%c192] : memref<244xf32, #tpu.memory_space<smem>>
    %524 = vector.broadcast %523 : f32 to vector<8x64xf32>
    %525 = arith.mulf %524, %90 : vector<8x64xf32>
    %526 = arith.addf %522, %525 : vector<8x64xf32>
    %c201 = arith.constant 201 : index
    %527 = memref.load %arg2[%c201] : memref<244xf32, #tpu.memory_space<smem>>
    %528 = vector.broadcast %527 : f32 to vector<8x64xf32>
    %529 = arith.mulf %528, %94 : vector<8x64xf32>
    %530 = arith.addf %526, %529 : vector<8x64xf32>
    %c210 = arith.constant 210 : index
    %531 = memref.load %arg2[%c210] : memref<244xf32, #tpu.memory_space<smem>>
    %532 = vector.broadcast %531 : f32 to vector<8x64xf32>
    %533 = arith.mulf %532, %98 : vector<8x64xf32>
    %534 = arith.addf %530, %533 : vector<8x64xf32>
    %c219 = arith.constant 219 : index
    %535 = memref.load %arg2[%c219] : memref<244xf32, #tpu.memory_space<smem>>
    %536 = vector.broadcast %535 : f32 to vector<8x64xf32>
    %537 = arith.mulf %536, %102 : vector<8x64xf32>
    %538 = arith.addf %534, %537 : vector<8x64xf32>
    %c228 = arith.constant 228 : index
    %539 = memref.load %arg2[%c228] : memref<244xf32, #tpu.memory_space<smem>>
    %540 = vector.broadcast %539 : f32 to vector<8x64xf32>
    %541 = arith.mulf %540, %106 : vector<8x64xf32>
    %542 = arith.addf %538, %541 : vector<8x64xf32>
    %c237 = arith.constant 237 : index
    %543 = memref.load %arg2[%c237] : memref<244xf32, #tpu.memory_space<smem>>
    %544 = vector.broadcast %543 : f32 to vector<8x64xf32>
    %545 = arith.mulf %544, %110 : vector<8x64xf32>
    %546 = arith.addf %542, %545 : vector<8x64xf32>
    %547 = vector.extract_strided_slice %546 {offsets = [0, 3], sizes = [8, 56], strides = [1, 1]} : vector<8x64xf32> to vector<8x56xf32>
    %548 = arith.addf %439, %547 : vector<8x56xf32>
    %c4 = arith.constant 4 : index
    %549 = memref.load %arg2[%c4] : memref<244xf32, #tpu.memory_space<smem>>
    %550 = vector.broadcast %549 : f32 to vector<8x64xf32>
    %551 = arith.mulf %550, %6 : vector<8x64xf32>
    %c13 = arith.constant 13 : index
    %552 = memref.load %arg2[%c13] : memref<244xf32, #tpu.memory_space<smem>>
    %553 = vector.broadcast %552 : f32 to vector<8x64xf32>
    %554 = arith.mulf %553, %10 : vector<8x64xf32>
    %555 = arith.addf %551, %554 : vector<8x64xf32>
    %c22 = arith.constant 22 : index
    %556 = memref.load %arg2[%c22] : memref<244xf32, #tpu.memory_space<smem>>
    %557 = vector.broadcast %556 : f32 to vector<8x64xf32>
    %558 = arith.mulf %557, %14 : vector<8x64xf32>
    %559 = arith.addf %555, %558 : vector<8x64xf32>
    %c31 = arith.constant 31 : index
    %560 = memref.load %arg2[%c31] : memref<244xf32, #tpu.memory_space<smem>>
    %561 = vector.broadcast %560 : f32 to vector<8x64xf32>
    %562 = arith.mulf %561, %18 : vector<8x64xf32>
    %563 = arith.addf %559, %562 : vector<8x64xf32>
    %c40 = arith.constant 40 : index
    %564 = memref.load %arg2[%c40] : memref<244xf32, #tpu.memory_space<smem>>
    %565 = vector.broadcast %564 : f32 to vector<8x64xf32>
    %566 = arith.mulf %565, %22 : vector<8x64xf32>
    %567 = arith.addf %563, %566 : vector<8x64xf32>
    %c49 = arith.constant 49 : index
    %568 = memref.load %arg2[%c49] : memref<244xf32, #tpu.memory_space<smem>>
    %569 = vector.broadcast %568 : f32 to vector<8x64xf32>
    %570 = arith.mulf %569, %26 : vector<8x64xf32>
    %571 = arith.addf %567, %570 : vector<8x64xf32>
    %c58 = arith.constant 58 : index
    %572 = memref.load %arg2[%c58] : memref<244xf32, #tpu.memory_space<smem>>
    %573 = vector.broadcast %572 : f32 to vector<8x64xf32>
    %574 = arith.mulf %573, %30 : vector<8x64xf32>
    %575 = arith.addf %571, %574 : vector<8x64xf32>
    %c67 = arith.constant 67 : index
    %576 = memref.load %arg2[%c67] : memref<244xf32, #tpu.memory_space<smem>>
    %577 = vector.broadcast %576 : f32 to vector<8x64xf32>
    %578 = arith.mulf %577, %34 : vector<8x64xf32>
    %579 = arith.addf %575, %578 : vector<8x64xf32>
    %c76 = arith.constant 76 : index
    %580 = memref.load %arg2[%c76] : memref<244xf32, #tpu.memory_space<smem>>
    %581 = vector.broadcast %580 : f32 to vector<8x64xf32>
    %582 = arith.mulf %581, %38 : vector<8x64xf32>
    %583 = arith.addf %579, %582 : vector<8x64xf32>
    %c85 = arith.constant 85 : index
    %584 = memref.load %arg2[%c85] : memref<244xf32, #tpu.memory_space<smem>>
    %585 = vector.broadcast %584 : f32 to vector<8x64xf32>
    %586 = arith.mulf %585, %42 : vector<8x64xf32>
    %587 = arith.addf %583, %586 : vector<8x64xf32>
    %c94 = arith.constant 94 : index
    %588 = memref.load %arg2[%c94] : memref<244xf32, #tpu.memory_space<smem>>
    %589 = vector.broadcast %588 : f32 to vector<8x64xf32>
    %590 = arith.mulf %589, %46 : vector<8x64xf32>
    %591 = arith.addf %587, %590 : vector<8x64xf32>
    %c103 = arith.constant 103 : index
    %592 = memref.load %arg2[%c103] : memref<244xf32, #tpu.memory_space<smem>>
    %593 = vector.broadcast %592 : f32 to vector<8x64xf32>
    %594 = arith.mulf %593, %50 : vector<8x64xf32>
    %595 = arith.addf %591, %594 : vector<8x64xf32>
    %c112 = arith.constant 112 : index
    %596 = memref.load %arg2[%c112] : memref<244xf32, #tpu.memory_space<smem>>
    %597 = vector.broadcast %596 : f32 to vector<8x64xf32>
    %598 = arith.mulf %597, %54 : vector<8x64xf32>
    %599 = arith.addf %595, %598 : vector<8x64xf32>
    %c121 = arith.constant 121 : index
    %600 = memref.load %arg2[%c121] : memref<244xf32, #tpu.memory_space<smem>>
    %601 = vector.broadcast %600 : f32 to vector<8x64xf32>
    %602 = arith.mulf %601, %58 : vector<8x64xf32>
    %603 = arith.addf %599, %602 : vector<8x64xf32>
    %c130 = arith.constant 130 : index
    %604 = memref.load %arg2[%c130] : memref<244xf32, #tpu.memory_space<smem>>
    %605 = vector.broadcast %604 : f32 to vector<8x64xf32>
    %606 = arith.mulf %605, %62 : vector<8x64xf32>
    %607 = arith.addf %603, %606 : vector<8x64xf32>
    %c139 = arith.constant 139 : index
    %608 = memref.load %arg2[%c139] : memref<244xf32, #tpu.memory_space<smem>>
    %609 = vector.broadcast %608 : f32 to vector<8x64xf32>
    %610 = arith.mulf %609, %66 : vector<8x64xf32>
    %611 = arith.addf %607, %610 : vector<8x64xf32>
    %c148 = arith.constant 148 : index
    %612 = memref.load %arg2[%c148] : memref<244xf32, #tpu.memory_space<smem>>
    %613 = vector.broadcast %612 : f32 to vector<8x64xf32>
    %614 = arith.mulf %613, %70 : vector<8x64xf32>
    %615 = arith.addf %611, %614 : vector<8x64xf32>
    %c157 = arith.constant 157 : index
    %616 = memref.load %arg2[%c157] : memref<244xf32, #tpu.memory_space<smem>>
    %617 = vector.broadcast %616 : f32 to vector<8x64xf32>
    %618 = arith.mulf %617, %74 : vector<8x64xf32>
    %619 = arith.addf %615, %618 : vector<8x64xf32>
    %c166 = arith.constant 166 : index
    %620 = memref.load %arg2[%c166] : memref<244xf32, #tpu.memory_space<smem>>
    %621 = vector.broadcast %620 : f32 to vector<8x64xf32>
    %622 = arith.mulf %621, %78 : vector<8x64xf32>
    %623 = arith.addf %619, %622 : vector<8x64xf32>
    %c175 = arith.constant 175 : index
    %624 = memref.load %arg2[%c175] : memref<244xf32, #tpu.memory_space<smem>>
    %625 = vector.broadcast %624 : f32 to vector<8x64xf32>
    %626 = arith.mulf %625, %82 : vector<8x64xf32>
    %627 = arith.addf %623, %626 : vector<8x64xf32>
    %c184 = arith.constant 184 : index
    %628 = memref.load %arg2[%c184] : memref<244xf32, #tpu.memory_space<smem>>
    %629 = vector.broadcast %628 : f32 to vector<8x64xf32>
    %630 = arith.mulf %629, %86 : vector<8x64xf32>
    %631 = arith.addf %627, %630 : vector<8x64xf32>
    %c193 = arith.constant 193 : index
    %632 = memref.load %arg2[%c193] : memref<244xf32, #tpu.memory_space<smem>>
    %633 = vector.broadcast %632 : f32 to vector<8x64xf32>
    %634 = arith.mulf %633, %90 : vector<8x64xf32>
    %635 = arith.addf %631, %634 : vector<8x64xf32>
    %c202 = arith.constant 202 : index
    %636 = memref.load %arg2[%c202] : memref<244xf32, #tpu.memory_space<smem>>
    %637 = vector.broadcast %636 : f32 to vector<8x64xf32>
    %638 = arith.mulf %637, %94 : vector<8x64xf32>
    %639 = arith.addf %635, %638 : vector<8x64xf32>
    %c211 = arith.constant 211 : index
    %640 = memref.load %arg2[%c211] : memref<244xf32, #tpu.memory_space<smem>>
    %641 = vector.broadcast %640 : f32 to vector<8x64xf32>
    %642 = arith.mulf %641, %98 : vector<8x64xf32>
    %643 = arith.addf %639, %642 : vector<8x64xf32>
    %c220 = arith.constant 220 : index
    %644 = memref.load %arg2[%c220] : memref<244xf32, #tpu.memory_space<smem>>
    %645 = vector.broadcast %644 : f32 to vector<8x64xf32>
    %646 = arith.mulf %645, %102 : vector<8x64xf32>
    %647 = arith.addf %643, %646 : vector<8x64xf32>
    %c229 = arith.constant 229 : index
    %648 = memref.load %arg2[%c229] : memref<244xf32, #tpu.memory_space<smem>>
    %649 = vector.broadcast %648 : f32 to vector<8x64xf32>
    %650 = arith.mulf %649, %106 : vector<8x64xf32>
    %651 = arith.addf %647, %650 : vector<8x64xf32>
    %c238 = arith.constant 238 : index
    %652 = memref.load %arg2[%c238] : memref<244xf32, #tpu.memory_space<smem>>
    %653 = vector.broadcast %652 : f32 to vector<8x64xf32>
    %654 = arith.mulf %653, %110 : vector<8x64xf32>
    %655 = arith.addf %651, %654 : vector<8x64xf32>
    %656 = vector.extract_strided_slice %655 {offsets = [0, 4], sizes = [8, 56], strides = [1, 1]} : vector<8x64xf32> to vector<8x56xf32>
    %657 = arith.addf %548, %656 : vector<8x56xf32>
    %c5 = arith.constant 5 : index
    %658 = memref.load %arg2[%c5] : memref<244xf32, #tpu.memory_space<smem>>
    %659 = vector.broadcast %658 : f32 to vector<8x64xf32>
    %660 = arith.mulf %659, %6 : vector<8x64xf32>
    %c14 = arith.constant 14 : index
    %661 = memref.load %arg2[%c14] : memref<244xf32, #tpu.memory_space<smem>>
    %662 = vector.broadcast %661 : f32 to vector<8x64xf32>
    %663 = arith.mulf %662, %10 : vector<8x64xf32>
    %664 = arith.addf %660, %663 : vector<8x64xf32>
    %c23 = arith.constant 23 : index
    %665 = memref.load %arg2[%c23] : memref<244xf32, #tpu.memory_space<smem>>
    %666 = vector.broadcast %665 : f32 to vector<8x64xf32>
    %667 = arith.mulf %666, %14 : vector<8x64xf32>
    %668 = arith.addf %664, %667 : vector<8x64xf32>
    %c32 = arith.constant 32 : index
    %669 = memref.load %arg2[%c32] : memref<244xf32, #tpu.memory_space<smem>>
    %670 = vector.broadcast %669 : f32 to vector<8x64xf32>
    %671 = arith.mulf %670, %18 : vector<8x64xf32>
    %672 = arith.addf %668, %671 : vector<8x64xf32>
    %c41 = arith.constant 41 : index
    %673 = memref.load %arg2[%c41] : memref<244xf32, #tpu.memory_space<smem>>
    %674 = vector.broadcast %673 : f32 to vector<8x64xf32>
    %675 = arith.mulf %674, %22 : vector<8x64xf32>
    %676 = arith.addf %672, %675 : vector<8x64xf32>
    %c50 = arith.constant 50 : index
    %677 = memref.load %arg2[%c50] : memref<244xf32, #tpu.memory_space<smem>>
    %678 = vector.broadcast %677 : f32 to vector<8x64xf32>
    %679 = arith.mulf %678, %26 : vector<8x64xf32>
    %680 = arith.addf %676, %679 : vector<8x64xf32>
    %c59 = arith.constant 59 : index
    %681 = memref.load %arg2[%c59] : memref<244xf32, #tpu.memory_space<smem>>
    %682 = vector.broadcast %681 : f32 to vector<8x64xf32>
    %683 = arith.mulf %682, %30 : vector<8x64xf32>
    %684 = arith.addf %680, %683 : vector<8x64xf32>
    %c68 = arith.constant 68 : index
    %685 = memref.load %arg2[%c68] : memref<244xf32, #tpu.memory_space<smem>>
    %686 = vector.broadcast %685 : f32 to vector<8x64xf32>
    %687 = arith.mulf %686, %34 : vector<8x64xf32>
    %688 = arith.addf %684, %687 : vector<8x64xf32>
    %c77 = arith.constant 77 : index
    %689 = memref.load %arg2[%c77] : memref<244xf32, #tpu.memory_space<smem>>
    %690 = vector.broadcast %689 : f32 to vector<8x64xf32>
    %691 = arith.mulf %690, %38 : vector<8x64xf32>
    %692 = arith.addf %688, %691 : vector<8x64xf32>
    %c86 = arith.constant 86 : index
    %693 = memref.load %arg2[%c86] : memref<244xf32, #tpu.memory_space<smem>>
    %694 = vector.broadcast %693 : f32 to vector<8x64xf32>
    %695 = arith.mulf %694, %42 : vector<8x64xf32>
    %696 = arith.addf %692, %695 : vector<8x64xf32>
    %c95 = arith.constant 95 : index
    %697 = memref.load %arg2[%c95] : memref<244xf32, #tpu.memory_space<smem>>
    %698 = vector.broadcast %697 : f32 to vector<8x64xf32>
    %699 = arith.mulf %698, %46 : vector<8x64xf32>
    %700 = arith.addf %696, %699 : vector<8x64xf32>
    %c104 = arith.constant 104 : index
    %701 = memref.load %arg2[%c104] : memref<244xf32, #tpu.memory_space<smem>>
    %702 = vector.broadcast %701 : f32 to vector<8x64xf32>
    %703 = arith.mulf %702, %50 : vector<8x64xf32>
    %704 = arith.addf %700, %703 : vector<8x64xf32>
    %c113 = arith.constant 113 : index
    %705 = memref.load %arg2[%c113] : memref<244xf32, #tpu.memory_space<smem>>
    %706 = vector.broadcast %705 : f32 to vector<8x64xf32>
    %707 = arith.mulf %706, %54 : vector<8x64xf32>
    %708 = arith.addf %704, %707 : vector<8x64xf32>
    %c122 = arith.constant 122 : index
    %709 = memref.load %arg2[%c122] : memref<244xf32, #tpu.memory_space<smem>>
    %710 = vector.broadcast %709 : f32 to vector<8x64xf32>
    %711 = arith.mulf %710, %58 : vector<8x64xf32>
    %712 = arith.addf %708, %711 : vector<8x64xf32>
    %c131 = arith.constant 131 : index
    %713 = memref.load %arg2[%c131] : memref<244xf32, #tpu.memory_space<smem>>
    %714 = vector.broadcast %713 : f32 to vector<8x64xf32>
    %715 = arith.mulf %714, %62 : vector<8x64xf32>
    %716 = arith.addf %712, %715 : vector<8x64xf32>
    %c140 = arith.constant 140 : index
    %717 = memref.load %arg2[%c140] : memref<244xf32, #tpu.memory_space<smem>>
    %718 = vector.broadcast %717 : f32 to vector<8x64xf32>
    %719 = arith.mulf %718, %66 : vector<8x64xf32>
    %720 = arith.addf %716, %719 : vector<8x64xf32>
    %c149 = arith.constant 149 : index
    %721 = memref.load %arg2[%c149] : memref<244xf32, #tpu.memory_space<smem>>
    %722 = vector.broadcast %721 : f32 to vector<8x64xf32>
    %723 = arith.mulf %722, %70 : vector<8x64xf32>
    %724 = arith.addf %720, %723 : vector<8x64xf32>
    %c158 = arith.constant 158 : index
    %725 = memref.load %arg2[%c158] : memref<244xf32, #tpu.memory_space<smem>>
    %726 = vector.broadcast %725 : f32 to vector<8x64xf32>
    %727 = arith.mulf %726, %74 : vector<8x64xf32>
    %728 = arith.addf %724, %727 : vector<8x64xf32>
    %c167 = arith.constant 167 : index
    %729 = memref.load %arg2[%c167] : memref<244xf32, #tpu.memory_space<smem>>
    %730 = vector.broadcast %729 : f32 to vector<8x64xf32>
    %731 = arith.mulf %730, %78 : vector<8x64xf32>
    %732 = arith.addf %728, %731 : vector<8x64xf32>
    %c176 = arith.constant 176 : index
    %733 = memref.load %arg2[%c176] : memref<244xf32, #tpu.memory_space<smem>>
    %734 = vector.broadcast %733 : f32 to vector<8x64xf32>
    %735 = arith.mulf %734, %82 : vector<8x64xf32>
    %736 = arith.addf %732, %735 : vector<8x64xf32>
    %c185 = arith.constant 185 : index
    %737 = memref.load %arg2[%c185] : memref<244xf32, #tpu.memory_space<smem>>
    %738 = vector.broadcast %737 : f32 to vector<8x64xf32>
    %739 = arith.mulf %738, %86 : vector<8x64xf32>
    %740 = arith.addf %736, %739 : vector<8x64xf32>
    %c194 = arith.constant 194 : index
    %741 = memref.load %arg2[%c194] : memref<244xf32, #tpu.memory_space<smem>>
    %742 = vector.broadcast %741 : f32 to vector<8x64xf32>
    %743 = arith.mulf %742, %90 : vector<8x64xf32>
    %744 = arith.addf %740, %743 : vector<8x64xf32>
    %c203 = arith.constant 203 : index
    %745 = memref.load %arg2[%c203] : memref<244xf32, #tpu.memory_space<smem>>
    %746 = vector.broadcast %745 : f32 to vector<8x64xf32>
    %747 = arith.mulf %746, %94 : vector<8x64xf32>
    %748 = arith.addf %744, %747 : vector<8x64xf32>
    %c212 = arith.constant 212 : index
    %749 = memref.load %arg2[%c212] : memref<244xf32, #tpu.memory_space<smem>>
    %750 = vector.broadcast %749 : f32 to vector<8x64xf32>
    %751 = arith.mulf %750, %98 : vector<8x64xf32>
    %752 = arith.addf %748, %751 : vector<8x64xf32>
    %c221 = arith.constant 221 : index
    %753 = memref.load %arg2[%c221] : memref<244xf32, #tpu.memory_space<smem>>
    %754 = vector.broadcast %753 : f32 to vector<8x64xf32>
    %755 = arith.mulf %754, %102 : vector<8x64xf32>
    %756 = arith.addf %752, %755 : vector<8x64xf32>
    %c230 = arith.constant 230 : index
    %757 = memref.load %arg2[%c230] : memref<244xf32, #tpu.memory_space<smem>>
    %758 = vector.broadcast %757 : f32 to vector<8x64xf32>
    %759 = arith.mulf %758, %106 : vector<8x64xf32>
    %760 = arith.addf %756, %759 : vector<8x64xf32>
    %c239 = arith.constant 239 : index
    %761 = memref.load %arg2[%c239] : memref<244xf32, #tpu.memory_space<smem>>
    %762 = vector.broadcast %761 : f32 to vector<8x64xf32>
    %763 = arith.mulf %762, %110 : vector<8x64xf32>
    %764 = arith.addf %760, %763 : vector<8x64xf32>
    %765 = vector.extract_strided_slice %764 {offsets = [0, 5], sizes = [8, 56], strides = [1, 1]} : vector<8x64xf32> to vector<8x56xf32>
    %766 = arith.addf %657, %765 : vector<8x56xf32>
    %c6 = arith.constant 6 : index
    %767 = memref.load %arg2[%c6] : memref<244xf32, #tpu.memory_space<smem>>
    %768 = vector.broadcast %767 : f32 to vector<8x64xf32>
    %769 = arith.mulf %768, %6 : vector<8x64xf32>
    %c15 = arith.constant 15 : index
    %770 = memref.load %arg2[%c15] : memref<244xf32, #tpu.memory_space<smem>>
    %771 = vector.broadcast %770 : f32 to vector<8x64xf32>
    %772 = arith.mulf %771, %10 : vector<8x64xf32>
    %773 = arith.addf %769, %772 : vector<8x64xf32>
    %c24 = arith.constant 24 : index
    %774 = memref.load %arg2[%c24] : memref<244xf32, #tpu.memory_space<smem>>
    %775 = vector.broadcast %774 : f32 to vector<8x64xf32>
    %776 = arith.mulf %775, %14 : vector<8x64xf32>
    %777 = arith.addf %773, %776 : vector<8x64xf32>
    %c33 = arith.constant 33 : index
    %778 = memref.load %arg2[%c33] : memref<244xf32, #tpu.memory_space<smem>>
    %779 = vector.broadcast %778 : f32 to vector<8x64xf32>
    %780 = arith.mulf %779, %18 : vector<8x64xf32>
    %781 = arith.addf %777, %780 : vector<8x64xf32>
    %c42 = arith.constant 42 : index
    %782 = memref.load %arg2[%c42] : memref<244xf32, #tpu.memory_space<smem>>
    %783 = vector.broadcast %782 : f32 to vector<8x64xf32>
    %784 = arith.mulf %783, %22 : vector<8x64xf32>
    %785 = arith.addf %781, %784 : vector<8x64xf32>
    %c51 = arith.constant 51 : index
    %786 = memref.load %arg2[%c51] : memref<244xf32, #tpu.memory_space<smem>>
    %787 = vector.broadcast %786 : f32 to vector<8x64xf32>
    %788 = arith.mulf %787, %26 : vector<8x64xf32>
    %789 = arith.addf %785, %788 : vector<8x64xf32>
    %c60 = arith.constant 60 : index
    %790 = memref.load %arg2[%c60] : memref<244xf32, #tpu.memory_space<smem>>
    %791 = vector.broadcast %790 : f32 to vector<8x64xf32>
    %792 = arith.mulf %791, %30 : vector<8x64xf32>
    %793 = arith.addf %789, %792 : vector<8x64xf32>
    %c69 = arith.constant 69 : index
    %794 = memref.load %arg2[%c69] : memref<244xf32, #tpu.memory_space<smem>>
    %795 = vector.broadcast %794 : f32 to vector<8x64xf32>
    %796 = arith.mulf %795, %34 : vector<8x64xf32>
    %797 = arith.addf %793, %796 : vector<8x64xf32>
    %c78 = arith.constant 78 : index
    %798 = memref.load %arg2[%c78] : memref<244xf32, #tpu.memory_space<smem>>
    %799 = vector.broadcast %798 : f32 to vector<8x64xf32>
    %800 = arith.mulf %799, %38 : vector<8x64xf32>
    %801 = arith.addf %797, %800 : vector<8x64xf32>
    %c87 = arith.constant 87 : index
    %802 = memref.load %arg2[%c87] : memref<244xf32, #tpu.memory_space<smem>>
    %803 = vector.broadcast %802 : f32 to vector<8x64xf32>
    %804 = arith.mulf %803, %42 : vector<8x64xf32>
    %805 = arith.addf %801, %804 : vector<8x64xf32>
    %c96 = arith.constant 96 : index
    %806 = memref.load %arg2[%c96] : memref<244xf32, #tpu.memory_space<smem>>
    %807 = vector.broadcast %806 : f32 to vector<8x64xf32>
    %808 = arith.mulf %807, %46 : vector<8x64xf32>
    %809 = arith.addf %805, %808 : vector<8x64xf32>
    %c105 = arith.constant 105 : index
    %810 = memref.load %arg2[%c105] : memref<244xf32, #tpu.memory_space<smem>>
    %811 = vector.broadcast %810 : f32 to vector<8x64xf32>
    %812 = arith.mulf %811, %50 : vector<8x64xf32>
    %813 = arith.addf %809, %812 : vector<8x64xf32>
    %c114 = arith.constant 114 : index
    %814 = memref.load %arg2[%c114] : memref<244xf32, #tpu.memory_space<smem>>
    %815 = vector.broadcast %814 : f32 to vector<8x64xf32>
    %816 = arith.mulf %815, %54 : vector<8x64xf32>
    %817 = arith.addf %813, %816 : vector<8x64xf32>
    %c123 = arith.constant 123 : index
    %818 = memref.load %arg2[%c123] : memref<244xf32, #tpu.memory_space<smem>>
    %819 = vector.broadcast %818 : f32 to vector<8x64xf32>
    %820 = arith.mulf %819, %58 : vector<8x64xf32>
    %821 = arith.addf %817, %820 : vector<8x64xf32>
    %c132 = arith.constant 132 : index
    %822 = memref.load %arg2[%c132] : memref<244xf32, #tpu.memory_space<smem>>
    %823 = vector.broadcast %822 : f32 to vector<8x64xf32>
    %824 = arith.mulf %823, %62 : vector<8x64xf32>
    %825 = arith.addf %821, %824 : vector<8x64xf32>
    %c141 = arith.constant 141 : index
    %826 = memref.load %arg2[%c141] : memref<244xf32, #tpu.memory_space<smem>>
    %827 = vector.broadcast %826 : f32 to vector<8x64xf32>
    %828 = arith.mulf %827, %66 : vector<8x64xf32>
    %829 = arith.addf %825, %828 : vector<8x64xf32>
    %c150 = arith.constant 150 : index
    %830 = memref.load %arg2[%c150] : memref<244xf32, #tpu.memory_space<smem>>
    %831 = vector.broadcast %830 : f32 to vector<8x64xf32>
    %832 = arith.mulf %831, %70 : vector<8x64xf32>
    %833 = arith.addf %829, %832 : vector<8x64xf32>
    %c159 = arith.constant 159 : index
    %834 = memref.load %arg2[%c159] : memref<244xf32, #tpu.memory_space<smem>>
    %835 = vector.broadcast %834 : f32 to vector<8x64xf32>
    %836 = arith.mulf %835, %74 : vector<8x64xf32>
    %837 = arith.addf %833, %836 : vector<8x64xf32>
    %c168 = arith.constant 168 : index
    %838 = memref.load %arg2[%c168] : memref<244xf32, #tpu.memory_space<smem>>
    %839 = vector.broadcast %838 : f32 to vector<8x64xf32>
    %840 = arith.mulf %839, %78 : vector<8x64xf32>
    %841 = arith.addf %837, %840 : vector<8x64xf32>
    %c177 = arith.constant 177 : index
    %842 = memref.load %arg2[%c177] : memref<244xf32, #tpu.memory_space<smem>>
    %843 = vector.broadcast %842 : f32 to vector<8x64xf32>
    %844 = arith.mulf %843, %82 : vector<8x64xf32>
    %845 = arith.addf %841, %844 : vector<8x64xf32>
    %c186 = arith.constant 186 : index
    %846 = memref.load %arg2[%c186] : memref<244xf32, #tpu.memory_space<smem>>
    %847 = vector.broadcast %846 : f32 to vector<8x64xf32>
    %848 = arith.mulf %847, %86 : vector<8x64xf32>
    %849 = arith.addf %845, %848 : vector<8x64xf32>
    %c195 = arith.constant 195 : index
    %850 = memref.load %arg2[%c195] : memref<244xf32, #tpu.memory_space<smem>>
    %851 = vector.broadcast %850 : f32 to vector<8x64xf32>
    %852 = arith.mulf %851, %90 : vector<8x64xf32>
    %853 = arith.addf %849, %852 : vector<8x64xf32>
    %c204 = arith.constant 204 : index
    %854 = memref.load %arg2[%c204] : memref<244xf32, #tpu.memory_space<smem>>
    %855 = vector.broadcast %854 : f32 to vector<8x64xf32>
    %856 = arith.mulf %855, %94 : vector<8x64xf32>
    %857 = arith.addf %853, %856 : vector<8x64xf32>
    %c213 = arith.constant 213 : index
    %858 = memref.load %arg2[%c213] : memref<244xf32, #tpu.memory_space<smem>>
    %859 = vector.broadcast %858 : f32 to vector<8x64xf32>
    %860 = arith.mulf %859, %98 : vector<8x64xf32>
    %861 = arith.addf %857, %860 : vector<8x64xf32>
    %c222 = arith.constant 222 : index
    %862 = memref.load %arg2[%c222] : memref<244xf32, #tpu.memory_space<smem>>
    %863 = vector.broadcast %862 : f32 to vector<8x64xf32>
    %864 = arith.mulf %863, %102 : vector<8x64xf32>
    %865 = arith.addf %861, %864 : vector<8x64xf32>
    %c231 = arith.constant 231 : index
    %866 = memref.load %arg2[%c231] : memref<244xf32, #tpu.memory_space<smem>>
    %867 = vector.broadcast %866 : f32 to vector<8x64xf32>
    %868 = arith.mulf %867, %106 : vector<8x64xf32>
    %869 = arith.addf %865, %868 : vector<8x64xf32>
    %c240 = arith.constant 240 : index
    %870 = memref.load %arg2[%c240] : memref<244xf32, #tpu.memory_space<smem>>
    %871 = vector.broadcast %870 : f32 to vector<8x64xf32>
    %872 = arith.mulf %871, %110 : vector<8x64xf32>
    %873 = arith.addf %869, %872 : vector<8x64xf32>
    %874 = vector.extract_strided_slice %873 {offsets = [0, 6], sizes = [8, 56], strides = [1, 1]} : vector<8x64xf32> to vector<8x56xf32>
    %875 = arith.addf %766, %874 : vector<8x56xf32>
    %c7 = arith.constant 7 : index
    %876 = memref.load %arg2[%c7] : memref<244xf32, #tpu.memory_space<smem>>
    %877 = vector.broadcast %876 : f32 to vector<8x64xf32>
    %878 = arith.mulf %877, %6 : vector<8x64xf32>
    %c16 = arith.constant 16 : index
    %879 = memref.load %arg2[%c16] : memref<244xf32, #tpu.memory_space<smem>>
    %880 = vector.broadcast %879 : f32 to vector<8x64xf32>
    %881 = arith.mulf %880, %10 : vector<8x64xf32>
    %882 = arith.addf %878, %881 : vector<8x64xf32>
    %c25 = arith.constant 25 : index
    %883 = memref.load %arg2[%c25] : memref<244xf32, #tpu.memory_space<smem>>
    %884 = vector.broadcast %883 : f32 to vector<8x64xf32>
    %885 = arith.mulf %884, %14 : vector<8x64xf32>
    %886 = arith.addf %882, %885 : vector<8x64xf32>
    %c34 = arith.constant 34 : index
    %887 = memref.load %arg2[%c34] : memref<244xf32, #tpu.memory_space<smem>>
    %888 = vector.broadcast %887 : f32 to vector<8x64xf32>
    %889 = arith.mulf %888, %18 : vector<8x64xf32>
    %890 = arith.addf %886, %889 : vector<8x64xf32>
    %c43 = arith.constant 43 : index
    %891 = memref.load %arg2[%c43] : memref<244xf32, #tpu.memory_space<smem>>
    %892 = vector.broadcast %891 : f32 to vector<8x64xf32>
    %893 = arith.mulf %892, %22 : vector<8x64xf32>
    %894 = arith.addf %890, %893 : vector<8x64xf32>
    %c52 = arith.constant 52 : index
    %895 = memref.load %arg2[%c52] : memref<244xf32, #tpu.memory_space<smem>>
    %896 = vector.broadcast %895 : f32 to vector<8x64xf32>
    %897 = arith.mulf %896, %26 : vector<8x64xf32>
    %898 = arith.addf %894, %897 : vector<8x64xf32>
    %c61 = arith.constant 61 : index
    %899 = memref.load %arg2[%c61] : memref<244xf32, #tpu.memory_space<smem>>
    %900 = vector.broadcast %899 : f32 to vector<8x64xf32>
    %901 = arith.mulf %900, %30 : vector<8x64xf32>
    %902 = arith.addf %898, %901 : vector<8x64xf32>
    %c70 = arith.constant 70 : index
    %903 = memref.load %arg2[%c70] : memref<244xf32, #tpu.memory_space<smem>>
    %904 = vector.broadcast %903 : f32 to vector<8x64xf32>
    %905 = arith.mulf %904, %34 : vector<8x64xf32>
    %906 = arith.addf %902, %905 : vector<8x64xf32>
    %c79 = arith.constant 79 : index
    %907 = memref.load %arg2[%c79] : memref<244xf32, #tpu.memory_space<smem>>
    %908 = vector.broadcast %907 : f32 to vector<8x64xf32>
    %909 = arith.mulf %908, %38 : vector<8x64xf32>
    %910 = arith.addf %906, %909 : vector<8x64xf32>
    %c88 = arith.constant 88 : index
    %911 = memref.load %arg2[%c88] : memref<244xf32, #tpu.memory_space<smem>>
    %912 = vector.broadcast %911 : f32 to vector<8x64xf32>
    %913 = arith.mulf %912, %42 : vector<8x64xf32>
    %914 = arith.addf %910, %913 : vector<8x64xf32>
    %c97 = arith.constant 97 : index
    %915 = memref.load %arg2[%c97] : memref<244xf32, #tpu.memory_space<smem>>
    %916 = vector.broadcast %915 : f32 to vector<8x64xf32>
    %917 = arith.mulf %916, %46 : vector<8x64xf32>
    %918 = arith.addf %914, %917 : vector<8x64xf32>
    %c106 = arith.constant 106 : index
    %919 = memref.load %arg2[%c106] : memref<244xf32, #tpu.memory_space<smem>>
    %920 = vector.broadcast %919 : f32 to vector<8x64xf32>
    %921 = arith.mulf %920, %50 : vector<8x64xf32>
    %922 = arith.addf %918, %921 : vector<8x64xf32>
    %c115 = arith.constant 115 : index
    %923 = memref.load %arg2[%c115] : memref<244xf32, #tpu.memory_space<smem>>
    %924 = vector.broadcast %923 : f32 to vector<8x64xf32>
    %925 = arith.mulf %924, %54 : vector<8x64xf32>
    %926 = arith.addf %922, %925 : vector<8x64xf32>
    %c124 = arith.constant 124 : index
    %927 = memref.load %arg2[%c124] : memref<244xf32, #tpu.memory_space<smem>>
    %928 = vector.broadcast %927 : f32 to vector<8x64xf32>
    %929 = arith.mulf %928, %58 : vector<8x64xf32>
    %930 = arith.addf %926, %929 : vector<8x64xf32>
    %c133 = arith.constant 133 : index
    %931 = memref.load %arg2[%c133] : memref<244xf32, #tpu.memory_space<smem>>
    %932 = vector.broadcast %931 : f32 to vector<8x64xf32>
    %933 = arith.mulf %932, %62 : vector<8x64xf32>
    %934 = arith.addf %930, %933 : vector<8x64xf32>
    %c142 = arith.constant 142 : index
    %935 = memref.load %arg2[%c142] : memref<244xf32, #tpu.memory_space<smem>>
    %936 = vector.broadcast %935 : f32 to vector<8x64xf32>
    %937 = arith.mulf %936, %66 : vector<8x64xf32>
    %938 = arith.addf %934, %937 : vector<8x64xf32>
    %c151 = arith.constant 151 : index
    %939 = memref.load %arg2[%c151] : memref<244xf32, #tpu.memory_space<smem>>
    %940 = vector.broadcast %939 : f32 to vector<8x64xf32>
    %941 = arith.mulf %940, %70 : vector<8x64xf32>
    %942 = arith.addf %938, %941 : vector<8x64xf32>
    %c160 = arith.constant 160 : index
    %943 = memref.load %arg2[%c160] : memref<244xf32, #tpu.memory_space<smem>>
    %944 = vector.broadcast %943 : f32 to vector<8x64xf32>
    %945 = arith.mulf %944, %74 : vector<8x64xf32>
    %946 = arith.addf %942, %945 : vector<8x64xf32>
    %c169 = arith.constant 169 : index
    %947 = memref.load %arg2[%c169] : memref<244xf32, #tpu.memory_space<smem>>
    %948 = vector.broadcast %947 : f32 to vector<8x64xf32>
    %949 = arith.mulf %948, %78 : vector<8x64xf32>
    %950 = arith.addf %946, %949 : vector<8x64xf32>
    %c178 = arith.constant 178 : index
    %951 = memref.load %arg2[%c178] : memref<244xf32, #tpu.memory_space<smem>>
    %952 = vector.broadcast %951 : f32 to vector<8x64xf32>
    %953 = arith.mulf %952, %82 : vector<8x64xf32>
    %954 = arith.addf %950, %953 : vector<8x64xf32>
    %c187 = arith.constant 187 : index
    %955 = memref.load %arg2[%c187] : memref<244xf32, #tpu.memory_space<smem>>
    %956 = vector.broadcast %955 : f32 to vector<8x64xf32>
    %957 = arith.mulf %956, %86 : vector<8x64xf32>
    %958 = arith.addf %954, %957 : vector<8x64xf32>
    %c196 = arith.constant 196 : index
    %959 = memref.load %arg2[%c196] : memref<244xf32, #tpu.memory_space<smem>>
    %960 = vector.broadcast %959 : f32 to vector<8x64xf32>
    %961 = arith.mulf %960, %90 : vector<8x64xf32>
    %962 = arith.addf %958, %961 : vector<8x64xf32>
    %c205 = arith.constant 205 : index
    %963 = memref.load %arg2[%c205] : memref<244xf32, #tpu.memory_space<smem>>
    %964 = vector.broadcast %963 : f32 to vector<8x64xf32>
    %965 = arith.mulf %964, %94 : vector<8x64xf32>
    %966 = arith.addf %962, %965 : vector<8x64xf32>
    %c214 = arith.constant 214 : index
    %967 = memref.load %arg2[%c214] : memref<244xf32, #tpu.memory_space<smem>>
    %968 = vector.broadcast %967 : f32 to vector<8x64xf32>
    %969 = arith.mulf %968, %98 : vector<8x64xf32>
    %970 = arith.addf %966, %969 : vector<8x64xf32>
    %c223 = arith.constant 223 : index
    %971 = memref.load %arg2[%c223] : memref<244xf32, #tpu.memory_space<smem>>
    %972 = vector.broadcast %971 : f32 to vector<8x64xf32>
    %973 = arith.mulf %972, %102 : vector<8x64xf32>
    %974 = arith.addf %970, %973 : vector<8x64xf32>
    %c232 = arith.constant 232 : index
    %975 = memref.load %arg2[%c232] : memref<244xf32, #tpu.memory_space<smem>>
    %976 = vector.broadcast %975 : f32 to vector<8x64xf32>
    %977 = arith.mulf %976, %106 : vector<8x64xf32>
    %978 = arith.addf %974, %977 : vector<8x64xf32>
    %c241 = arith.constant 241 : index
    %979 = memref.load %arg2[%c241] : memref<244xf32, #tpu.memory_space<smem>>
    %980 = vector.broadcast %979 : f32 to vector<8x64xf32>
    %981 = arith.mulf %980, %110 : vector<8x64xf32>
    %982 = arith.addf %978, %981 : vector<8x64xf32>
    %983 = vector.extract_strided_slice %982 {offsets = [0, 7], sizes = [8, 56], strides = [1, 1]} : vector<8x64xf32> to vector<8x56xf32>
    %984 = arith.addf %875, %983 : vector<8x56xf32>
    %c8 = arith.constant 8 : index
    %985 = memref.load %arg2[%c8] : memref<244xf32, #tpu.memory_space<smem>>
    %986 = vector.broadcast %985 : f32 to vector<8x64xf32>
    %987 = arith.mulf %986, %6 : vector<8x64xf32>
    %c17 = arith.constant 17 : index
    %988 = memref.load %arg2[%c17] : memref<244xf32, #tpu.memory_space<smem>>
    %989 = vector.broadcast %988 : f32 to vector<8x64xf32>
    %990 = arith.mulf %989, %10 : vector<8x64xf32>
    %991 = arith.addf %987, %990 : vector<8x64xf32>
    %c26 = arith.constant 26 : index
    %992 = memref.load %arg2[%c26] : memref<244xf32, #tpu.memory_space<smem>>
    %993 = vector.broadcast %992 : f32 to vector<8x64xf32>
    %994 = arith.mulf %993, %14 : vector<8x64xf32>
    %995 = arith.addf %991, %994 : vector<8x64xf32>
    %c35 = arith.constant 35 : index
    %996 = memref.load %arg2[%c35] : memref<244xf32, #tpu.memory_space<smem>>
    %997 = vector.broadcast %996 : f32 to vector<8x64xf32>
    %998 = arith.mulf %997, %18 : vector<8x64xf32>
    %999 = arith.addf %995, %998 : vector<8x64xf32>
    %c44 = arith.constant 44 : index
    %1000 = memref.load %arg2[%c44] : memref<244xf32, #tpu.memory_space<smem>>
    %1001 = vector.broadcast %1000 : f32 to vector<8x64xf32>
    %1002 = arith.mulf %1001, %22 : vector<8x64xf32>
    %1003 = arith.addf %999, %1002 : vector<8x64xf32>
    %c53 = arith.constant 53 : index
    %1004 = memref.load %arg2[%c53] : memref<244xf32, #tpu.memory_space<smem>>
    %1005 = vector.broadcast %1004 : f32 to vector<8x64xf32>
    %1006 = arith.mulf %1005, %26 : vector<8x64xf32>
    %1007 = arith.addf %1003, %1006 : vector<8x64xf32>
    %c62 = arith.constant 62 : index
    %1008 = memref.load %arg2[%c62] : memref<244xf32, #tpu.memory_space<smem>>
    %1009 = vector.broadcast %1008 : f32 to vector<8x64xf32>
    %1010 = arith.mulf %1009, %30 : vector<8x64xf32>
    %1011 = arith.addf %1007, %1010 : vector<8x64xf32>
    %c71 = arith.constant 71 : index
    %1012 = memref.load %arg2[%c71] : memref<244xf32, #tpu.memory_space<smem>>
    %1013 = vector.broadcast %1012 : f32 to vector<8x64xf32>
    %1014 = arith.mulf %1013, %34 : vector<8x64xf32>
    %1015 = arith.addf %1011, %1014 : vector<8x64xf32>
    %c80 = arith.constant 80 : index
    %1016 = memref.load %arg2[%c80] : memref<244xf32, #tpu.memory_space<smem>>
    %1017 = vector.broadcast %1016 : f32 to vector<8x64xf32>
    %1018 = arith.mulf %1017, %38 : vector<8x64xf32>
    %1019 = arith.addf %1015, %1018 : vector<8x64xf32>
    %c89 = arith.constant 89 : index
    %1020 = memref.load %arg2[%c89] : memref<244xf32, #tpu.memory_space<smem>>
    %1021 = vector.broadcast %1020 : f32 to vector<8x64xf32>
    %1022 = arith.mulf %1021, %42 : vector<8x64xf32>
    %1023 = arith.addf %1019, %1022 : vector<8x64xf32>
    %c98 = arith.constant 98 : index
    %1024 = memref.load %arg2[%c98] : memref<244xf32, #tpu.memory_space<smem>>
    %1025 = vector.broadcast %1024 : f32 to vector<8x64xf32>
    %1026 = arith.mulf %1025, %46 : vector<8x64xf32>
    %1027 = arith.addf %1023, %1026 : vector<8x64xf32>
    %c107 = arith.constant 107 : index
    %1028 = memref.load %arg2[%c107] : memref<244xf32, #tpu.memory_space<smem>>
    %1029 = vector.broadcast %1028 : f32 to vector<8x64xf32>
    %1030 = arith.mulf %1029, %50 : vector<8x64xf32>
    %1031 = arith.addf %1027, %1030 : vector<8x64xf32>
    %c116 = arith.constant 116 : index
    %1032 = memref.load %arg2[%c116] : memref<244xf32, #tpu.memory_space<smem>>
    %1033 = vector.broadcast %1032 : f32 to vector<8x64xf32>
    %1034 = arith.mulf %1033, %54 : vector<8x64xf32>
    %1035 = arith.addf %1031, %1034 : vector<8x64xf32>
    %c125 = arith.constant 125 : index
    %1036 = memref.load %arg2[%c125] : memref<244xf32, #tpu.memory_space<smem>>
    %1037 = vector.broadcast %1036 : f32 to vector<8x64xf32>
    %1038 = arith.mulf %1037, %58 : vector<8x64xf32>
    %1039 = arith.addf %1035, %1038 : vector<8x64xf32>
    %c134 = arith.constant 134 : index
    %1040 = memref.load %arg2[%c134] : memref<244xf32, #tpu.memory_space<smem>>
    %1041 = vector.broadcast %1040 : f32 to vector<8x64xf32>
    %1042 = arith.mulf %1041, %62 : vector<8x64xf32>
    %1043 = arith.addf %1039, %1042 : vector<8x64xf32>
    %c143 = arith.constant 143 : index
    %1044 = memref.load %arg2[%c143] : memref<244xf32, #tpu.memory_space<smem>>
    %1045 = vector.broadcast %1044 : f32 to vector<8x64xf32>
    %1046 = arith.mulf %1045, %66 : vector<8x64xf32>
    %1047 = arith.addf %1043, %1046 : vector<8x64xf32>
    %c152 = arith.constant 152 : index
    %1048 = memref.load %arg2[%c152] : memref<244xf32, #tpu.memory_space<smem>>
    %1049 = vector.broadcast %1048 : f32 to vector<8x64xf32>
    %1050 = arith.mulf %1049, %70 : vector<8x64xf32>
    %1051 = arith.addf %1047, %1050 : vector<8x64xf32>
    %c161 = arith.constant 161 : index
    %1052 = memref.load %arg2[%c161] : memref<244xf32, #tpu.memory_space<smem>>
    %1053 = vector.broadcast %1052 : f32 to vector<8x64xf32>
    %1054 = arith.mulf %1053, %74 : vector<8x64xf32>
    %1055 = arith.addf %1051, %1054 : vector<8x64xf32>
    %c170 = arith.constant 170 : index
    %1056 = memref.load %arg2[%c170] : memref<244xf32, #tpu.memory_space<smem>>
    %1057 = vector.broadcast %1056 : f32 to vector<8x64xf32>
    %1058 = arith.mulf %1057, %78 : vector<8x64xf32>
    %1059 = arith.addf %1055, %1058 : vector<8x64xf32>
    %c179 = arith.constant 179 : index
    %1060 = memref.load %arg2[%c179] : memref<244xf32, #tpu.memory_space<smem>>
    %1061 = vector.broadcast %1060 : f32 to vector<8x64xf32>
    %1062 = arith.mulf %1061, %82 : vector<8x64xf32>
    %1063 = arith.addf %1059, %1062 : vector<8x64xf32>
    %c188 = arith.constant 188 : index
    %1064 = memref.load %arg2[%c188] : memref<244xf32, #tpu.memory_space<smem>>
    %1065 = vector.broadcast %1064 : f32 to vector<8x64xf32>
    %1066 = arith.mulf %1065, %86 : vector<8x64xf32>
    %1067 = arith.addf %1063, %1066 : vector<8x64xf32>
    %c197 = arith.constant 197 : index
    %1068 = memref.load %arg2[%c197] : memref<244xf32, #tpu.memory_space<smem>>
    %1069 = vector.broadcast %1068 : f32 to vector<8x64xf32>
    %1070 = arith.mulf %1069, %90 : vector<8x64xf32>
    %1071 = arith.addf %1067, %1070 : vector<8x64xf32>
    %c206 = arith.constant 206 : index
    %1072 = memref.load %arg2[%c206] : memref<244xf32, #tpu.memory_space<smem>>
    %1073 = vector.broadcast %1072 : f32 to vector<8x64xf32>
    %1074 = arith.mulf %1073, %94 : vector<8x64xf32>
    %1075 = arith.addf %1071, %1074 : vector<8x64xf32>
    %c215 = arith.constant 215 : index
    %1076 = memref.load %arg2[%c215] : memref<244xf32, #tpu.memory_space<smem>>
    %1077 = vector.broadcast %1076 : f32 to vector<8x64xf32>
    %1078 = arith.mulf %1077, %98 : vector<8x64xf32>
    %1079 = arith.addf %1075, %1078 : vector<8x64xf32>
    %c224 = arith.constant 224 : index
    %1080 = memref.load %arg2[%c224] : memref<244xf32, #tpu.memory_space<smem>>
    %1081 = vector.broadcast %1080 : f32 to vector<8x64xf32>
    %1082 = arith.mulf %1081, %102 : vector<8x64xf32>
    %1083 = arith.addf %1079, %1082 : vector<8x64xf32>
    %c233 = arith.constant 233 : index
    %1084 = memref.load %arg2[%c233] : memref<244xf32, #tpu.memory_space<smem>>
    %1085 = vector.broadcast %1084 : f32 to vector<8x64xf32>
    %1086 = arith.mulf %1085, %106 : vector<8x64xf32>
    %1087 = arith.addf %1083, %1086 : vector<8x64xf32>
    %c242 = arith.constant 242 : index
    %1088 = memref.load %arg2[%c242] : memref<244xf32, #tpu.memory_space<smem>>
    %1089 = vector.broadcast %1088 : f32 to vector<8x64xf32>
    %1090 = arith.mulf %1089, %110 : vector<8x64xf32>
    %1091 = arith.addf %1087, %1090 : vector<8x64xf32>
    %1092 = vector.extract_strided_slice %1091 {offsets = [0, 8], sizes = [8, 56], strides = [1, 1]} : vector<8x64xf32> to vector<8x56xf32>
    %1093 = arith.addf %984, %1092 : vector<8x56xf32>
    %1094 = math.tanh %1093 : vector<8x56xf32>
    %cst = arith.constant 0.000000e+00 : f32
    %1095 = vector.broadcast %cst : f32 to vector<8x56xf32>
    %1096 = arith.maximumf %1094, %1095 : vector<8x56xf32>
    %c0_100 = arith.constant 0 : index
    %c0_101 = arith.constant 0 : index
    %c0_102 = arith.constant 0 : index
    %1097 = vector.load %arg4[%c0_100, %c0_101, %c0_102] : memref<1x8x56xf32, #tpu.memory_space<vmem>>, vector<1x8x56xf32>
    %1098 = vector.shape_cast %1097 : vector<1x8x56xf32> to vector<8x56xf32>
    %1099 = vector.shape_cast %1096 : vector<8x56xf32> to vector<1x8x56xf32>
    tpu.vector_store %arg4[%c0_100, %c0_101, %c0_102], %1099 {strides = array<i32>} : memref<1x8x56xf32, #tpu.memory_space<vmem>>, vector<1x8x56xf32>,
    return
  }
  func.func @transform_0(%arg0: i32, %arg1: i32) -> i32 {
    %c0_i32 = arith.constant 0 : i32
    %c0_i32_0 = arith.constant 0 : i32
    return %c0_i32 : i32
  }
  func.func @transform_1(%arg0: i32, %arg1: i32) -> (i32, i32, i32, i32) {
    %c0_i32 = arith.constant 0 : i32
    %c0_i32_0 = arith.constant 0 : i32
    %c0_i32_1 = arith.constant 0 : i32
    %c0_i32_2 = arith.constant 0 : i32
    return %arg0, %c0_i32, %c0_i32_0, %c0_i32_1 : i32, i32, i32, i32
  }
  func.func @transform_2(%arg0: i32, %arg1: i32) -> (i32, i32, i32) {
    %c0_i32 = arith.constant 0 : i32
    %c0_i32_0 = arith.constant 0 : i32
    return %arg0, %arg1, %c0_i32 : i32, i32, i32
  }
}

</mosaic_0001>

<bundles_post_ra>
// kernel: model_forward.1
= control target key start
LH: loop header
LB: loop body
LE: loop exit
PB: predicated region body
PF: predicated region fallthrough
CT: control target
= control target key end

     0   :  { %7 = vsyncpa [#allocation3], 0  ;;  %s1836_s9 = smov 0   ;;  %s1838_s10 = smov 0   ;;  %s2843_s0 = inlined_call_operand.vmem [shape: f32[244], index: 0, kind: input, shape index: {}]   ;;  %s2844_s1 = inlined_call_operand.vmem [shape: f32[1,3,64,64], index: 1, kind: input, shape index: {}]   ;;  %s2845_s2 = inlined_call_operand.vmem [shape: f32[1,64,56], index: 2, kind: output, shape index: {}]  }
   0x1   :  { %s1840_s11 = smov 0  }
   0x2 LB: > { %s1417_s12 = sadd.s32 4294967295, %s1810_s11   ;;  %s22_s13 = sadd.s32 1, %s1806_s10  ;;  %s1810_s11 = sphi %s1840_s11, %s13_s11   ;;  %s1806_s10 = sphi %s1838_s10, %s2849_s10   ;;  %s1802_s9 = sphi %s1836_s9, %s2848_s9  }
   0x3   : > { %p23_p0 = scmp.ge.s32.totalorder %s22_s13, 8  ;;  %p1419_p1 = scmp.ge.s32.totalorder %s1810_s11, 1 }
   0x4   : > { %p105_p2 = scmp.lt.s32.totalorder %s1810_s11, 9  ;;  %p1861_p4 = scmp.eq.s32.totalorder %s1417_s12, 0 }
   0x5   : > { %s2851_s13 = smov (%p23_p0, %s22_s13), 0  ;;  %s118_s18 = sshll.u32 %s2843_s0, 4  ;;  %s119_s18 = int_to_ptr.vmem [resolvable:$true] %s118_s18 }
   0x6   : > { %p1857_p3 = pnand %p1419_p1, %p105_p2  ;;  %s1769_s19 = scalar_lea.vmem %s119_s18, 32 }
   0x7   : > { %p1770_p7 = scmp.ne.s32.totalorder %s119_s18, %s1769_s19  ;;  %p1777_p11 = scmp.lt.s32.totalorder %s119_s18, %s119_s18 }
   0x8   : > { %p1701_p5 = pneg %p1857_p3  ;;  %p1778_p12 = scmp.lt.s32.totalorder %s1769_s19, %s1769_s19 }
   0xa   : > { %p1702_p6 = pnand %p1861_p4, %p1701_p5  ;;  %p1779_p13 = por %p1778_p12, %p1777_p11 }
   0xc   : > { %p1771_p8 = pneg %p1702_p6 }
   0xe   : > { %p1772_p9 = pnand %p1771_p8, %p1770_p7 }
  0x10   : > { %p1773_p10 = pneg %p1772_p9 }
  0x12   : > { %p1780_p0 = pnand %p1779_p13, %p1773_p10 }
  0x14   : > { %1783 = shalt.err (!%p1780_p0)
}
  0x15   : > { %s1812_s20 = smov [#allocation2]   ;;  %139 = sbr.rel (%p1857_p3) target bundleno = 408 (0x198), region = 28 }
  0x16   : > { %1704 = dma.vmem_to_smem (!%p1702_p6), %s119_s18, 32, %s1812_s20, [#allocation3]  }
  0x1a   : > { %1797 = dma.done.wait (%p1861_p4), [#allocation3], 32  }
  0x1b   : > { %1799 = vsyncadd (%p1861_p4), [#allocation3], 4294967264 }
  0x1c   : > { %145 = sfence }
  0x1d   : > { %s1425_s21 = sshll.u32 %s1802_s9, 3  ;;  %s1479_s22 = sld [smem:[#allocation2 + $0x1]]  ;;  %vm1269_vm0 = vcmask 457728  }
  0x1e   : > { %p179_p1 = scmp.lt.s32.totalorder %s1425_s21, 48  ;;  %s1480_s23 = sld [smem:[#allocation2 + $0xa]] }
  0x1f   : > { %s1481_s24 = sld [smem:[#allocation2 + $0x13]]  ;;  %p172_p2 = scmp.lt.s32.totalorder %s1802_s9, 7 }
  0x20   : > { %s2853_s21 = smov (!%p179_p1, %s1425_s21), 48  ;;  %s1482_s25 = sld [smem:[#allocation2 + $0x1c]] }
  0x21   : > { %s1882_s28 = scalar_lea.vmem %s2844_s1, %s2853_s21  ;;  %s1483_s29 = sld [smem:[#allocation2 + $0x25]] }
  0x22   : > { %v1885_v0 = vld [vmem:[%s1882_s28] sm:$0xff]  ;;  %s1484_s30 = sld [smem:[#allocation2 + $0x2e]]  ;;  %v1916_v27 = vld [vmem:[%s1882_s28 + $0x8] sm:$0xff]  ;;  %s2855_s9 = smov (!%p172_p2, %s1802_s9), 7 }
  0x23   : > { %v1888_v1 = vld [vmem:[%s1882_s28 + $0x1] sm:$0xff]  ;;  %v372_v3 = vstv %s1479_s22  ;;  %s1485_s3 = sld [smem:[#allocation2 + $0x37]] }
  0x24   : > { %v1891_v2 = vld [vmem:[%s1882_s28 + $0x2] sm:$0xff]  ;;  %v373_v4 = vmul.f32 %v372_v3, %v1885_v0  ;;  %v375_v5 = vstv %s1480_s23  ;;  %s1486_s4 = sld [smem:[#allocation2 + $0x40]] }
  0x25   : > { %v1895_v6 = vld [vmem:[%s1882_s28 + $0x3] sm:$0xff]  ;;  %v376_v7 = vmul.f32 %v1888_v1, %v375_v5  ;;  %v379_v8 = vstv %s1481_s24  ;;  %s1487_s5 = sld [smem:[#allocation2 + $0x49]] }
  0x26   : > { %v1899_v9 = vld [vmem:[%s1882_s28 + $0x4] sm:$0xff]  ;;  %v380_v10 = vmul.f32 %v1891_v2, %v379_v8  ;;  %v383_v12 = vstv %s1482_s25  ;;  %s1488_s6 = sld [smem:[#allocation2 + $0x52]] }
  0x27   : > { %v377_v11 = vadd.f32 %v376_v7, %v373_v4  ;;  %v1903_v13 = vld [vmem:[%s1882_s28 + $0x5] sm:$0xff]  ;;  %v384_v14 = vmul.f32 %v1895_v6, %v383_v12  ;;  %v387_v15 = vstv %s1483_s29  ;;  %s1489_s7 = sld [smem:[#allocation2 + $0x5b]] }
  0x28   : > { %v388_v17 = vmul.f32 %v1899_v9, %v387_v15  ;;  %v391_v18 = vstv %s1484_s30  ;;  %v1908_v19 = vld [vmem:[%s1882_s28 + $0x6] sm:$0xff]  ;;  %s1490_s8 = sld [smem:[#allocation2 + $0x64]] }
  0x29   : > { %v381_v16 = vadd.f32 %v380_v10, %v377_v11  ;;  %v395_v20 = vstv %s1485_s3  ;;  %v392_v22 = vmul.f32 %v1903_v13, %v391_v18  ;;  %v1912_v23 = vld [vmem:[%s1882_s28 + $0x7] sm:$0xff]  ;;  %s1918_s12 = sld [smem:[#allocation2 + $0x6d]] }
  0x2a   : > { %v399_v24 = vstv %s1486_s4  ;;  %v396_v26 = vmul.f32 %v1908_v19, %v395_v20  ;;  %v1922_v31 = vld [vmem:[%s1882_s28 + $0x40] sm:$0xff]  ;;  %s1924_s14 = sld [smem:[#allocation2 + $0x76]]  ;;  %v1980_v61 = vld [vmem:[%s1882_s28 + $0x48] sm:$0xff] }
  0x2b   : > { %v385_v21 = vadd.f32 %v384_v14, %v381_v16  ;;  %v403_v28 = vstv %s1487_s5  ;;  %v400_v30 = vmul.f32 %v1912_v23, %v399_v24  ;;  %s1927_s15 = sld [smem:[#allocation2 + $0x7f]]  ;;  %v1930_v35 = vld [vmem:[%s1882_s28 + $0x41] sm:$0xff] }
  0x2c   : > { %v407_v32 = vstv %s1488_s6  ;;  %v404_v34 = vmul.f32 %v1916_v27, %v403_v28  ;;  %s1932_s16 = sld [smem:[#allocation2 + $0x88]]  ;;  %v1938_v39 = vld [vmem:[%s1882_s28 + $0x42] sm:$0xff] }
  0x2d   : > { %v389_v25 = vadd.f32 %v388_v17, %v385_v21  ;;  %v411_v36 = vstv %s1489_s7  ;;  %v408_v38 = vmul.f32 %v1922_v31, %v407_v32  ;;  %s1935_s17 = sld [smem:[#allocation2 + $0x91]]  ;;  %v1946_v43 = vld [vmem:[%s1882_s28 + $0x43] sm:$0xff] }
  0x2e   : > { %v415_v40 = vstv %s1490_s8  ;;  %s1940_s18 = sld [smem:[#allocation2 + $0x9a]]  ;;  %v412_v42 = vmul.f32 %v1930_v35, %v411_v36  ;;  %v1955_v47 = vld [vmem:[%s1882_s28 + $0x44] sm:$0xff] }
  0x2f   : > { %v393_v29 = vadd.f32 %v392_v22, %v389_v25  ;;  %s1943_s19 = sld [smem:[#allocation2 + $0xa3]]  ;;  %v419_v44 = vstv %s1918_s12  ;;  %v416_v46 = vmul.f32 %v1938_v39, %v415_v40  ;;  %v1962_v51 = vld [vmem:[%s1882_s28 + $0x45] sm:$0xff] }
  0x30   : > { %s1949_s20 = sld [smem:[#allocation2 + $0xac]]  ;;  %v423_v48 = vstv %s1924_s14  ;;  %v420_v50 = vmul.f32 %v1946_v43, %v419_v44  ;;  %v1967_v55 = vld [vmem:[%s1882_s28 + $0x46] sm:$0xff] }
  0x31   : > { %v397_v33 = vadd.f32 %v396_v26, %v393_v29  ;;  %s1952_s21 = sld [smem:[#allocation2 + $0xb5]]  ;;  %v427_v52 = vstv %s1927_s15  ;;  %v424_v54 = vmul.f32 %v1955_v47, %v423_v48  ;;  %v1974_v59 = vld [vmem:[%s1882_s28 + $0x47] sm:$0xff] }
  0x32   : > { %s1958_s22 = sld [smem:[#allocation2 + $0xbe]]  ;;  %v431_v56 = vstv %s1932_s16  ;;  %v428_v58 = vmul.f32 %v1962_v51, %v427_v52  ;;  %v1994_v14 = vld [vmem:[%s1882_s28 + $0x80] sm:$0xff] }
  0x33   : > { %v401_v37 = vadd.f32 %v400_v30, %v397_v33  ;;  %s1533_s23 = sld [smem:[#allocation2 + $0x3]]  ;;  %v435_v60 = vstv %s1935_s17  ;;  %v432_v63 = vmul.f32 %v1967_v55, %v431_v56  ;;  %v2006_v25 = vld [vmem:[%s1882_s28 + $0x81] sm:$0xff] }
  0x34   : > { %s1534_s24 = sld [smem:[#allocation2 + $0xc]]  ;;  %v439_v3 = vstv %s1940_s18  ;;  %v436_v10 = vmul.f32 %v1974_v59, %v435_v60  ;;  %v2028_v44 = vld [vmem:[%s1882_s28 + $0x83] sm:$0xff] }
  0x35   : > { %v405_v41 = vadd.f32 %v404_v34, %v401_v37  ;;  %s1535_s25 = sld [smem:[#allocation2 + $0x15]]  ;;  %v440_v15 = vmul.f32 %v1980_v61, %v439_v3  ;;  %v443_v16 = vstv %s1943_s19  ;;  %v2017_v34 = vld [vmem:[%s1882_s28 + $0x82] sm:$0xff] }
  0x36   : > { %s1536_s26 = sld [smem:[#allocation2 + $0x1e]]  ;;  %v447_v26 = vstv %s1949_s20  ;;  %v444_v30 = vmul.f32 %v1994_v14, %v443_v16 }
  0x37   : > { %v409_v45 = vadd.f32 %v408_v38, %v405_v41  ;;  %s1971_s27 = sld [smem:[#allocation2 + $0x27]]  ;;  %v451_v36 = vstv %s1952_s21  ;;  %v448_v40 = vmul.f32 %v2006_v25, %v447_v26 }
  0x38   : > { %s1977_s29 = sld [smem:[#allocation2 + $0x30]] }
  0x39   : > { %v413_v49 = vadd.f32 %v412_v42, %v409_v45  ;;  %v596_v4 = vstv %s1533_s23  ;;  %s1984_s30 = sld [smem:[#allocation2 + $0x39]]  ;;  %v455_v45 = vstv %s1958_s22 }
  0x3a   : > { %v597_v5 = vmul.f32 %v596_v4, %v1885_v0  ;;  %v599_v7 = vstv %s1534_s24  ;;  %s1987_s3 = sld [smem:[#allocation2 + $0x42]] }
  0x3b   : > { %v417_v53 = vadd.f32 %v416_v46, %v413_v49  ;;  %s1990_s4 = sld [smem:[#allocation2 + $0xc7]]  ;;  %v600_v11 = vmul.f32 %v1888_v1, %v599_v7  ;;  %v603_v12 = vstv %s1535_s25  ;;  %v452_v49 = vmul.f32 %v2017_v34, %v451_v36 }
  0x3c   : > { %v604_v17 = vmul.f32 %v1891_v2, %v603_v12  ;;  %v607_v18 = vstv %s1536_s26  ;;  %s1999_s5 = sld [smem:[#allocation2 + $0x4b]] }
  0x3d   : > { %v421_v57 = vadd.f32 %v420_v50, %v417_v53  ;;  %s2001_s6 = sld [smem:[#allocation2 + $0xd0]]  ;;  %v601_v21 = vadd.f32 %v600_v11, %v597_v5  ;;  %v608_v22 = vmul.f32 %v1895_v6, %v607_v18  ;;  %v611_v24 = vstv %s1971_s27  ;;  %v2039_v53 = vld [vmem:[%s1882_s28 + $0x84] sm:$0xff] }
  0x3e   : > { %v615_v28 = vstv %s1977_s29  ;;  %s2010_s7 = sld [smem:[#allocation2 + $0x54]]  ;;  %v612_v33 = vmul.f32 %v1899_v9, %v611_v24  ;;  %v2059_v11 = vld [vmem:[%s1882_s28 + $0x86] sm:$0xff] }
  0x3f   : > { %v425_v62 = vadd.f32 %v424_v54, %v421_v57  ;;  %s2013_s8 = sld [smem:[#allocation2 + $0xd9]]  ;;  %v605_v32 = vadd.f32 %v604_v17, %v601_v21  ;;  %v619_v37 = vstv %s1984_s30  ;;  %v616_v42 = vmul.f32 %v1903_v13, %v615_v28  ;;  %v2070_v21 = vld [vmem:[%s1882_s28 + $0x87] sm:$0xff] }
  0x40   : > { %s2021_s12 = sld [smem:[#allocation2 + $0x5d]]  ;;  %v623_v46 = vstv %s1987_s3  ;;  %v620_v52 = vmul.f32 %v1908_v19, %v619_v37 }
  0x41   : > { %v429_v8 = vadd.f32 %v428_v58, %v425_v62  ;;  %s2024_s14 = sld [smem:[#allocation2 + $0xe2]]  ;;  %v609_v41 = vadd.f32 %v608_v22, %v605_v32  ;;  %v459_v54 = vstv %s1990_s4  ;;  %v456_v58 = vmul.f32 %v2028_v44, %v455_v45  ;;  %v2081_v32 = vld [vmem:[%s1882_s28 + $0x88] sm:$0xff] }
  0x42   : > { %s2032_s15 = sld [smem:[#allocation2 + $0x66]]  ;;  %v627_v56 = vstv %s1999_s5  ;;  %v624_v62 = vmul.f32 %v1912_v23, %v623_v46  ;;  %v460_v7 = vmul.f32 %v2039_v53, %v459_v54 }
  0x43   : > { %v433_v20 = vadd.f32 %v432_v63, %v429_v8  ;;  %s2035_s16 = sld [smem:[#allocation2 + $0xeb]]  ;;  %v613_v50 = vadd.f32 %v612_v33, %v609_v41  ;;  %v2048_v63 = vld [vmem:[%s1882_s28 + $0x85] sm:$0xff]  ;;  %v463_v3 = vstv %s2001_s6  ;;  %s1813_s6 = smov 127  }
  0x44   : > { %s2043_s17 = sld [smem:[#allocation2 + $0x6f]]  ;;  %v631_v4 = vstv %s2010_s7  ;;  %v464_v17 = vmul.f32 %v2048_v63, %v463_v3 }
  0x45   : > { %v437_v29 = vadd.f32 %v436_v10, %v433_v20  ;;  %v617_v60 = vadd.f32 %v616_v42, %v613_v50  ;;  %s2052_s18 = sld [smem:[#allocation2 + $0x78]]  ;;  %v628_v10 = vmul.f32 %v1916_v27, %v627_v56  ;;  %v467_v12 = vstv %s2013_s8 }
  0x46   : > { %s2056_s19 = sld [smem:[#allocation2 + $0x81]]  ;;  %v632_v20 = vmul.f32 %v1922_v31, %v631_v4  ;;  %v468_v28 = vmul.f32 %v2059_v11, %v467_v12 }
  0x47   : > { %v441_v38 = vadd.f32 %v440_v15, %v437_v29  ;;  %v621_v8 = vadd.f32 %v620_v52, %v617_v60  ;;  %v635_v15 = vstv %s2021_s12  ;;  %s2063_s20 = sld [smem:[#allocation2 + $0x8a]]  ;;  %v471_v22 = vstv %s2024_s14 }
  0x48   : > { %s2067_s21 = sld [smem:[#allocation2 + $0x93]]  ;;  %v639_v24 = vstv %s2032_s15 }
  0x49   : > { %v445_v48 = vadd.f32 %v444_v30, %v441_v38  ;;  %v625_v18 = vadd.f32 %v624_v62, %v621_v8  ;;  %s2074_s22 = sld [smem:[#allocation2 + $0x9c]]  ;;  %v636_v30 = vmul.f32 %v1930_v35, %v635_v15  ;;  %v475_v33 = vstv %s2035_s16 }
  0x4a   : > { %s2078_s23 = sld [smem:[#allocation2 + $0xa5]]  ;;  %v643_v36 = vstv %s2043_s17  ;;  %v472_v38 = vmul.f32 %v2070_v21, %v471_v22  ;;  %v640_v41 = vmul.f32 %v1938_v39, %v639_v24  ;;  %v476_v46 = vmul.f32 %v2081_v32, %v475_v33 }
  0x4b   : > { %v449_v57 = vadd.f32 %v448_v40, %v445_v48  ;;  %v629_v29 = vadd.f32 %v628_v10, %v625_v18  ;;  %s2085_s24 = sld [smem:[#allocation2 + $0xae]]  ;;  %v647_v42 = vstv %s2052_s18 }
  0x4c   : > { %s2089_s25 = sld [smem:[#allocation2 + $0xb7]]  ;;  %v651_v50 = vstv %s2056_s19  ;;  %v648_v56 = vmul.f32 %v1955_v47, %v647_v42 }
  0x4d   : > { %v453_v5 = vadd.f32 %v452_v49, %v449_v57  ;;  %v633_v40 = vadd.f32 %v632_v20, %v629_v29  ;;  %s1506_s26 = sld [smem:[#allocation2 + $0x2]]  ;;  %v644_v49 = vmul.f32 %v1946_v43, %v643_v36  ;;  %v655_v57 = vstv %s2063_s20 }
  0x4e   : > { %s1507_s27 = sld [smem:[#allocation2 + $0xb]]  ;;  %v652_v62 = vmul.f32 %v1962_v51, %v651_v50  ;;  %v659_v3 = vstv %s2067_s21 }
  0x4f   : > { %v457_v16 = vadd.f32 %v456_v58, %v453_v5  ;;  %v637_v48 = vadd.f32 %v636_v30, %v633_v40  ;;  %s1508_s29 = sld [smem:[#allocation2 + $0x14]]  ;;  %v663_v12 = vstv %s2074_s22  ;;  %v660_v18 = vmul.f32 %v1974_v59, %v659_v3 }
  0x50   : > { %s1509_s30 = sld [smem:[#allocation2 + $0x1d]]  ;;  %v667_v24 = vstv %s2078_s23  ;;  %v664_v33 = vmul.f32 %v1980_v61, %v663_v12 }
  0x51   : > { %v461_v26 = vadd.f32 %v460_v7, %v457_v16  ;;  %v641_v54 = vadd.f32 %v640_v41, %v637_v48  ;;  %s2097_s3 = sld [smem:[#allocation2 + $0x26]]  ;;  %v656_v7 = vmul.f32 %v1967_v55, %v655_v57  ;;  %v668_v42 = vmul.f32 %v1994_v14, %v667_v24 }
  0x52   : > { %s2100_s4 = sld [smem:[#allocation2 + $0x2f]] }
  0x53   : > { %v465_v37 = vadd.f32 %v464_v17, %v461_v26  ;;  %v645_v60 = vadd.f32 %v644_v49, %v641_v54  ;;  %v484_v4 = vstv %s1506_s26  ;;  %s2103_s5 = sld [smem:[#allocation2 + $0x38]] }
  0x54   : > { %v485_v8 = vmul.f32 %v484_v4, %v1885_v0  ;;  %v487_v10 = vstv %s1507_s27  ;;  %s2107_s7 = sld [smem:[#allocation2 + $0x41]] }
  0x55   : > { %v469_v45 = vadd.f32 %v468_v28, %v465_v37  ;;  %v649_v5 = vadd.f32 %v648_v56, %v645_v60  ;;  %s2110_s8 = sld [smem:[#allocation2 + $0xc0]]  ;;  %v488_v15 = vmul.f32 %v1888_v1, %v487_v10  ;;  %v491_v16 = vstv %s1508_s29 }
  0x56   : > { %v492_v20 = vmul.f32 %v1891_v2, %v491_v16  ;;  %v495_v22 = vstv %s1509_s30  ;;  %s2115_s12 = sld [smem:[#allocation2 + $0x4a]]  ;;  %v671_v37 = vstv %s2085_s24 }
  0x57   : > { %v473_v52 = vadd.f32 %v472_v38, %v469_v45  ;;  %v653_v17 = vadd.f32 %v652_v62, %v649_v5  ;;  %s2118_s14 = sld [smem:[#allocation2 + $0xc9]]  ;;  %v489_v26 = vadd.f32 %v488_v15, %v485_v8  ;;  %v496_v28 = vmul.f32 %v1895_v6, %v495_v22 }
  0x58   : > { %v499_v29 = vstv %s2097_s3  ;;  %v503_v36 = vstv %s2100_s4  ;;  %s2124_s15 = sld [smem:[#allocation2 + $0x53]] }
  0x59   : > { %v477_v58 = vadd.f32 %v476_v46, %v473_v52  ;;  %v657_v30 = vadd.f32 %v656_v7, %v653_v17  ;;  %s2127_s16 = sld [smem:[#allocation2 + $0xd2]]  ;;  %v493_v38 = vadd.f32 %v492_v20, %v489_v26  ;;  %v500_v40 = vmul.f32 %v1899_v9, %v499_v29 }
  0x5a   : > { %v507_v45 = vstv %s2103_s5  ;;  %s2132_s17 = sld [smem:[#allocation2 + $0x5c]]  ;;  %v675_v46 = vstv %s2089_s25  ;;  %v504_v49 = vmul.f32 %v1903_v13, %v503_v36  ;;  %v672_v52 = vmul.f32 %v2006_v25, %v671_v37 }
  0x5b   : > { %479 = vrot.lane.b32.xlu0 %v477_v58, %s1813_s6  ;;  %v661_v41 = vadd.f32 %v660_v18, %v657_v30  ;;  %s2135_s18 = sld [smem:[#allocation2 + $0xdb]]  ;;  %v497_v48 = vadd.f32 %v496_v28, %v493_v38  ;;  %v511_v54 = vstv %s2107_s7  ;;  %v679_v56 = vstv %s2110_s8 }
  0x5c   : > { %s2140_s19 = sld [smem:[#allocation2 + $0x65]]  ;;  %v508_v58 = vmul.f32 %v1908_v19, %v507_v45  ;;  %v676_v62 = vmul.f32 %v2017_v34, %v675_v46  ;;  %v515_v3 = vstv %s2115_s12  ;;  %v512_v7 = vmul.f32 %v1912_v23, %v511_v54 }
  0x5d   : > { %v665_v50 = vadd.f32 %v664_v33, %v661_v41  ;;  %s2143_s20 = sld [smem:[#allocation2 + $0xe4]]  ;;  %v501_v57 = vadd.f32 %v500_v40, %v497_v48  ;;  %v683_v4 = vstv %s2118_s14  ;;  %v680_v10 = vmul.f32 %v2028_v44, %v679_v56 }
  0x5e   : > { %s2148_s21 = sld [smem:[#allocation2 + $0x6e]]  ;;  %v519_v12 = vstv %s2124_s15  ;;  %v516_v17 = vmul.f32 %v1916_v27, %v515_v3  ;;  %v684_v20 = vmul.f32 %v2039_v53, %v683_v4 }
  0x5f   : > { %v669_v60 = vadd.f32 %v668_v42, %v665_v50  ;;  %s2151_s22 = sld [smem:[#allocation2 + $0xed]]  ;;  %v505_v5 = vadd.f32 %v504_v49, %v501_v57  ;;  %v687_v15 = vstv %s2127_s16  ;;  %v520_v28 = vmul.f32 %v1922_v31, %v519_v12  ;;  %s1814_s16 = smov 125  }
  0x60   : > { %s2156_s23 = sld [smem:[#allocation2 + $0x77]]  ;;  %v523_v22 = vstv %s2132_s17  ;;  %v688_v30 = vmul.f32 %v2048_v63, %v687_v15 }
  0x61   : > { %v673_v8 = vadd.f32 %v672_v52, %v669_v60  ;;  %v509_v16 = vadd.f32 %v508_v58, %v505_v5  ;;  %s2160_s24 = sld [smem:[#allocation2 + $0x80]]  ;;  %v691_v24 = vstv %s2135_s18  ;;  %v524_v38 = vmul.f32 %v1930_v35, %v523_v22 }
  0x62   : > { %s2164_s25 = sld [smem:[#allocation2 + $0x89]]  ;;  %v527_v33 = vstv %s2140_s19  ;;  %v692_v41 = vmul.f32 %v2059_v11, %v691_v24 }
  0x63   : > { %v677_v18 = vadd.f32 %v676_v62, %v673_v8  ;;  %v513_v26 = vadd.f32 %v512_v7, %v509_v16  ;;  %s2168_s26 = sld [smem:[#allocation2 + $0x92]]  ;;  %v695_v36 = vstv %s2143_s20  ;;  %v528_v48 = vmul.f32 %v1938_v39, %v527_v33 }
  0x64   : > { %s2172_s27 = sld [smem:[#allocation2 + $0x9b]]  ;;  %v531_v42 = vstv %s2148_s21  ;;  %v696_v50 = vmul.f32 %v2070_v21, %v695_v36 }
  0x65   : > { %v681_v29 = vadd.f32 %v680_v10, %v677_v18  ;;  %v517_v37 = vadd.f32 %v516_v17, %v513_v26  ;;  %s2176_s29 = sld [smem:[#allocation2 + $0xa4]]  ;;  %v699_v45 = vstv %s2151_s22  ;;  %v532_v56 = vmul.f32 %v1946_v43, %v531_v42 }
  0x66   : > { %s2180_s30 = sld [smem:[#allocation2 + $0xad]]  ;;  %v535_v52 = vstv %s2156_s23  ;;  %v700_v58 = vmul.f32 %v2081_v32, %v699_v45 }
  0x67   : > { %v685_v40 = vadd.f32 %v684_v20, %v681_v29  ;;  %v521_v46 = vadd.f32 %v520_v28, %v517_v37  ;;  %s2184_s3 = sld [smem:[#allocation2 + $0xb6]]  ;;  %v539_v60 = vstv %s2160_s24  ;;  %v536_v3 = vmul.f32 %v1955_v47, %v535_v52 }
  0x68   : > { %s1560_s4 = sld [smem:[#allocation2 + $0x4]]  ;;  %v543_v5 = vstv %s2164_s25  ;;  %v540_v8 = vmul.f32 %v1962_v51, %v539_v60 }
  0x69   : > { %v689_v49 = vadd.f32 %v688_v30, %v685_v40  ;;  %v525_v54 = vadd.f32 %v524_v38, %v521_v46  ;;  %s1561_s5 = sld [smem:[#allocation2 + $0xd]]  ;;  %v547_v12 = vstv %s2168_s26  ;;  %v544_v17 = vmul.f32 %v1967_v55, %v543_v5 }
  0x6a   : > { %s1562_s6 = sld [smem:[#allocation2 + $0x16]]  ;;  %v551_v22 = vstv %s2172_s27  ;;  %v548_v29 = vmul.f32 %v1974_v59, %v547_v12 }
  0x6b   : > { %v693_v57 = vadd.f32 %v692_v41, %v689_v49  ;;  %v529_v62 = vadd.f32 %v528_v48, %v525_v54  ;;  %s1563_s7 = sld [smem:[#allocation2 + $0x1f]]  ;;  %v555_v36 = vstv %s2176_s29  ;;  %v552_v42 = vmul.f32 %v1980_v61, %v551_v22 }
  0x6c   : > { %s2193_s8 = sld [smem:[#allocation2 + $0x28]]  ;;  %v559_v46 = vstv %s2180_s30  ;;  %v556_v52 = vmul.f32 %v1994_v14, %v555_v36 }
  0x6d   : > { %v697_v4 = vadd.f32 %v696_v50, %v693_v57  ;;  %v533_v7 = vadd.f32 %v532_v56, %v529_v62  ;;  %s2196_s12 = sld [smem:[#allocation2 + $0x31]]  ;;  %v563_v56 = vstv %s2184_s3  ;;  %v560_v62 = vmul.f32 %v2006_v25, %v559_v46 }
  0x6e   : > { %v708_v15 = vstv %s1560_s4  ;;  %s2199_s14 = sld [smem:[#allocation2 + $0x3a]] }
  0x6f   : > { %v701_v10 = vadd.f32 %v700_v58, %v697_v4  ;;  %v537_v16 = vadd.f32 %v536_v3, %v533_v7  ;;  %v709_v18 = vmul.f32 %v708_v15, %v1885_v0  ;;  %v711_v20 = vstv %s1561_s5  ;;  %s2203_s15 = sld [smem:[#allocation2 + $0x43]] }
  0x70   : > { %s2206_s17 = sld [smem:[#allocation2 + $0xbf]]  ;;  %v712_v24 = vmul.f32 %v1888_v1, %v711_v20  ;;  %v715_v26 = vstv %s1562_s6 }
  0x71   : > { %703 = vrot.lane.b32.xlu1 %v701_v10, %s1814_s16  ;;  %v541_v28 = vadd.f32 %v540_v8, %v537_v16  ;;  %v716_v30 = vmul.f32 %v1891_v2, %v715_v26  ;;  %v719_v33 = vstv %s1563_s7  ;;  %s2211_s18 = sld [smem:[#allocation2 + $0x4c]]  ;;  %v564_v10 = vmul.f32 %v2017_v34, %v563_v56 }
  0x72   : > { %s2214_s19 = sld [smem:[#allocation2 + $0xc8]]  ;;  %v713_v37 = vadd.f32 %v712_v24, %v709_v18  ;;  %v720_v38 = vmul.f32 %v1895_v6, %v719_v33  ;;  %v723_v40 = vstv %s2193_s8 }
  0x73   : > { %v545_v41 = vadd.f32 %v544_v17, %v541_v28  ;;  %v727_v45 = vstv %s2196_s12  ;;  %s2220_s20 = sld [smem:[#allocation2 + $0x55]]  ;;  %v724_v49 = vmul.f32 %v1899_v9, %v723_v40 }
  0x74   : > { %s2223_s21 = sld [smem:[#allocation2 + $0xd1]]  ;;  %v717_v48 = vadd.f32 %v716_v30, %v713_v37  ;;  %v731_v54 = vstv %s2199_s14  ;;  %v728_v58 = vmul.f32 %v1903_v13, %v727_v45 }
  0x75   : > { %v549_v50 = vadd.f32 %v548_v29, %v545_v41  ;;  %s2228_s22 = sld [smem:[#allocation2 + $0x5e]]  ;;  %v735_v3 = vstv %s2203_s15  ;;  %v732_v7 = vmul.f32 %v1908_v19, %v731_v54 }
  0x76   : > { %s2231_s23 = sld [smem:[#allocation2 + $0xda]]  ;;  %v721_v57 = vadd.f32 %v720_v38, %v717_v48  ;;  %v567_v4 = vstv %s2206_s17  ;;  %v736_v17 = vmul.f32 %v1912_v23, %v735_v3 }
  0x77   : > { %v553_v60 = vadd.f32 %v552_v42, %v549_v50  ;;  %s2236_s24 = sld [smem:[#allocation2 + $0x67]]  ;;  %v739_v12 = vstv %s2211_s18  ;;  %v568_v20 = vmul.f32 %v2028_v44, %v567_v4 }
  0x78   : > { %s2239_s25 = sld [smem:[#allocation2 + $0xe3]]  ;;  %v725_v5 = vadd.f32 %v724_v49, %v721_v57  ;;  %v571_v15 = vstv %s2214_s19  ;;  %v740_v28 = vmul.f32 %v1916_v27, %v739_v12 }
  0x79   : > { %v557_v8 = vadd.f32 %v556_v52, %v553_v60  ;;  %s2244_s26 = sld [smem:[#allocation2 + $0x70]]  ;;  %v743_v22 = vstv %s2220_s20  ;;  %v572_v30 = vmul.f32 %v2039_v53, %v571_v15 }
  0x7a   : > { %s2247_s27 = sld [smem:[#allocation2 + $0xec]]  ;;  %v729_v16 = vadd.f32 %v728_v58, %v725_v5  ;;  %v575_v24 = vstv %s2223_s21  ;;  %v744_v38 = vmul.f32 %v1922_v31, %v743_v22  ;;  %s1815_s21 = smov 126  }
  0x7b   : > { %v561_v18 = vadd.f32 %v560_v62, %v557_v8  ;;  %s2252_s29 = sld [smem:[#allocation2 + $0x79]]  ;;  %v747_v33 = vstv %s2228_s22  ;;  %v576_v41 = vmul.f32 %v2048_v63, %v575_v24 }
  0x7c   : > { %v733_v26 = vadd.f32 %v732_v7, %v729_v16  ;;  %s2256_s30 = sld [smem:[#allocation2 + $0x82]]  ;;  %v579_v36 = vstv %s2231_s23  ;;  %v748_v48 = vmul.f32 %v1930_v35, %v747_v33 }
  0x7d   : > { %v565_v29 = vadd.f32 %v564_v10, %v561_v18  ;;  %s2260_s3 = sld [smem:[#allocation2 + $0x8b]]  ;;  %v751_v42 = vstv %s2236_s24  ;;  %v580_v50 = vmul.f32 %v2059_v11, %v579_v36 }
  0x7e   : > { %v737_v37 = vadd.f32 %v736_v17, %v733_v26  ;;  %s2264_s4 = sld [smem:[#allocation2 + $0x94]]  ;;  %v583_v45 = vstv %s2239_s25  ;;  %v752_v57 = vmul.f32 %v1938_v39, %v751_v42 }
  0x7f   : > { %v569_v40 = vadd.f32 %v568_v20, %v565_v29  ;;  %s2268_s5 = sld [smem:[#allocation2 + $0x9d]]  ;;  %v755_v52 = vstv %s2244_s26  ;;  %v584_v60 = vmul.f32 %v2070_v21, %v583_v45 }
  0x80   : > { %v741_v46 = vadd.f32 %v740_v28, %v737_v37  ;;  %s2272_s6 = sld [smem:[#allocation2 + $0xa6]]  ;;  %v587_v54 = vstv %s2247_s27  ;;  %v756_v4 = vmul.f32 %v1946_v43, %v755_v52 }
  0x81   : > { %v573_v49 = vadd.f32 %v572_v30, %v569_v40  ;;  %s2276_s7 = sld [smem:[#allocation2 + $0xaf]]  ;;  %v759_v62 = vstv %s2252_s29  ;;  %v588_v7 = vmul.f32 %v2081_v32, %v587_v54 }
  0x82   : > { %v745_v56 = vadd.f32 %v744_v38, %v741_v46  ;;  %s2280_s8 = sld [smem:[#allocation2 + $0xb8]]  ;;  %v763_v8 = vstv %s2256_s30  ;;  %v760_v12 = vmul.f32 %v1955_v47, %v759_v62 }
  0x83   : > { %v577_v58 = vadd.f32 %v576_v41, %v573_v49  ;;  %s1587_s12 = sld [smem:[#allocation2 + $0x5]]  ;;  %v767_v16 = vstv %s2260_s3  ;;  %v764_v18 = vmul.f32 %v1962_v51, %v763_v8 }
  0x84   : > { %v749_v3 = vadd.f32 %v748_v48, %v745_v56  ;;  %s1588_s14 = sld [smem:[#allocation2 + $0xe]]  ;;  %v771_v22 = vstv %s2264_s4  ;;  %v768_v28 = vmul.f32 %v1967_v55, %v767_v16 }
  0x85   : > { %v581_v5 = vadd.f32 %v580_v50, %v577_v58  ;;  %s1589_s15 = sld [smem:[#allocation2 + $0x17]]  ;;  %v775_v33 = vstv %s2268_s5  ;;  %v772_v40 = vmul.f32 %v1974_v59, %v771_v22 }
  0x86   : > { %v753_v10 = vadd.f32 %v752_v57, %v749_v3  ;;  %s1590_s16 = sld [smem:[#allocation2 + $0x20]]  ;;  %v779_v42 = vstv %s2272_s6  ;;  %v776_v49 = vmul.f32 %v1980_v61, %v775_v33 }
  0x87   : > { %v585_v15 = vadd.f32 %v584_v60, %v581_v5  ;;  %s2289_s17 = sld [smem:[#allocation2 + $0x29]]  ;;  %v780_v57 = vmul.f32 %v1994_v14, %v779_v42 }
  0x88   : > { %v757_v17 = vadd.f32 %v756_v4, %v753_v10  ;;  %s2292_s18 = sld [smem:[#allocation2 + $0x32]] }
  0x89   : > { %v589_v20 = vadd.f32 %v588_v7, %v585_v15  ;;  %v820_v24 = vstv %s1587_s12  ;;  %s2295_s19 = sld [smem:[#allocation2 + $0x3b]] }
  0x8a   : > { %v761_v26 = vadd.f32 %v760_v12, %v757_v17  ;;  %v821_v29 = vmul.f32 %v820_v24, %v1885_v0  ;;  %v823_v30 = vstv %s1588_s14  ;;  %s2299_s20 = sld [smem:[#allocation2 + $0x44]] }
  0x8b   : > { %591 = vrot.lane.b32.xlu0 %v589_v20, %s1815_s21  ;;  %s2302_s22 = sld [smem:[#allocation2 + $0xc1]]  ;;  %v824_v36 = vmul.f32 %v1888_v1, %v823_v30  ;;  %v827_v37 = vstv %s1589_s15 }
  0x8c   : > { %v765_v38 = vadd.f32 %v764_v18, %v761_v26  ;;  %v828_v41 = vmul.f32 %v1891_v2, %v827_v37  ;;  %v831_v0 = vstv %s1590_s16  ;;  %s2307_s23 = sld [smem:[#allocation2 + $0x4d]]  ;;  %v783_v2 = vstv %s2276_s7 }
  0x8d   : > { %s2310_s24 = sld [smem:[#allocation2 + $0xca]]  ;;  %v825_v45 = vadd.f32 %v824_v36, %v821_v29  ;;  %v832_v46 = vmul.f32 %v1895_v6, %v831_v0  ;;  %v835_v48 = vstv %s2289_s17  ;;  %v787_v6 = vstv %s2280_s8 }
  0x8e   : > { %v769_v1 = vadd.f32 %v768_v28, %v765_v38  ;;  %v839_v50 = vstv %s2292_s18  ;;  %s2316_s25 = sld [smem:[#allocation2 + $0x56]]  ;;  %v836_v54 = vmul.f32 %v1899_v9, %v835_v48  ;;  %v784_v4 = vmul.f32 %v2006_v25, %v783_v2 }
  0x8f   : > { %s2319_s26 = sld [smem:[#allocation2 + $0xd3]]  ;;  %v829_v52 = vadd.f32 %v828_v41, %v825_v45  ;;  %v843_v58 = vstv %s2295_s19  ;;  %v840_v62 = vmul.f32 %v1903_v13, %v839_v50  ;;  %v788_v12 = vmul.f32 %v2017_v34, %v787_v6 }
  0x90   : > { %v773_v56 = vadd.f32 %v772_v40, %v769_v1  ;;  %s2324_s27 = sld [smem:[#allocation2 + $0x5f]]  ;;  %v847_v5 = vstv %s2299_s20  ;;  %v844_v8 = vmul.f32 %v1908_v19, %v843_v58 }
  0x91   : > { %s2327_s29 = sld [smem:[#allocation2 + $0xdc]]  ;;  %v833_v60 = vadd.f32 %v832_v46, %v829_v52  ;;  %v791_v9 = vstv %s2302_s22  ;;  %v848_v17 = vmul.f32 %v1912_v23, %v847_v5 }
  0x92   : > { %v777_v3 = vadd.f32 %v776_v49, %v773_v56  ;;  %s2332_s30 = sld [smem:[#allocation2 + $0x68]]  ;;  %v851_v15 = vstv %s2307_s23  ;;  %v792_v20 = vmul.f32 %v2028_v44, %v791_v9 }
  0x93   : > { %s2335_s3 = sld [smem:[#allocation2 + $0xe5]]  ;;  %v837_v7 = vadd.f32 %v836_v54, %v833_v60  ;;  %v795_v13 = vstv %s2310_s24  ;;  %v852_v26 = vmul.f32 %v1916_v27, %v851_v15 }
  0x94   : > { %v781_v10 = vadd.f32 %v780_v57, %v777_v3  ;;  %s2340_s4 = sld [smem:[#allocation2 + $0x71]]  ;;  %v855_v22 = vstv %s2316_s25  ;;  %v796_v29 = vmul.f32 %v2039_v53, %v795_v13 }
  0x95   : > { %s2343_s5 = sld [smem:[#allocation2 + $0xee]]  ;;  %v841_v16 = vadd.f32 %v840_v62, %v837_v7  ;;  %v799_v19 = vstv %s2319_s26  ;;  %v856_v36 = vmul.f32 %v1922_v31, %v855_v22  ;;  %v2399_v7 = vld [vmem:[%s1882_s28] sm:$0xff]  ;;  %s1816_s26 = smov 124  }
  0x96   : > { %v785_v18 = vadd.f32 %v784_v4, %v781_v10  ;;  %s2348_s6 = sld [smem:[#allocation2 + $0x7a]]  ;;  %v859_v30 = vstv %s2324_s27  ;;  %v800_v38 = vmul.f32 %v2048_v63, %v799_v19 }
  0x97   : > { %v845_v24 = vadd.f32 %v844_v8, %v841_v16  ;;  %s2352_s7 = sld [smem:[#allocation2 + $0x83]]  ;;  %v803_v23 = vstv %s2327_s29  ;;  %v860_v0 = vmul.f32 %v1930_v35, %v859_v30 }
  0x98   : > { %v789_v28 = vadd.f32 %v788_v12, %v785_v18  ;;  %s2356_s8 = sld [smem:[#allocation2 + $0x8c]]  ;;  %v863_v27 = vstv %s2332_s30  ;;  %v804_v45 = vmul.f32 %v2059_v11, %v803_v23  ;;  %v2408_v12 = vld [vmem:[%s1882_s28 + $0x1] sm:$0xff] }
  0x99   : > { %v849_v33 = vadd.f32 %v848_v17, %v845_v24  ;;  %s2360_s12 = sld [smem:[#allocation2 + $0x95]]  ;;  %v807_v40 = vstv %s2335_s3  ;;  %v864_v1 = vmul.f32 %v1938_v39, %v863_v27  ;;  %v2414_v17 = vld [vmem:[%s1882_s28 + $0x2] sm:$0xff] }
  0x9a   : > { %v793_v37 = vadd.f32 %v792_v20, %v789_v28  ;;  %s2364_s14 = sld [smem:[#allocation2 + $0x9e]]  ;;  %v867_v31 = vstv %s2340_s4  ;;  %v808_v50 = vmul.f32 %v2070_v21, %v807_v40  ;;  %v2424_v24 = vld [vmem:[%s1882_s28 + $0x3] sm:$0xff] }
  0x9b   : > { %v853_v41 = vadd.f32 %v852_v26, %v849_v33  ;;  %s2368_s15 = sld [smem:[#allocation2 + $0xa7]]  ;;  %v811_v46 = vstv %s2343_s5  ;;  %v868_v52 = vmul.f32 %v1946_v43, %v867_v31 }
  0x9c   : > { %v797_v42 = vadd.f32 %v796_v29, %v793_v37  ;;  %s2372_s16 = sld [smem:[#allocation2 + $0xb0]]  ;;  %v871_v35 = vstv %s2348_s6  ;;  %v812_v56 = vmul.f32 %v2081_v32, %v811_v46 }
  0x9d   : > { %v857_v48 = vadd.f32 %v856_v36, %v853_v41  ;;  %s2376_s17 = sld [smem:[#allocation2 + $0xb9]]  ;;  %v875_v57 = vstv %s2352_s7  ;;  %v872_v58 = vmul.f32 %v1955_v47, %v871_v35  ;;  %v2436_v36 = vld [vmem:[%s1882_s28 + $0x4] sm:$0xff] }
  0x9e   : > { %v801_v49 = vadd.f32 %v800_v38, %v797_v42  ;;  %s1614_s18 = sld [smem:[#allocation2 + $0x6]]  ;;  %v879_v60 = vstv %s2356_s8  ;;  %v876_v62 = vmul.f32 %v1962_v51, %v875_v57 }
  0x9f   : > { %v861_v2 = vadd.f32 %v860_v0, %v857_v48  ;;  %s1615_s19 = sld [smem:[#allocation2 + $0xf]]  ;;  %v883_v4 = vstv %s2360_s12  ;;  %v880_v9 = vmul.f32 %v1967_v55, %v879_v60  ;;  %v2447_v0 = vld [vmem:[%s1882_s28 + $0x5] sm:$0xff] }
  0xa0   : > { %v805_v54 = vadd.f32 %v804_v45, %v801_v49  ;;  %s2383_s20 = sld [smem:[#allocation2 + $0x18]]  ;;  %v887_v10 = vstv %s2364_s14  ;;  %v884_v16 = vmul.f32 %v1974_v59, %v883_v4  ;;  %v2478_v60 = vld [vmem:[%s1882_s28 + $0x8] sm:$0xff] }
  0xa1   : > { %v865_v39 = vadd.f32 %v864_v1, %v861_v2  ;;  %s2386_s21 = sld [smem:[#allocation2 + $0x21]]  ;;  %v891_v22 = vstv %s2368_s15  ;;  %v888_v29 = vmul.f32 %v1980_v61, %v887_v10  ;;  %v2458_v1 = vld [vmem:[%s1882_s28 + $0x6] sm:$0xff] }
  0xa2   : > { %v809_v6 = vadd.f32 %v808_v50, %v805_v54  ;;  %s2389_s22 = sld [smem:[#allocation2 + $0x2a]]  ;;  %v895_v23 = vstv %s2372_s16  ;;  %v892_v27 = vmul.f32 %v1994_v14, %v891_v22  ;;  %v2469_v54 = vld [vmem:[%s1882_s28 + $0x7] sm:$0xff] }
  0xa3   : > { %v869_v43 = vadd.f32 %v868_v52, %v865_v39  ;;  %s2392_s23 = sld [smem:[#allocation2 + $0x33]]  ;;  %v899_v61 = vstv %s2376_s17  ;;  %v896_v31 = vmul.f32 %v2006_v25, %v895_v23 }
  0xa4   : > { %v813_v3 = vadd.f32 %v812_v56, %v809_v6  ;;  %v932_v5 = vstv %s1614_s18  ;;  %s2395_s24 = sld [smem:[#allocation2 + $0x3c]]  ;;  %v900_v35 = vmul.f32 %v2017_v34, %v899_v61 }
  0xa5   : > { %v873_v47 = vadd.f32 %v872_v58, %v869_v43  ;;  %v933_v8 = vmul.f32 %v2399_v7, %v932_v5  ;;  %v935_v51 = vstv %s1615_s19  ;;  %s2402_s25 = sld [smem:[#allocation2 + $0x45]] }
  0xa6   : > { %815 = vrot.lane.b32.xlu1 %v813_v3, %s1816_s26  ;;  %s2405_s27 = sld [smem:[#allocation2 + $0xc2]]  ;;  %v936_v55 = vmul.f32 %v2408_v12, %v935_v51  ;;  %v939_v15 = vstv %s2383_s20 }
  0xa7   : > { %v877_v13 = vadd.f32 %v876_v62, %v873_v47  ;;  %v940_v18 = vmul.f32 %v2414_v17, %v939_v15  ;;  %v943_v20 = vstv %s2386_s21  ;;  %s2418_s29 = sld [smem:[#allocation2 + $0x4e]]  ;;  %v2489_v47 = vld [vmem:[%s1882_s28 + $0x40] sm:$0xff] }
  0xa8   : > { %s2421_s30 = sld [smem:[#allocation2 + $0xcb]]  ;;  %v937_v19 = vadd.f32 %v936_v55, %v933_v8  ;;  %v944_v26 = vmul.f32 %v2424_v24, %v943_v20  ;;  %v947_v28 = vstv %s2389_s22  ;;  %v2500_v15 = vld [vmem:[%s1882_s28 + $0x41] sm:$0xff] }
  0xa9   : > { %v881_v59 = vadd.f32 %v880_v9, %v877_v13  ;;  %v951_v30 = vstv %s2392_s23  ;;  %s2430_s3 = sld [smem:[#allocation2 + $0x57]]  ;;  %v948_v37 = vmul.f32 %v2436_v36, %v947_v28 }
  0xaa   : > { %s2433_s4 = sld [smem:[#allocation2 + $0xd4]]  ;;  %v941_v33 = vadd.f32 %v940_v18, %v937_v19  ;;  %v955_v40 = vstv %s2395_s24  ;;  %v952_v42 = vmul.f32 %v2447_v0, %v951_v30  ;;  %v2511_v19 = vld [vmem:[%s1882_s28 + $0x42] sm:$0xff] }
  0xab   : > { %v885_v38 = vadd.f32 %v884_v16, %v881_v59  ;;  %s2441_s5 = sld [smem:[#allocation2 + $0x60]]  ;;  %v959_v46 = vstv %s2402_s25  ;;  %v956_v49 = vmul.f32 %v2458_v1, %v955_v40  ;;  %v2519_v30 = vld [vmem:[%s1882_s28 + $0x43] sm:$0xff] }
  0xac   : > { %s2444_s6 = sld [smem:[#allocation2 + $0xdd]]  ;;  %v945_v41 = vadd.f32 %v944_v26, %v941_v33  ;;  %v903_v14 = vstv %s2405_s27  ;;  %v960_v56 = vmul.f32 %v2469_v54, %v959_v46 }
  0xad   : > { %v889_v45 = vadd.f32 %v888_v29, %v885_v38  ;;  %s2452_s7 = sld [smem:[#allocation2 + $0x69]]  ;;  %v963_v2 = vstv %s2418_s29  ;;  %v904_v39 = vmul.f32 %v2028_v44, %v903_v14 }
  0xae   : > { %s2455_s8 = sld [smem:[#allocation2 + $0xe6]]  ;;  %v949_v48 = vadd.f32 %v948_v37, %v945_v41  ;;  %v907_v25 = vstv %s2421_s30  ;;  %v964_v43 = vmul.f32 %v2478_v60, %v963_v2 }
  0xaf   : > { %v893_v50 = vadd.f32 %v892_v27, %v889_v45  ;;  %s2463_s12 = sld [smem:[#allocation2 + $0x72]]  ;;  %v967_v58 = vstv %s2430_s3  ;;  %v908_v3 = vmul.f32 %v2039_v53, %v907_v25  ;;  %v2536_v45 = vld [vmem:[%s1882_s28 + $0x45] sm:$0xff] }
  0xb0   : > { %s2466_s14 = sld [smem:[#allocation2 + $0xef]]  ;;  %v953_v52 = vadd.f32 %v952_v42, %v949_v48  ;;  %v911_v34 = vstv %s2433_s4  ;;  %v968_v9 = vmul.f32 %v2489_v47, %v967_v58  ;;  %s1817_s4 = smov 123  }
  0xb1   : > { %v897_v57 = vadd.f32 %v896_v31, %v893_v50  ;;  %s2474_s15 = sld [smem:[#allocation2 + $0x7b]]  ;;  %v971_v4 = vstv %s2441_s5  ;;  %v912_v51 = vmul.f32 %v2048_v63, %v911_v34 }
  0xb2   : > { %v957_v6 = vadd.f32 %v956_v49, %v953_v52  ;;  %s2481_s16 = sld [smem:[#allocation2 + $0x84]]  ;;  %v915_v44 = vstv %s2444_s6  ;;  %v972_v13 = vmul.f32 %v2500_v15, %v971_v4  ;;  %v2545_v49 = vld [vmem:[%s1882_s28 + $0x46] sm:$0xff] }
  0xb3   : > { %v901_v62 = vadd.f32 %v900_v35, %v897_v57  ;;  %s2485_s17 = sld [smem:[#allocation2 + $0x8d]]  ;;  %v975_v10 = vstv %s2452_s7  ;;  %v916_v18 = vmul.f32 %v2059_v11, %v915_v44 }
  0xb4   : > { %v961_v5 = vadd.f32 %v960_v56, %v957_v6  ;;  %s2492_s18 = sld [smem:[#allocation2 + $0x96]]  ;;  %v919_v53 = vstv %s2455_s8  ;;  %v976_v26 = vmul.f32 %v2511_v19, %v975_v10 }
  0xb5   : > { %v905_v8 = vadd.f32 %v904_v39, %v901_v62  ;;  %s2496_s19 = sld [smem:[#allocation2 + $0x9f]]  ;;  %v979_v20 = vstv %s2463_s12  ;;  %v920_v59 = vmul.f32 %v2070_v21, %v919_v53  ;;  %v2527_v21 = vld [vmem:[%s1882_s28 + $0x44] sm:$0xff] }
  0xb6   : > { %v965_v55 = vadd.f32 %v964_v43, %v961_v5  ;;  %s2503_s20 = sld [smem:[#allocation2 + $0xa8]]  ;;  %v923_v63 = vstv %s2466_s14  ;;  %v980_v23 = vmul.f32 %v2519_v30, %v979_v20  ;;  %v2557_v39 = vld [vmem:[%s1882_s28 + $0x47] sm:$0xff] }
  0xb7   : > { %v909_v16 = vadd.f32 %v908_v3, %v905_v8  ;;  %s2507_s21 = sld [smem:[#allocation2 + $0xb1]]  ;;  %v983_v29 = vstv %s2474_s15  ;;  %v924_v37 = vmul.f32 %v2081_v32, %v923_v63  ;;  %v2570_v5 = vld [vmem:[%s1882_s28 + $0x48] sm:$0xff] }
  0xb8   : > { %v969_v22 = vadd.f32 %v968_v9, %v965_v55  ;;  %s2514_s22 = sld [smem:[#allocation2 + $0xba]]  ;;  %v987_v38 = vstv %s2481_s16  ;;  %v984_v40 = vmul.f32 %v2527_v21, %v983_v29 }
  0xb9   : > { %v913_v28 = vadd.f32 %v912_v51, %v909_v16  ;;  %s1641_s23 = sld [smem:[#allocation2 + $0x7]]  ;;  %v991_v41 = vstv %s2485_s17  ;;  %v988_v32 = vmul.f32 %v2536_v45, %v987_v38  ;;  %v2603_v38 = vld [vmem:[%s1882_s28 + $0x82] sm:$0xff] }
  0xba   : > { %v973_v11 = vadd.f32 %v972_v13, %v969_v22  ;;  %s1642_s24 = sld [smem:[#allocation2 + $0x10]]  ;;  %v995_v46 = vstv %s2492_s18  ;;  %v992_v50 = vmul.f32 %v2545_v49, %v991_v41  ;;  %v2581_v13 = vld [vmem:[%s1882_s28 + $0x80] sm:$0xff] }
  0xbb   : > { %v917_v33 = vadd.f32 %v916_v18, %v913_v28  ;;  %s2524_s25 = sld [smem:[#allocation2 + $0x19]]  ;;  %v999_v25 = vstv %s2496_s19  ;;  %v996_v58 = vmul.f32 %v2557_v39, %v995_v46  ;;  %v2592_v28 = vld [vmem:[%s1882_s28 + $0x81] sm:$0xff] }
  0xbc   : > { %v977_v27 = vadd.f32 %v976_v26, %v973_v11  ;;  %s2530_s26 = sld [smem:[#allocation2 + $0x22]]  ;;  %v1003_v43 = vstv %s2503_s20  ;;  %v1000_v9 = vmul.f32 %v2570_v5, %v999_v25  ;;  %v2625_v25 = vld [vmem:[%s1882_s28 + $0x84] sm:$0xff] }
  0xbd   : > { %v921_v61 = vadd.f32 %v920_v59, %v917_v33  ;;  %s2533_s27 = sld [smem:[#allocation2 + $0x2b]]  ;;  %v1007_v51 = vstv %s2507_s21  ;;  %v1004_v16 = vmul.f32 %v2581_v13, %v1003_v43  ;;  %v2636_v43 = vld [vmem:[%s1882_s28 + $0x85] sm:$0xff] }
  0xbe   : > { %v981_v42 = vadd.f32 %v980_v23, %v977_v27  ;;  %s2539_s29 = sld [smem:[#allocation2 + $0x34]]  ;;  %v1011_v20 = vstv %s2514_s22  ;;  %v1008_v59 = vmul.f32 %v2592_v28, %v1007_v51  ;;  %v2647_v51 = vld [vmem:[%s1882_s28 + $0x86] sm:$0xff] }
  0xbf   : > { %v925_v31 = vadd.f32 %v924_v37, %v921_v61  ;;  %v1044_v14 = vstv %s1641_s23  ;;  %s2542_s30 = sld [smem:[#allocation2 + $0x3d]]  ;;  %v1012_v27 = vmul.f32 %v2603_v38, %v1011_v20 }
  0xc0   : > { %v985_v48 = vadd.f32 %v984_v40, %v981_v42  ;;  %v1045_v35 = vmul.f32 %v2399_v7, %v1044_v14  ;;  %v1047_v2 = vstv %s1642_s24  ;;  %s2549_s3 = sld [smem:[#allocation2 + $0x46]] }
  0xc1   : > { %927 = vrot.lane.b32.xlu0 %v925_v31, %s1817_s4  ;;  %s2552_s5 = sld [smem:[#allocation2 + $0xc3]]  ;;  %v1048_v52 = vmul.f32 %v2408_v12, %v1047_v2  ;;  %v1051_v56 = vstv %s2524_s25  ;;  %v2614_v31 = vld [vmem:[%s1882_s28 + $0x83] sm:$0xff] }
  0xc2   : > { %v989_v57 = vadd.f32 %v988_v32, %v985_v48  ;;  %v1052_v34 = vmul.f32 %v2414_v17, %v1051_v56  ;;  %v1055_v6 = vstv %s2530_s26  ;;  %s2562_s6 = sld [smem:[#allocation2 + $0x4f]] }
  0xc3   : > { %s2565_s7 = sld [smem:[#allocation2 + $0xcc]]  ;;  %v1049_v62 = vadd.f32 %v1048_v52, %v1045_v35  ;;  %v1056_v3 = vmul.f32 %v2424_v24, %v1055_v6  ;;  %v1059_v4 = vstv %s2533_s27 }
  0xc4   : > { %v993_v44 = vadd.f32 %v992_v50, %v989_v57  ;;  %v1063_v8 = vstv %s2539_s29  ;;  %s2574_s8 = sld [smem:[#allocation2 + $0x58]]  ;;  %v1060_v53 = vmul.f32 %v2436_v36, %v1059_v4 }
  0xc5   : > { %s2577_s12 = sld [smem:[#allocation2 + $0xd5]]  ;;  %v1053_v10 = vadd.f32 %v1052_v34, %v1049_v62  ;;  %v1067_v18 = vstv %s2542_s30  ;;  %v1064_v22 = vmul.f32 %v2447_v0, %v1063_v8 }
  0xc6   : > { %v997_v55 = vadd.f32 %v996_v58, %v993_v44  ;;  %s2585_s14 = sld [smem:[#allocation2 + $0x61]]  ;;  %v1071_v29 = vstv %s2549_s3  ;;  %v1068_v33 = vmul.f32 %v2458_v1, %v1067_v18 }
  0xc7   : > { %s2588_s15 = sld [smem:[#allocation2 + $0xde]]  ;;  %v1057_v63 = vadd.f32 %v1056_v3, %v1053_v10  ;;  %v1015_v11 = vstv %s2552_s5  ;;  %v1072_v42 = vmul.f32 %v2469_v54, %v1071_v29 }
  0xc8   : > { %v1001_v26 = vadd.f32 %v1000_v9, %v997_v55  ;;  %s2596_s16 = sld [smem:[#allocation2 + $0x6a]]  ;;  %v1075_v40 = vstv %s2562_s6  ;;  %v1016_v46 = vmul.f32 %v2614_v31, %v1015_v11 }
  0xc9   : > { %s2599_s17 = sld [smem:[#allocation2 + $0xe7]]  ;;  %v1061_v23 = vadd.f32 %v1060_v53, %v1057_v63  ;;  %v1019_v61 = vstv %s2565_s7  ;;  %v1076_v35 = vmul.f32 %v2478_v60, %v1075_v40  ;;  %v2658_v63 = vld [vmem:[%s1882_s28 + $0x87] sm:$0xff] }
  0xca   : > { %v1005_v37 = vadd.f32 %v1004_v16, %v1001_v26  ;;  %s2607_s18 = sld [smem:[#allocation2 + $0x73]]  ;;  %v1079_v14 = vstv %s2574_s8  ;;  %v1020_v52 = vmul.f32 %v2625_v25, %v1019_v61  ;;  %s1818_s8 = smov 122  }
  0xcb   : > { %s2610_s19 = sld [smem:[#allocation2 + $0xf0]]  ;;  %v1065_v41 = vadd.f32 %v1064_v22, %v1061_v23  ;;  %v1023_v48 = vstv %s2577_s12  ;;  %v1080_v34 = vmul.f32 %v2489_v47, %v1079_v14  ;;  %v2664_v23 = vld [vmem:[%s1882_s28 + $0x88] sm:$0xff] }
  0xcc   : > { %v1009_v32 = vadd.f32 %v1008_v59, %v1005_v37  ;;  %s2618_s20 = sld [smem:[#allocation2 + $0x7c]]  ;;  %v1083_v56 = vstv %s2585_s14  ;;  %v1024_v62 = vmul.f32 %v2636_v43, %v1023_v48 }
  0xcd   : > { %v1069_v50 = vadd.f32 %v1068_v33, %v1065_v41  ;;  %s2622_s21 = sld [smem:[#allocation2 + $0x85]]  ;;  %v1027_v57 = vstv %s2588_s15  ;;  %v1084_v9 = vmul.f32 %v2500_v15, %v1083_v56 }
  0xce   : > { %v1013_v2 = vadd.f32 %v1012_v27, %v1009_v32  ;;  %s2629_s22 = sld [smem:[#allocation2 + $0x8e]]  ;;  %v1087_v3 = vstv %s2596_s16  ;;  %v1028_v10 = vmul.f32 %v2647_v51, %v1027_v57 }
  0xcf   : > { %v1073_v58 = vadd.f32 %v1072_v42, %v1069_v50  ;;  %s2633_s23 = sld [smem:[#allocation2 + $0x97]]  ;;  %v1031_v4 = vstv %s2599_s17  ;;  %v1088_v18 = vmul.f32 %v2511_v19, %v1087_v3 }
  0xd0   : > { %v1017_v6 = vadd.f32 %v1016_v46, %v1013_v2  ;;  %s2640_s24 = sld [smem:[#allocation2 + $0xa0]]  ;;  %v1091_v53 = vstv %s2607_s18  ;;  %v1032_v22 = vmul.f32 %v2658_v63, %v1031_v4 }
  0xd1   : > { %v1077_v44 = vadd.f32 %v1076_v35, %v1073_v58  ;;  %s2644_s25 = sld [smem:[#allocation2 + $0xa9]]  ;;  %v1035_v55 = vstv %s2610_s19  ;;  %v1092_v29 = vmul.f32 %v2519_v30, %v1091_v53 }
  0xd2   : > { %v1021_v8 = vadd.f32 %v1020_v52, %v1017_v6  ;;  %s2651_s26 = sld [smem:[#allocation2 + $0xb2]]  ;;  %v1095_v26 = vstv %s2618_s20  ;;  %v1036_v33 = vmul.f32 %v2664_v23, %v1035_v55 }
  0xd3   : > { %v1081_v16 = vadd.f32 %v1080_v34, %v1077_v44  ;;  %s2655_s27 = sld [smem:[#allocation2 + $0xbb]]  ;;  %v1099_v37 = vstv %s2622_s21  ;;  %v1096_v40 = vmul.f32 %v2527_v21, %v1095_v26 }
  0xd4   : > { %v1025_v20 = vadd.f32 %v1024_v62, %v1021_v8  ;;  %s1668_s29 = sld [smem:[#allocation2 + $0x8]]  ;;  %v1103_v41 = vstv %s2629_s22  ;;  %v1100_v32 = vmul.f32 %v2536_v45, %v1099_v37 }
  0xd5   : > { %v1085_v59 = vadd.f32 %v1084_v9, %v1081_v16  ;;  %s1669_s30 = sld [smem:[#allocation2 + $0x11]]  ;;  %v1107_v14 = vstv %s2633_s23  ;;  %v1104_v35 = vmul.f32 %v2545_v49, %v1103_v41 }
  0xd6   : > { %v1029_v11 = vadd.f32 %v1028_v10, %v1025_v20  ;;  %s1670_s3 = sld [smem:[#allocation2 + $0x1a]]  ;;  %v1111_v56 = vstv %s2640_s24  ;;  %v1108_v6 = vmul.f32 %v2557_v39, %v1107_v14 }
  0xd7   : > { %v1089_v27 = vadd.f32 %v1088_v18, %v1085_v59  ;;  %s1671_s4 = sld [smem:[#allocation2 + $0x23]]  ;;  %v1115_v4 = vstv %s2644_s25  ;;  %v1112_v53 = vmul.f32 %v2570_v5, %v1111_v56 }
  0xd8   : > { %v1033_v61 = vadd.f32 %v1032_v22, %v1029_v11  ;;  %s2670_s5 = sld [smem:[#allocation2 + $0x2c]]  ;;  %v1119_v16 = vstv %s2651_s26  ;;  %v1116_v26 = vmul.f32 %v2581_v13, %v1115_v4 }
  0xd9   : > { %v1093_v42 = vadd.f32 %v1092_v29, %v1089_v27  ;;  %s2673_s6 = sld [smem:[#allocation2 + $0x35]]  ;;  %v1123_v29 = vstv %s2655_s27  ;;  %v1120_v27 = vmul.f32 %v2592_v28, %v1119_v16 }
  0xda   : > { %v1037_v46 = vadd.f32 %v1036_v33, %v1033_v61  ;;  %v1156_v48 = vstv %s1668_s29  ;;  %s2676_s28 = sld [smem:[#allocation2 + $0x3e]] }
  0xdb   : > { %v1097_v50 = vadd.f32 %v1096_v40, %v1093_v42  ;;  %v1157_v2 = vmul.f32 %v2399_v7, %v1156_v48  ;;  %v1159_v52 = vstv %s1669_s30  ;;  %s2680_s7 = sld [smem:[#allocation2 + $0x47]] }
  0xdc   : > { %1039 = vrot.lane.b32.xlu1 %v1037_v46, %s1818_s8  ;;  %s2683_s12 = sld [smem:[#allocation2 + $0xc4]]  ;;  %v1160_v57 = vmul.f32 %v2408_v12, %v1159_v52  ;;  %v1163_v58 = vstv %s1670_s3  ;;  %v1124_v46 = vmul.f32 %v2603_v38, %v1123_v29 }
  0xdd   : > { %v1101_v34 = vadd.f32 %v1100_v32, %v1097_v50  ;;  %v1164_v62 = vmul.f32 %v2414_v17, %v1163_v58  ;;  %v1167_v3 = vstv %s1671_s4  ;;  %s2688_s14 = sld [smem:[#allocation2 + $0x50]] }
  0xde   : > { %s2691_s15 = sld [smem:[#allocation2 + $0xcd]]  ;;  %v1161_v44 = vadd.f32 %v1160_v57, %v1157_v2  ;;  %v1168_v9 = vmul.f32 %v2424_v24, %v1167_v3  ;;  %v1171_v8 = vstv %s2670_s5 }
  0xdf   : > { %v1105_v10 = vadd.f32 %v1104_v35, %v1101_v34  ;;  %v1175_v55 = vstv %s2673_s6  ;;  %s2697_s16 = sld [smem:[#allocation2 + $0x59]]  ;;  %v1172_v20 = vmul.f32 %v2436_v36, %v1171_v8 }
  0xe0   : > { %s2700_s17 = sld [smem:[#allocation2 + $0xd6]]  ;;  %v1165_v18 = vadd.f32 %v1164_v62, %v1161_v44  ;;  %v1179_v59 = vstv %s2676_s28  ;;  %v1176_v33 = vmul.f32 %v2447_v0, %v1175_v55 }
  0xe1   : > { %v1109_v22 = vadd.f32 %v1108_v6, %v1105_v10  ;;  %s2705_s18 = sld [smem:[#allocation2 + $0x62]]  ;;  %v1183_v40 = vstv %s2680_s7  ;;  %v1180_v42 = vmul.f32 %v2458_v1, %v1179_v59  ;;  %s1819_s7 = smov 121  }
  0xe2   : > { %s2708_s19 = sld [smem:[#allocation2 + $0xdf]]  ;;  %v1169_v11 = vadd.f32 %v1168_v9, %v1165_v18  ;;  %v1127_v61 = vstv %s2683_s12  ;;  %v1184_v35 = vmul.f32 %v2469_v54, %v1183_v40 }
  0xe3   : > { %v1113_v37 = vadd.f32 %v1112_v53, %v1109_v22  ;;  %s2713_s20 = sld [smem:[#allocation2 + $0x6b]]  ;;  %v1187_v14 = vstv %s2688_s14  ;;  %v1128_v52 = vmul.f32 %v2614_v31, %v1127_v61 }
  0xe4   : > { %s2716_s21 = sld [smem:[#allocation2 + $0xe8]]  ;;  %v1173_v41 = vadd.f32 %v1172_v20, %v1169_v11  ;;  %v1131_v48 = vstv %s2691_s15  ;;  %v1188_v34 = vmul.f32 %v2478_v60, %v1187_v14 }
  0xe5   : > { %v1117_v32 = vadd.f32 %v1116_v26, %v1113_v37  ;;  %s2721_s22 = sld [smem:[#allocation2 + $0x74]]  ;;  %v1191_v56 = vstv %s2697_s16  ;;  %v1132_v62 = vmul.f32 %v2625_v25, %v1131_v48 }
  0xe6   : > { %s2724_s23 = sld [smem:[#allocation2 + $0xf1]]  ;;  %v1177_v50 = vadd.f32 %v1176_v33, %v1173_v41  ;;  %v1135_v57 = vstv %s2700_s17  ;;  %v1192_v9 = vmul.f32 %v2489_v47, %v1191_v56 }
  0xe7   : > { %v1121_v2 = vadd.f32 %v1120_v27, %v1117_v32  ;;  %s2729_s24 = sld [smem:[#allocation2 + $0x7d]]  ;;  %v1195_v3 = vstv %s2705_s18  ;;  %v1136_v10 = vmul.f32 %v2636_v43, %v1135_v57 }
  0xe8   : > { %v1181_v58 = vadd.f32 %v1180_v42, %v1177_v50  ;;  %s2735_s25 = sld [smem:[#allocation2 + $0x86]]  ;;  %v1139_v4 = vstv %s2708_s19  ;;  %v1196_v18 = vmul.f32 %v2500_v15, %v1195_v3 }
  0xe9   : > { %v1125_v6 = vadd.f32 %v1124_v46, %v1121_v2  ;;  %v1199_v53 = vstv %s2713_s20  ;;  %s2741_s26 = sld [smem:[#allocation2 + $0x8f]]  ;;  %v1140_v22 = vmul.f32 %v2647_v51, %v1139_v4 }
  0xea   : > { %v1185_v44 = vadd.f32 %v1184_v35, %v1181_v58  ;;  %v1143_v55 = vstv %s2716_s21  ;;  %s2747_s27 = sld [smem:[#allocation2 + $0x98]]  ;;  %v1200_v11 = vmul.f32 %v2511_v19, %v1199_v53 }
  0xeb   : > { %v1129_v8 = vadd.f32 %v1128_v52, %v1125_v6  ;;  %v1203_v26 = vstv %s2721_s22  ;;  %s2751_s29 = sld [smem:[#allocation2 + $0xa1]]  ;;  %v1144_v37 = vmul.f32 %v2658_v63, %v1143_v55 }
  0xec   : > { %v1189_v16 = vadd.f32 %v1188_v34, %v1185_v44  ;;  %v1147_v59 = vstv %s2724_s23  ;;  %s2755_s30 = sld [smem:[#allocation2 + $0xaa]]  ;;  %v1204_v61 = vmul.f32 %v2519_v30, %v1203_v26 }
  0xed   : > { %v1133_v20 = vadd.f32 %v1132_v62, %v1129_v8  ;;  %v1207_v27 = vstv %s2729_s24  ;;  %s2758_s3 = sld [smem:[#allocation2]]  ;;  %v1148_v42 = vmul.f32 %v2664_v23, %v1147_v59 }
  0xee   : > { %v1193_v29 = vadd.f32 %v1192_v9, %v1189_v16  ;;  %v1211_v32 = vstv %s2735_s25  ;;  %s1453_s4 = sld [smem:[#allocation2 + $0x9]]  ;;  %v1208_v14 = vmul.f32 %v2527_v21, %v1207_v27  ;;  %s1820_s25 = smov 120  }
  0xef   : > { %v1137_v33 = vadd.f32 %v1136_v10, %v1133_v20  ;;  %v1215_v50 = vstv %s2741_s26  ;;  %s2764_s5 = sld [smem:[#allocation2 + $0xb3]]  ;;  %v1212_v2 = vmul.f32 %v2536_v45, %v1211_v32 }
  0xf0   : > { %v1197_v40 = vadd.f32 %v1196_v18, %v1193_v29  ;;  %s2767_s6 = sld [smem:[#allocation2 + $0x12]]  ;;  %v1219_v56 = vstv %s2747_s27  ;;  %v1216_v58 = vmul.f32 %v2545_v49, %v1215_v50 }
  0xf1   : > { %v1141_v41 = vadd.f32 %v1140_v22, %v1137_v33  ;;  %s2770_s28 = sld [smem:[#allocation2 + $0xbc]]  ;;  %v1223_v34 = vstv %s2751_s29  ;;  %v1220_v62 = vmul.f32 %v2557_v39, %v1219_v56 }
  0xf2   : > { %v1201_v46 = vadd.f32 %v1200_v11, %v1197_v40  ;;  %s2774_s8 = sld [smem:[#allocation2 + $0xc5]]  ;;  %v1227_v44 = vstv %s2755_s30  ;;  %v1224_v8 = vmul.f32 %v2570_v5, %v1223_v34 }
  0xf3   : > { %v1145_v48 = vadd.f32 %v1144_v37, %v1141_v41  ;;  %v264_v3 = vstv %s2758_s3  ;;  %s2778_s12 = sld [smem:[#allocation2 + $0x1b]]  ;;  %v1228_v18 = vmul.f32 %v2581_v13, %v1227_v44 }
  0xf4   : > { %v1205_v35 = vadd.f32 %v1204_v61, %v1201_v46  ;;  %v267_v4 = vstv %s1453_s4  ;;  %s2781_s14 = sld [smem:[#allocation2 + $0xce]]  ;;  %v265_v53 = vmul.f32 %v2399_v7, %v264_v3 }
  0xf5   : > { %v1149_v52 = vadd.f32 %v1148_v42, %v1145_v48  ;;  %v1231_v10 = vstv %s2764_s5  ;;  %s2785_s15 = sld [smem:[#allocation2 + $0xd7]]  ;;  %v268_v55 = vmul.f32 %v2408_v12, %v267_v4 }
  0xf6   : > { %v1209_v57 = vadd.f32 %v1208_v14, %v1205_v35  ;;  %v271_v20 = vstv %s2767_s6  ;;  %s1456_s16 = sld [smem:[#allocation2 + $0x24]]  ;;  %v1232_v59 = vmul.f32 %v2592_v28, %v1231_v10 }
  0xf7   : > { %1151 = vrot.lane.b32.xlu0 %v1149_v52, %s1819_s7  ;;  %v1235_v22 = vstv %s2770_s28  ;;  %s1692_s17 = sld [smem:[#allocation2 + $0xe0]]  ;;  %v269_v11 = vadd.f32 %v268_v55, %v265_v53  ;;  %v272_v7 = vmul.f32 %v2414_v17, %v271_v20 }
  0xf8   : > { %v1213_v6 = vadd.f32 %v1212_v2, %v1209_v57  ;;  %v1239_v29 = vstv %s2774_s8  ;;  %s1693_s18 = sld [smem:[#allocation2 + $0xe9]]  ;;  %v1236_v12 = vmul.f32 %v2603_v38, %v1235_v22 }
  0xf9   : > { %v275_v37 = vstv %s2778_s12  ;;  %s1457_s19 = sld [smem:[#allocation2 + $0x2d]]  ;;  %v1240_v61 = vmul.f32 %v2614_v31, %v1239_v29  ;;  %v273_v42 = vadd.f32 %v272_v7, %v269_v11 }
  0xfa   : > { %v1217_v9 = vadd.f32 %v1216_v58, %v1213_v6  ;;  %v1243_v27 = vstv %s2781_s14  ;;  %s1694_s20 = sld [smem:[#allocation2 + $0xf2]]  ;;  %v276_v32 = vmul.f32 %v2424_v24, %v275_v37 }
  0xfb   : > { %v1247_v41 = vstv %s2785_s15  ;;  %v1244_v14 = vmul.f32 %v2625_v25, %v1243_v27  ;;  %s1458_s21 = sld [smem:[#allocation2 + $0x36]] }
  0xfc   : > { %v1221_v16 = vadd.f32 %v1220_v62, %v1217_v9  ;;  %v279_v48 = vstv %s1456_s16  ;;  %v1248_v35 = vmul.f32 %v2636_v43, %v1247_v41  ;;  %v277_v52 = vadd.f32 %v276_v32, %v273_v42  ;;  %s1459_s22 = sld [smem:[#allocation2 + $0x3f]] }
  0xfd   : > { %v1251_v17 = vstv %s1692_s17  ;;  %v280_v56 = vmul.f32 %v2436_v36, %v279_v48  ;;  %s1460_s23 = sld [smem:[#allocation2 + $0x48]] }
  0xfe   : > { %v1225_v26 = vadd.f32 %v1224_v8, %v1221_v16  ;;  %v1255_v2 = vstv %s1693_s18  ;;  %v1252_v58 = vmul.f32 %v2647_v51, %v1251_v17  ;;  %s1461_s24 = sld [smem:[#allocation2 + $0x51]] }
  0xff   : > { %v283_v34 = vstv %s1457_s19  ;;  %v1256_v62 = vmul.f32 %v2658_v63, %v1255_v2  ;;  %v281_v3 = vadd.f32 %v280_v56, %v277_v52  ;;  %s1462_s26 = sld [smem:[#allocation2 + $0x5a]] }
 0x100   : > { %v1229_v33 = vadd.f32 %v1228_v18, %v1225_v26  ;;  %v1259_v6 = vstv %s1694_s20  ;;  %v284_v4 = vmul.f32 %v2447_v0, %v283_v34  ;;  %s1463_s27 = sld [smem:[#allocation2 + $0x63]]  ;;  %s1424_s20 = sshll.u32 %s2855_s9, 3 }
 0x101   : > { %v1260_v9 = vmul.f32 %v2664_v23, %v1259_v6  ;;  %v287_v8 = vstv %s1458_s21  ;;  %s1464_s29 = sld [smem:[#allocation2 + $0x6c]] }
 0x102   : > { %v1233_v40 = vadd.f32 %v1232_v59, %v1229_v33  ;;  %v285_v53 = vadd.f32 %v284_v4, %v281_v3  ;;  %v288_v36 = vmul.f32 %v2458_v1, %v287_v8  ;;  %v291_v16 = vstv %s1459_s22  ;;  %s1465_s30 = sld [smem:[#allocation2 + $0x75]] }
 0x103   : > { %v292_v20 = vmul.f32 %v2469_v54, %v291_v16  ;;  %v295_v22 = vstv %s1460_s23  ;;  %s1466_s3 = sld [smem:[#allocation2 + $0x7e]]  ;;  %s177_s23 = scalar_lea.vmem %s2845_s2, %s1424_s20 }
 0x104   : > { %v1237_v46 = vadd.f32 %v1236_v12, %v1233_v40  ;;  %v289_v18 = vadd.f32 %v288_v36, %v285_v53  ;;  %v296_v26 = vmul.f32 %v2478_v60, %v295_v22  ;;  %v299_v59 = vstv %s1461_s24  ;;  %s1467_s4 = sld [smem:[#allocation2 + $0x87]] }
 0x105   : > { %v300_v11 = vmul.f32 %v2489_v47, %v299_v59  ;;  %v303_v7 = vstv %s1462_s26  ;;  %s1468_s5 = sld [smem:[#allocation2 + $0x90]] }
 0x106   : > { %v1241_v50 = vadd.f32 %v1240_v61, %v1237_v46  ;;  %v293_v0 = vadd.f32 %v292_v20, %v289_v18  ;;  %v304_v33 = vmul.f32 %v2500_v15, %v303_v7  ;;  %v307_v12 = vstv %s1463_s27  ;;  %s1469_s6 = sld [smem:[#allocation2 + $0x99]]  ;;  %v480_v18 = vpop.permute.xlu0 %479 }
 0x107   : > { %v308_v54 = vmul.f32 %v2511_v19, %v307_v12  ;;  %v311_v27 = vstv %s1464_s29  ;;  %s1470_s28 = sld [smem:[#allocation2 + $0xa2]] }
 0x108   : > { %v1245_v57 = vadd.f32 %v1244_v14, %v1241_v50  ;;  %v297_v29 = vadd.f32 %v296_v26, %v293_v0  ;;  %v312_v60 = vmul.f32 %v2519_v30, %v311_v27  ;;  %v315_v61 = vstv %s1465_s30  ;;  %s1471_s7 = sld [smem:[#allocation2 + $0xab]]  ;;  %v704_v26 = vpop.permute.xlu1 %703 }
 0x109   : > { %v316_v47 = vmul.f32 %v2527_v21, %v315_v61  ;;  %v319_v42 = vstv %s1466_s3  ;;  %s1472_s8 = sld [smem:[#allocation2 + $0xb4]] }
 0x10a   : > { %v1249_v24 = vadd.f32 %v1248_v35, %v1245_v57  ;;  %v301_v1 = vadd.f32 %v300_v11, %v297_v29  ;;  %v320_v15 = vmul.f32 %v2536_v45, %v319_v42  ;;  %v323_v46 = vstv %s1467_s4  ;;  %s1473_s12 = sld [smem:[#allocation2 + $0xbd]]  ;;  %v592_v0 = vpop.permute.xlu0 %591 }
 0x10b   : > { %v324_v19 = vmul.f32 %v2545_v49, %v323_v46  ;;  %v327_v48 = vstv %s1468_s5  ;;  %s1474_s14 = sld [smem:[#allocation2 + $0xc6]] }
 0x10c   : > { %v1253_v44 = vadd.f32 %v1252_v58, %v1249_v24  ;;  %v305_v37 = vadd.f32 %v304_v33, %v301_v1  ;;  %v328_v30 = vmul.f32 %v2557_v39, %v327_v48  ;;  %v331_v50 = vstv %s1469_s6  ;;  %s1475_s15 = sld [smem:[#allocation2 + $0xcf]] }
 0x10d   : > { %v332_v21 = vmul.f32 %v2570_v5, %v331_v50  ;;  %v335_v2 = vstv %s1470_s28  ;;  %s1476_s16 = sld [smem:[#allocation2 + $0xd8]] }
 0x10e   : > { %v1257_v10 = vadd.f32 %v1256_v62, %v1253_v44  ;;  %v309_v40 = vadd.f32 %v308_v54, %v305_v37  ;;  %v336_v45 = vmul.f32 %v2581_v13, %v335_v2  ;;  %v339_v56 = vstv %s1471_s7  ;;  %s1477_s17 = sld [smem:[#allocation2 + $0xe1]] }
 0x10f   : > { %v340_v49 = vmul.f32 %v2592_v28, %v339_v56  ;;  %v343_v58 = vstv %s1472_s8  ;;  %s1478_s18 = sld [smem:[#allocation2 + $0xea]] }
 0x110   : > { %v1261_v55 = vadd.f32 %v1260_v9, %v1257_v10  ;;  %v313_v41 = vadd.f32 %v312_v60, %v309_v40  ;;  %v344_v39 = vmul.f32 %v2603_v38, %v343_v58  ;;  %v347_v6 = vstv %s1473_s12  ;;  %s1452_s19 = sld [smem:[#allocation2 + $0xf3]] }
 0x111   : > { %v348_v5 = vmul.f32 %v2614_v31, %v347_v6  ;;  %v351_v62 = vstv %s1474_s14 }
 0x112   : > { %1263 = vrot.lane.b32.xlu1 %v1261_v55, %s1820_s25  ;;  %v317_v32 = vadd.f32 %v316_v47, %v313_v41  ;;  %v352_v13 = vmul.f32 %v2625_v25, %v351_v62  ;;  %v355_v4 = vstv %s1475_s15 }
 0x113   : > { %v356_v28 = vmul.f32 %v2636_v43, %v355_v4  ;;  %v359_v9 = vstv %s1476_s16 }
 0x114   : > { %v321_v14 = vadd.f32 %v320_v15, %v317_v32  ;;  %v360_v38 = vmul.f32 %v2647_v51, %v359_v9  ;;  %v363_v10 = vstv %s1477_s17 }
 0x115   : > { %v364_v36 = vmul.f32 %v2658_v63, %v363_v10  ;;  %v367_v31 = vstv %s1478_s18 }
 0x116   : > { %v325_v17 = vadd.f32 %v324_v19, %v321_v14  ;;  %v368_v16 = vmul.f32 %v2664_v23, %v367_v31  ;;  %v262_v20 = vstv %s1452_s19 }
 0x118   : > { %v329_v35 = vadd.f32 %v328_v30, %v325_v17  ;;  %v816_v29 = vpop.permute.xlu1 %815 }
 0x11a   : > { %v333_v52 = vadd.f32 %v332_v21, %v329_v35 }
 0x11c   : > { %v337_v57 = vadd.f32 %v336_v45, %v333_v52 }
 0x11e   : > { %v341_v34 = vadd.f32 %v340_v49, %v337_v57 }
 0x120   : > { %v345_v24 = vadd.f32 %v344_v39, %v341_v34 }
 0x122   : > { %v349_v3 = vadd.f32 %v348_v5, %v345_v24 }
 0x124   : > { %v353_v44 = vadd.f32 %v352_v13, %v349_v3 }
 0x126   : > { %v357_v8 = vadd.f32 %v356_v28, %v353_v44 }
 0x128   : > { %v361_v53 = vadd.f32 %v360_v38, %v357_v8 }
 0x12a   : > { %v365_v55 = vadd.f32 %v364_v36, %v361_v53 }
 0x12c   : > { %v369_v25 = vadd.f32 %v368_v16, %v365_v55 }
 0x12e   : > { %v370_v22 = vadd.f32 %v369_v25, %v262_v20 }
 0x130   : > { %v482_v43 = vadd.f32 %v480_v18, %v370_v22 }
 0x132   : > { %v594_v59 = vadd.f32 %v592_v0, %v482_v43 }
 0x133   : > { %v928_v7 = vpop.permute.xlu0 %927 }
 0x134   : > { %v706_v51 = vadd.f32 %v704_v26, %v594_v59 }
 0x136   : > { %v818_v11 = vadd.f32 %v816_v29, %v706_v51 }
 0x138   : > { %v930_v63 = vadd.f32 %v928_v7, %v818_v11 }
 0x14e   : > { %v1040_v1 = vpop.permute.xlu1 %1039 }
 0x14f   : > { %v1042_v33 = vadd.f32 %v1040_v1, %v930_v63 }
 0x169   : > { %v1152_v12 = vpop.permute.xlu0 %1151 }
 0x16a   : > { %v1154_v37 = vadd.f32 %v1152_v12, %v1042_v33 }
 0x184   : > { %v1264_v23 = vpop.permute.xlu1 %1263 }
 0x185   : > { %v1266_v54 = vadd.f32 %v1264_v23, %v1154_v37 }
 0x187   : > { %1740 = vtanh.f32 %v1266_v54 }
 0x194   : > { %v1741_v27 = vpop.eup %1740 }
 0x195   : > { %v1268_v40 = vmax.f32 %v1741_v27, 0.0 }
 0x197   : > { %1270 = vst.msk [vmem:[%s177_s23] sm:$0xff] %vm1269_vm0, %v1268_v40 }
 0x198 PF: > { %s13_s11 = sadd.s32 1, %s1810_s11   ;;  %s2848_s9 = smov %s1806_s10 }
 0x199   : > { %p10_p3 = scmp.ge.s32.totalorder %s13_s11, 10   ;;  %s2849_s10 = smov %s2851_s13 }
 0x19b   :  { %12 = sbr.rel (!%p10_p3) target bundleno = 2 (0x2), region = 90 }
 0x1a0   :  { %1298 = vsyncpa [#allocation3], 1 }
 0x1a1   :  { %1300 = vsyncpa [#allocation3 + $0x1], 1 }

</bundles_post_ra>
